<compile_context>
chip_gen: v6e
topology: v6e:2x2x1
jax: 0.10.0
libtpu: 0.0.40
codegen_flags: <defaults>
</compile_context>

<pallas_src>
import functools

import jax
import jax.numpy as jnp
from jax import lax
from jax.experimental import pallas as pl
from jax.experimental.pallas import tpu as pltpu

# ----------------------------- configuration (small) -----------------------------
B = 2            # batch
T_IMG = 1        # images per sample
FRAMES = 1       # F (single-frame)
C_IN = 4         # image channels
H_IN = W_IN = 16 # image spatial
PATCH = 8        # patch size -> n1 = n2 = 2, v = 4 tokens per image
VIS_DIM = 32     # visual feature dim

# Perceiver resampler
P_DEPTH = 2
P_HEADS = 2
P_DIM_HEAD = 16
NUM_LATENTS = 8
FF_MULT = 4

# Language model
VOCAB = 64
VOCAB_PAD = 128  # lane-dense lm-head output (sliced back to VOCAB in JAX)
D_LANG = 32
N_LAYERS = 2
L_HEADS = 2
X_HEADS = 2
X_DIM_HEAD = 16
CROSS_EVERY = 1
T_TXT = 8
MEDIA_TOKEN_ID = 3
EOC_TOKEN_ID = 2

NEG = -1e30
F32 = jnp.float32
BF16 = jnp.bfloat16


# ----------------------------- in-kernel helpers -----------------------------
def _ln(x, g, b, eps=1e-5):
    x = x.astype(F32)
    mu = jnp.mean(x, axis=-1, keepdims=True)
    var = jnp.mean(jnp.square(x - mu), axis=-1, keepdims=True)
    return (x - mu) * lax.rsqrt(var + eps) * g + b


def _gelu(x):
    # tanh-approximate GELU (EUP tanh); see TODO(synk) above.
    c = 0.7978845608028654  # sqrt(2/pi)
    return 0.5 * x * (1.0 + jnp.tanh(c * (x + 0.044715 * x * x * x)))


def _softmax(sim):
    sim = sim - jnp.max(sim, axis=-1, keepdims=True)
    p = jnp.exp(sim)
    return p * pl.reciprocal(jnp.sum(p, axis=-1, keepdims=True), approx=True)


def _attn_fold_out(q, k, v, wo, heads, dim_head, valid=None):
    """Multi-head attention with the output projection folded per head.
    q: (Nq, h*dh) f32 (scale already folded into wq), k/v: (Nk, h*dh) f32,
    wo: (h*dh, d_out) bf16, valid: optional (Nq, Nk) bool mask.
    Returns (Nq, d_out) f32 without any lane-axis head concat."""
    out = jnp.zeros((q.shape[0], wo.shape[1]), F32)
    for h in range(heads):
        sl = slice(h * dim_head, (h + 1) * dim_head)
        sim = lax.dot_general(q[:, sl].astype(BF16), k[:, sl].astype(BF16),
                              (((1,), (1,)), ((), ())), preferred_element_type=F32)
        if valid is not None:
            sim = jnp.where(valid, sim, NEG)
        attn = _softmax(sim)
        oh = jnp.dot(attn.astype(BF16), v[:, sl].astype(BF16),
                     preferred_element_type=F32)
        out = out + jnp.dot(oh.astype(BF16), wo[sl, :], preferred_element_type=F32)
    return out


def _attn_two_seg_fold_out(q, k1, v1, k2, v2, wo, heads, dim_head):
    """Like _attn_fold_out, but keys/values arrive in two row segments
    (media features + latents) joined by an online softmax -> avoids the
    non-8-aligned sublane concat of the perceiver kv input."""
    out = jnp.zeros((q.shape[0], wo.shape[1]), F32)
    for h in range(heads):
        sl = slice(h * dim_head, (h + 1) * dim_head)
        qh = q[:, sl].astype(BF16)
        s1 = lax.dot_general(qh, k1[:, sl].astype(BF16), (((1,), (1,)), ((), ())),
                             preferred_element_type=F32)
        s2 = lax.dot_general(qh, k2[:, sl].astype(BF16), (((1,), (1,)), ((), ())),
                             preferred_element_type=F32)
        m = jnp.maximum(jnp.max(s1, -1, keepdims=True), jnp.max(s2, -1, keepdims=True))
        p1 = jnp.exp(s1 - m)
        p2 = jnp.exp(s2 - m)
        inv = pl.reciprocal(jnp.sum(p1, -1, keepdims=True)
                            + jnp.sum(p2, -1, keepdims=True), approx=True)
        oh = (jnp.dot(p1.astype(BF16), v1[:, sl].astype(BF16), preferred_element_type=F32)
              + jnp.dot(p2.astype(BF16), v2[:, sl].astype(BF16), preferred_element_type=F32)) * inv
        out = out + jnp.dot(oh.astype(BF16), wo[sl, :], preferred_element_type=F32)
    return out


# ----------------------------- fused Pallas kernels -----------------------------
def _vision_perceiver_kernel(patches_ref, wp_ref, bp_ref, lat0_ref,
                             lnm_g, lnm_b, lnl_g, lnl_b, wq, wkv, wo,
                             ffg, ffb, fw1, fw2, ng, nb,
                             o_ref, lat_sc,
                             *, heads, dim_head, groups, n_in, n_lat):
    """One grid step = one perceiver layer.  Patch-embed is (re)computed from the
    resident patches block (trivial at this size); latents carried in VMEM scratch."""
    l = pl.program_id(0)
    inner = heads * dim_head

    @pl.when(l == 0)
    def _():
        lat_sc[...] = jnp.concatenate([lat0_ref[...]] * groups, axis=0)

    # synthetic vision encoder: patch-embed "conv" as a single matmul.
    feat = jnp.dot(patches_ref[...].astype(BF16), wp_ref[...],
                   preferred_element_type=F32) + bp_ref[...]          # (G*n_in, d)
    lat = lat_sc[...]                                                 # (G*n_lat, d)

    xn = _ln(feat, lnm_g[0], lnm_b[0])
    ltn = _ln(lat, lnl_g[0], lnl_b[0])

    q = jnp.dot(ltn.astype(BF16), wq[0], preferred_element_type=F32)      # pre-scaled wq
    kv_x = jnp.dot(xn.astype(BF16), wkv[0], preferred_element_type=F32)   # (G*n_in, 2*inner)
    kv_l = jnp.dot(ltn.astype(BF16), wkv[0], preferred_element_type=F32)  # (G*n_lat, 2*inner)

    outs = []
    for g in range(groups):
        qs = slice(g * n_lat, (g + 1) * n_lat)
        ms = slice(g * n_in, (g + 1) * n_in)
        outs.append(_attn_two_seg_fold_out(
            q[qs], kv_x[ms, :inner], kv_x[ms, inner:],
            kv_l[qs, :inner], kv_l[qs, inner:],
            wo[0], heads, dim_head))
    lat = lat + jnp.concatenate(outs, axis=0)

    # feed-forward (no biases)
    h = _ln(lat, ffg[0], ffb[0])
    h = _gelu(jnp.dot(h.astype(BF16), fw1[0], preferred_element_type=F32))
    lat = lat + jnp.dot(h.astype(BF16), fw2[0], preferred_element_type=F32)

    lat_sc[...] = lat
    # final norm written every step; the last step's value is what gets written back.
    o_ref[...] = _ln(lat, ng[...], nb[...])


def _lang_kernel(x_ref, media_ref, tt_ref, pad_ref, gates_ref,
                 cln_g, cln_b, cwq, cwkv, cwo, cffg, cffb, cfw1, cfw2,
                 ln1_g, ln1_b, w_qkv, b_qkv, dwo, dbo, ln2_g, ln2_b, w1, b1, w2, b2,
                 lnf_g, lnf_b, lm_w,
                 o_ref, state_sc,
                 *, x_heads, x_dim_head, l_heads, batch, n_txt, n_media, n_lat):
    """One grid step = one (gated cross-attn + decoder) layer; the last step also
    produces the lane-dense padded-vocab logits.  Residual state lives in scratch."""
    l = pl.program_id(0)
    d = state_sc.shape[-1]
    dh = d // l_heads
    x_inner = x_heads * x_dim_head

    @pl.when(l == 0)
    def _():
        state_sc[...] = x_ref[...]

    x = state_sc[...]                                                  # (B*n_txt, d)

    # ---------------- gated cross-attention block ----------------
    g_attn = gates_ref[l, 0]
    g_ff = gates_ref[l, 1]

    xn = _ln(x, cln_g[0], cln_b[0])
    q = jnp.dot(xn.astype(BF16), cwq[0], preferred_element_type=F32)          # (B*n, x_inner)
    kv = jnp.dot(media_ref[...].astype(BF16), cwkv[0], preferred_element_type=F32)

    kcol = lax.broadcasted_iota(jnp.int32, (n_txt, n_media), 1)
    outs = []
    for b in range(batch):
        ts = slice(b * n_txt, (b + 1) * n_txt)
        ms = slice(b * n_media, (b + 1) * n_media)
        tt = tt_ref[b]                                                 # (n_txt, 1) int32
        # only_attend_immediate_media: text_time == media_time of the latent chunk.
        valid = (kcol >= (tt - 1) * n_lat) & (kcol < tt * n_lat)
        ob = _attn_fold_out(q[ts], kv[ms, :x_inner], kv[ms, x_inner:],
                            cwo[0], x_heads, x_dim_head, valid=valid)
        ob = jnp.where(tt > 0, ob, 0.0)        # tokens with no preceding media
        outs.append(ob)
    x = x + g_attn * jnp.concatenate(outs, axis=0)

    h = _ln(x, cffg[0], cffb[0])
    h = _gelu(jnp.dot(h.astype(BF16), cfw1[0], preferred_element_type=F32))
    x = x + g_ff * jnp.dot(h.astype(BF16), cfw2[0], preferred_element_type=F32)

    # ---------------- decoder self-attention layer ----------------
    xn = _ln(x, ln1_g[0], ln1_b[0])
    qkv = jnp.dot(xn.astype(BF16), w_qkv[0], preferred_element_type=F32) + b_qkv[0]

    row = lax.broadcasted_iota(jnp.int32, (n_txt, n_txt), 0)
    col = lax.broadcasted_iota(jnp.int32, (n_txt, n_txt), 1)
    causal = row >= col
    outs = []
    for b in range(batch):
        ts = slice(b * n_txt, (b + 1) * n_txt)
        valid = causal & (pad_ref[b] > 0)                              # (n,n) & (1,n)
        outs.append(_attn_fold_out(qkv[ts, :d], qkv[ts, d:2 * d], qkv[ts, 2 * d:],
                                   dwo[0], l_heads, dh, valid=valid))
    x = x + jnp.concatenate(outs, axis=0) + dbo[0]

    xn = _ln(x, ln2_g[0], ln2_b[0])
    h = _gelu(jnp.dot(xn.astype(BF16), w1[0], preferred_element_type=F32) + b1[0])
    x = x + jnp.dot(h.astype(BF16), w2[0], preferred_element_type=F32) + b2[0]

    state_sc[...] = x
    # final LN + lm-head (lane-dense 128-wide) written every step; last step wins.
    o_ref[...] = jnp.dot(_ln(x, lnf_g[...], lnf_b[...]).astype(BF16), lm_w[...],
                         preferred_element_type=F32)


# ----------------------------- BlockSpec helpers -----------------------------
def _resident(a):
    # full array, same block every layer step (Pallas skips the redundant re-DMA)
    return pl.BlockSpec(a.shape, lambda l, _nd=a.ndim: (0,) * _nd)


def _stacked(a):
    # per-layer slab of a weight stacked on a leading layer axis
    return pl.BlockSpec((1,) + a.shape[1:],
                        lambda l, _nd=a.ndim: (l,) + (0,) * (_nd - 1))


# ----------------------------- Pallas wrappers -----------------------------
def pallas_vision_perceiver(params, vision_x):
    """Patch-embed + full PerceiverResampler in a single pallas_call."""
    Bb, T, F = vision_x.shape[:3]
    imgs = vision_x.reshape(Bb * T * F, C_IN, H_IN, W_IN)              # '(b T F) c h w'
    N = imgs.shape[0]
    n1, n2 = H_IN // PATCH, W_IN // PATCH
    patches = imgs.reshape(N, C_IN, n1, PATCH, n2, PATCH)
    patches = patches.transpose(0, 2, 4, 1, 3, 5).reshape(
        N * n1 * n2, C_IN * PATCH * PATCH)                             # im2col

    G = Bb * T
    n_in = F * n1 * n2
    d = VIS_DIM
    vp, pp = params["vis"], params["perc"]

    stacked = [pp["ln_m_g"], pp["ln_m_b"], pp["ln_l_g"], pp["ln_l_b"],
               pp["wq"], pp["wkv"], pp["wo"],
               pp["ff_ln_g"], pp["ff_ln_b"], pp["ff_w1"], pp["ff_w2"]]
    tail = [pp["norm_g"], pp["norm_b"]]

    kernel = functools.partial(_vision_perceiver_kernel,
                               heads=P_HEADS, dim_head=P_DIM_HEAD,
                               groups=G, n_in=n_in, n_lat=NUM_LATENTS)
    lat = pl.pallas_call(
        kernel,
        grid=(P_DEPTH,),
        in_specs=[_resident(patches), _resident(vp["w_patch"]), _resident(vp["b_patch"]),
                  _resident(pp["latents"])]
                 + [_stacked(w) for w in stacked]
                 + [_resident(w) for w in tail],
        out_specs=pl.BlockSpec((G * NUM_LATENTS, d), lambda l: (0, 0)),
        out_shape=jax.ShapeDtypeStruct((G * NUM_LATENTS, d), F32),
        scratch_shapes=[pltpu.VMEM((G * NUM_LATENTS, d), F32)],
        compiler_params=pltpu.CompilerParams(dimension_semantics=("arbitrary",)),
    )(patches, vp["w_patch"], vp["b_patch"], pp["latents"], *stacked, *tail)
    return lat.reshape(Bb, T, NUM_LATENTS, d)                          # (B, T, n_lat, d)


def pallas_lang_model(lang_p, x_emb, media, text_time, pad_mask):
    """All N_LAYERS (gated xattn + decoder) layers + final LN + lm-head fused."""
    Bb, n, d = x_emb.shape
    n_media, dv = media.shape[1], media.shape[2]
    x_flat = x_emb.reshape(Bb * n, d)
    media_flat = media.reshape(Bb * n_media, dv)

    cross = lang_p["cross"]
    dec = lang_p["dec"]
    cross_stacked = [cross[k] for k in
                     ("ln_g", "ln_b", "wq", "wkv", "wo",
                      "ff_ln_g", "ff_ln_b", "ff_w1", "ff_w2")]
    dec_stacked = [dec[k] for k in
                   ("ln1_g", "ln1_b", "w_qkv", "b_qkv", "wo", "bo",
                    "ln2_g", "ln2_b", "w1", "b1", "w2", "b2")]
    head = [lang_p["lnf_g"], lang_p["lnf_b"], lang_p["lm_head_pad"]]

    kernel = functools.partial(_lang_kernel,
                               x_heads=X_HEADS, x_dim_head=X_DIM_HEAD,
                               l_heads=L_HEADS, batch=Bb, n_txt=n,
                               n_media=n_media, n_lat=NUM_LATENTS)
    logits = pl.pallas_call(
        kernel,
        grid=(N_LAYERS,),
        in_specs=[_resident(x_flat), _resident(media_flat),
                  _resident(text_time), _resident(pad_mask),
                  pl.BlockSpec(memory_space=pltpu.MemorySpace.SMEM)]
                 + [_stacked(w) for w in cross_stacked]
                 + [_stacked(w) for w in dec_stacked]
                 + [_resident(w) for w in head],
        out_specs=pl.BlockSpec((Bb * n, VOCAB_PAD), lambda l: (0, 0)),
        out_shape=jax.ShapeDtypeStruct((Bb * n, VOCAB_PAD), F32),
        scratch_shapes=[pltpu.VMEM((Bb * n, d), F32)],
        compiler_params=pltpu.CompilerParams(dimension_semantics=("arbitrary",)),
    )(x_flat, media_flat, text_time, pad_mask, lang_p["gates"],
      *cross_stacked, *dec_stacked, *head)
    return logits[:, :VOCAB].reshape(Bb, n, VOCAB)


# ----------------------------- model forward -----------------------------
def flamingo_forward(params, vision_x, lang_x, attention_mask=None):
    # _encode_vision_x: vision encoder + perceiver resampler (1 pallas_call)
    vis = pallas_vision_perceiver(params, vision_x)                    # (B, T, n_lat, d)

    # conditioned language model (1 pallas_call)
    Bb, n = lang_x.shape
    x = jnp.take(params["lang"]["tok_emb"], lang_x, axis=0)            # (B, n, d_lang)
    # attend_previous=True, only_attend_immediate_media=True
    text_time = jnp.cumsum((lang_x == MEDIA_TOKEN_ID).astype(jnp.int32),
                           axis=-1)[..., None]                         # (B, n, 1)
    if attention_mask is None:
        pad = jnp.ones((Bb, 1, n), jnp.int32)
    else:
        pad = attention_mask.astype(jnp.int32).reshape(Bb, 1, n)
    T, n_lat, dv = vis.shape[1], vis.shape[2], vis.shape[3]
    media = vis.reshape(Bb, T * n_lat, dv)
    return pallas_lang_model(params["lang"], x, media, text_time, pad)  # (B, n, VOCAB)


# ----------------------------- deterministic init -----------------------------
class KeyGen:
    def __init__(self, key):
        self.key = key

    def __call__(self):
        self.key, sub = jax.random.split(self.key)
        return sub


def init_params(key):
    kg = KeyGen(key)

    def nrm(*shape, scale=0.02, dtype=BF16):
        # matmul weights are stored bf16 (MXU operands); everything else f32
        return (scale * jax.random.normal(kg(), shape, F32)).astype(dtype)

    def ones_rows(L, d):
        return jnp.ones((L, 1, d), F32)

    def zeros_rows(L, d):
        return jnp.zeros((L, 1, d), F32)

    vis = dict(w_patch=nrm(C_IN * PATCH * PATCH, VIS_DIM),
               b_patch=jnp.zeros((1, VIS_DIM), F32))

    # ---- perceiver (per-layer weights stacked on a leading layer axis) ----
    p_inner = P_HEADS * P_DIM_HEAD
    p_scale = P_DIM_HEAD ** -0.5
    perc = dict(
        latents=nrm(NUM_LATENTS, VIS_DIM, scale=1.0, dtype=F32),
        ln_m_g=ones_rows(P_DEPTH, VIS_DIM), ln_m_b=zeros_rows(P_DEPTH, VIS_DIM),
        ln_l_g=ones_rows(P_DEPTH, VIS_DIM), ln_l_b=zeros_rows(P_DEPTH, VIS_DIM),
        # softmax scale folded into wq at init
        wq=(nrm(P_DEPTH, VIS_DIM, p_inner, dtype=F32) * p_scale).astype(BF16),
        wkv=nrm(P_DEPTH, VIS_DIM, 2 * p_inner),
        wo=nrm(P_DEPTH, p_inner, VIS_DIM),
        ff_ln_g=ones_rows(P_DEPTH, VIS_DIM), ff_ln_b=zeros_rows(P_DEPTH, VIS_DIM),
        ff_w1=nrm(P_DEPTH, VIS_DIM, FF_MULT * VIS_DIM),
        ff_w2=nrm(P_DEPTH, FF_MULT * VIS_DIM, VIS_DIM),
        norm_g=jnp.ones((1, VIS_DIM), F32), norm_b=jnp.zeros((1, VIS_DIM), F32),
    )

    # ---- language model (stacked layer weights) ----
    L = N_LAYERS
    x_inner = X_HEADS * X_DIM_HEAD
    x_scale = X_DIM_HEAD ** -0.5
    cross = dict(
        ln_g=ones_rows(L, D_LANG), ln_b=zeros_rows(L, D_LANG),
        wq=(nrm(L, D_LANG, x_inner, dtype=F32) * x_scale).astype(BF16),
        wkv=nrm(L, VIS_DIM, 2 * x_inner),
        wo=nrm(L, x_inner, D_LANG),
        ff_ln_g=ones_rows(L, D_LANG), ff_ln_b=zeros_rows(L, D_LANG),
        ff_w1=nrm(L, D_LANG, FF_MULT * D_LANG),
        ff_w2=nrm(L, FF_MULT * D_LANG, D_LANG),
    )
    l_scale = (D_LANG // L_HEADS) ** -0.5
    w_qkv = nrm(L, D_LANG, 3 * D_LANG, dtype=F32)
    w_qkv = w_qkv.at[:, :, :D_LANG].multiply(l_scale)   # fold attn scale into Q proj
    dec = dict(
        ln1_g=ones_rows(L, D_LANG), ln1_b=zeros_rows(L, D_LANG),
        w_qkv=w_qkv.astype(BF16), b_qkv=jnp.zeros((L, 1, 3 * D_LANG), F32),
        wo=nrm(L, D_LANG, D_LANG), bo=jnp.zeros((L, 1, D_LANG), F32),
        ln2_g=ones_rows(L, D_LANG), ln2_b=zeros_rows(L, D_LANG),
        w1=nrm(L, D_LANG, 4 * D_LANG), b1=jnp.zeros((L, 1, 4 * D_LANG), F32),
        w2=nrm(L, 4 * D_LANG, D_LANG), b2=jnp.zeros((L, 1, D_LANG), F32),
    )

    # tanh gates per layer (attn, ff).  gate == 0 exactly reproduces "no cross
    # block on this layer"; NOTE: original module inits gates to 0.0 (tanh(0)
    # disables the path) - use 0.5 on cross layers so the path is exercised.
    gate_raw = jnp.array([0.5 if (li + 1) % CROSS_EVERY == 0 else 0.0
                          for li in range(L)], F32)
    gates = jnp.stack([jnp.tanh(gate_raw), jnp.tanh(gate_raw)], axis=-1)   # (L, 2)

    lm_head = nrm(D_LANG, VOCAB, dtype=F32)
    lm_head_pad = jnp.pad(lm_head, ((0, 0), (0, VOCAB_PAD - VOCAB))).astype(BF16)
    lang = dict(tok_emb=nrm(VOCAB, D_LANG, dtype=F32),
                cross=cross, dec=dec, gates=gates,
                lnf_g=jnp.ones((1, D_LANG), F32), lnf_b=jnp.zeros((1, D_LANG), F32),
                lm_head_pad=lm_head_pad)
    return dict(vis=vis, perc=perc, lang=lang)


# ----------------------------- main -----------------------------
if __name__ == "__main__":
    root = jax.random.PRNGKey(0)
    kp, kv, kl = jax.random.split(root, 3)
    params = init_params(kp)

    vision_x = jax.random.normal(kv, (B, T_IMG, FRAMES, C_IN, H_IN, W_IN), F32)
    lang_x = jax.random.randint(kl, (B, T_TXT), 4, VOCAB, dtype=jnp.int32)
    lang_x = lang_x.at[:, 0].set(MEDIA_TOKEN_ID).at[:, -1].set(EOC_TOKEN_ID)

    fwd = jax.jit(flamingo_forward)
    logits = fwd(params, vision_x, lang_x)
    jax.block_until_ready(logits)

    assert logits.shape == (B, T_TXT, VOCAB), logits.shape
    assert bool(jnp.all(jnp.isfinite(logits)))
    print("KERNEL_OK")
</pallas_src>

<mosaic_0001>
module attributes {stable_mosaic.version = 11 : i64} {
  func.func @_vision_perceiver_kernel(%arg0: i32, %arg1: memref<8x256xf32, #tpu.memory_space<vmem>>, %arg2: memref<256x32xbf16, #tpu.memory_space<vmem>>, %arg3: memref<1x32xf32, #tpu.memory_space<vmem>>, %arg4: memref<8x32xf32, #tpu.memory_space<vmem>>, %arg5: memref<1x1x32xf32, #tpu.memory_space<vmem>>, %arg6: memref<1x1x32xf32, #tpu.memory_space<vmem>>, %arg7: memref<1x1x32xf32, #tpu.memory_space<vmem>>, %arg8: memref<1x1x32xf32, #tpu.memory_space<vmem>>, %arg9: memref<1x32x32xbf16, #tpu.memory_space<vmem>>, %arg10: memref<1x32x64xbf16, #tpu.memory_space<vmem>>, %arg11: memref<1x32x32xbf16, #tpu.memory_space<vmem>>, %arg12: memref<1x1x32xf32, #tpu.memory_space<vmem>>, %arg13: memref<1x1x32xf32, #tpu.memory_space<vmem>>, %arg14: memref<1x32x128xbf16, #tpu.memory_space<vmem>>, %arg15: memref<1x128x32xbf16, #tpu.memory_space<vmem>>, %arg16: memref<1x32xf32, #tpu.memory_space<vmem>>, %arg17: memref<1x32xf32, #tpu.memory_space<vmem>>, %arg18: memref<16x32xf32, #tpu.memory_space<vmem>>, %arg19: memref<16x32xf32, #tpu.memory_space<vmem>>) attributes {dimension_semantics = [#tpu.dimension_semantics<arbitrary>], iteration_bounds = array<i64: 2>, scalar_prefetch = 0 : i64, scratch_operands = 1 : i64, tpu.core_type = #tpu.core_type<tc>, window_params = [{pipeline_mode = #tpu.pipeline_mode<synchronous>, transform_indices = @transform_0, window_bounds = array<i64: 8, 256>}, {pipeline_mode = #tpu.pipeline_mode<synchronous>, transform_indices = @transform_1, window_bounds = array<i64: 256, 32>}, {pipeline_mode = #tpu.pipeline_mode<synchronous>, transform_indices = @transform_2, window_bounds = array<i64: 1, 32>}, {pipeline_mode = #tpu.pipeline_mode<synchronous>, transform_indices = @transform_3, window_bounds = array<i64: 8, 32>}, {transform_indices = @transform_4, window_bounds = array<i64: 1, 1, 32>}, {transform_indices = @transform_5, window_bounds = array<i64: 1, 1, 32>}, {transform_indices = @transform_6, window_bounds = array<i64: 1, 1, 32>}, {transform_indices = @transform_7, window_bounds = array<i64: 1, 1, 32>}, {transform_indices = @transform_8, window_bounds = array<i64: 1, 32, 32>}, {transform_indices = @transform_9, window_bounds = array<i64: 1, 32, 64>}, {transform_indices = @transform_10, window_bounds = array<i64: 1, 32, 32>}, {transform_indices = @transform_11, window_bounds = array<i64: 1, 1, 32>}, {transform_indices = @transform_12, window_bounds = array<i64: 1, 1, 32>}, {transform_indices = @transform_13, window_bounds = array<i64: 1, 32, 128>}, {transform_indices = @transform_14, window_bounds = array<i64: 1, 128, 32>}, {pipeline_mode = #tpu.pipeline_mode<synchronous>, transform_indices = @transform_15, window_bounds = array<i64: 1, 32>}, {pipeline_mode = #tpu.pipeline_mode<synchronous>, transform_indices = @transform_16, window_bounds = array<i64: 1, 32>}, {pipeline_mode = #tpu.pipeline_mode<synchronous>, transform_indices = @transform_17, window_bounds = array<i64: 16, 32>}]} {
    %c0_i32 = arith.constant 0 : i32
    %0 = arith.cmpi eq, %arg0, %c0_i32 : i32
    %1 = arith.extui %0 : i1 to i32
    %c0_i32_0 = arith.constant 0 : i32
    %2 = arith.cmpi ne, %1, %c0_i32_0 : i32
    scf.if %2 {
      %c0_122 = arith.constant 0 : index
      %c0_123 = arith.constant 0 : index
      %327 = vector.load %arg4[%c0_122, %c0_123] : memref<8x32xf32, #tpu.memory_space<vmem>>, vector<8x32xf32>
      %328 = tpu.concatenate %327, %327 in 0 : vector<8x32xf32>, vector<8x32xf32> -> vector<16x32xf32>
      %c0_124 = arith.constant 0 : index
      %c0_125 = arith.constant 0 : index
      %329 = vector.load %arg19[%c0_124, %c0_125] : memref<16x32xf32, #tpu.memory_space<vmem>>, vector<16x32xf32>
      tpu.vector_store %arg19[%c0_124, %c0_125], %328 {strides = array<i32>} : memref<16x32xf32, #tpu.memory_space<vmem>>, vector<16x32xf32>,
    } else {
    }
    %c0 = arith.constant 0 : index
    %c0_1 = arith.constant 0 : index
    %3 = vector.load %arg1[%c0, %c0_1] : memref<8x256xf32, #tpu.memory_space<vmem>>, vector<8x256xf32>
    %4 = arith.truncf %3 : vector<8x256xf32> to vector<8x256xbf16>
    %c0_2 = arith.constant 0 : index
    %c0_3 = arith.constant 0 : index
    %5 = vector.load %arg2[%c0_2, %c0_3] : memref<256x32xbf16, #tpu.memory_space<vmem>>, vector<256x32xbf16>
    %cst = arith.constant dense<0.000000e+00> : vector<8x32xf32>
    %6 = tpu.matmul %4, %5, %cst {dimension_numbers = #tpu.dot_dimension_numbers<[1], [0], [0], [1], [0, 0, 1, 1], [], []>} : vector<8x256xbf16>, vector<256x32xbf16>, vector<8x32xf32> -> vector<8x32xf32>
    %c0_4 = arith.constant 0 : index
    %c0_5 = arith.constant 0 : index
    %7 = vector.load %arg3[%c0_4, %c0_5] : memref<1x32xf32, #tpu.memory_space<vmem>>, vector<1x32xf32>
    %8 = vector.broadcast %7 : vector<1x32xf32> to vector<8x32xf32>
    %9 = arith.addf %6, %8 : vector<8x32xf32>
    %c0_6 = arith.constant 0 : index
    %c0_7 = arith.constant 0 : index
    %10 = vector.load %arg19[%c0_6, %c0_7] : memref<16x32xf32, #tpu.memory_space<vmem>>, vector<16x32xf32>
    %c0_8 = arith.constant 0 : index
    %c0_9 = arith.constant 0 : index
    %c0_10 = arith.constant 0 : index
    %11 = vector.load %arg5[%c0_8, %c0_9, %c0_10] : memref<1x1x32xf32, #tpu.memory_space<vmem>>, vector<1x1x32xf32>
    %12 = vector.shape_cast %11 : vector<1x1x32xf32> to vector<1x32xf32>
    %c0_11 = arith.constant 0 : index
    %c0_12 = arith.constant 0 : index
    %c0_13 = arith.constant 0 : index
    %13 = vector.load %arg6[%c0_11, %c0_12, %c0_13] : memref<1x1x32xf32, #tpu.memory_space<vmem>>, vector<1x1x32xf32>
    %14 = vector.shape_cast %13 : vector<1x1x32xf32> to vector<1x32xf32>
    %cst_14 = arith.constant dense<0.000000e+00> : vector<8xf32>
    %15 = vector.multi_reduction <add>, %9, %cst_14 [1] : vector<8x32xf32> to vector<8xf32>
    %16 = vector.shape_cast %15 : vector<8xf32> to vector<8x1xf32>
    %cst_15 = arith.constant 3.200000e+01 : f32
    %17 = vector.broadcast %cst_15 : f32 to vector<8x1xf32>
    %18 = arith.divf %16, %17 : vector<8x1xf32>
    %19 = vector.broadcast %18 : vector<8x1xf32> to vector<8x32xf32>
    %20 = arith.subf %9, %19 : vector<8x32xf32>
    %21 = arith.mulf %20, %20 : vector<8x32xf32>
    %cst_16 = arith.constant dense<0.000000e+00> : vector<8xf32>
    %22 = vector.multi_reduction <add>, %21, %cst_16 [1] : vector<8x32xf32> to vector<8xf32>
    %23 = vector.shape_cast %22 : vector<8xf32> to vector<8x1xf32>
    %cst_17 = arith.constant 3.200000e+01 : f32
    %24 = vector.broadcast %cst_17 : f32 to vector<8x1xf32>
    %25 = arith.divf %23, %24 : vector<8x1xf32>
    %26 = vector.broadcast %18 : vector<8x1xf32> to vector<8x32xf32>
    %27 = arith.subf %9, %26 : vector<8x32xf32>
    %cst_18 = arith.constant 9.99999974E-6 : f32
    %28 = vector.broadcast %cst_18 : f32 to vector<8x1xf32>
    %29 = arith.addf %25, %28 : vector<8x1xf32>
    %30 = math.rsqrt %29 : vector<8x1xf32>
    %31 = vector.broadcast %30 : vector<8x1xf32> to vector<8x32xf32>
    %32 = arith.mulf %27, %31 : vector<8x32xf32>
    %33 = vector.broadcast %12 : vector<1x32xf32> to vector<8x32xf32>
    %34 = arith.mulf %32, %33 : vector<8x32xf32>
    %35 = vector.broadcast %14 : vector<1x32xf32> to vector<8x32xf32>
    %36 = arith.addf %34, %35 : vector<8x32xf32>
    %c0_19 = arith.constant 0 : index
    %c0_20 = arith.constant 0 : index
    %c0_21 = arith.constant 0 : index
    %37 = vector.load %arg7[%c0_19, %c0_20, %c0_21] : memref<1x1x32xf32, #tpu.memory_space<vmem>>, vector<1x1x32xf32>
    %38 = vector.shape_cast %37 : vector<1x1x32xf32> to vector<1x32xf32>
    %c0_22 = arith.constant 0 : index
    %c0_23 = arith.constant 0 : index
    %c0_24 = arith.constant 0 : index
    %39 = vector.load %arg8[%c0_22, %c0_23, %c0_24] : memref<1x1x32xf32, #tpu.memory_space<vmem>>, vector<1x1x32xf32>
    %40 = vector.shape_cast %39 : vector<1x1x32xf32> to vector<1x32xf32>
    %cst_25 = arith.constant dense<0.000000e+00> : vector<16xf32>
    %41 = vector.multi_reduction <add>, %10, %cst_25 [1] : vector<16x32xf32> to vector<16xf32>
    %42 = vector.shape_cast %41 : vector<16xf32> to vector<16x1xf32>
    %cst_26 = arith.constant 3.200000e+01 : f32
    %43 = vector.broadcast %cst_26 : f32 to vector<16x1xf32>
    %44 = arith.divf %42, %43 : vector<16x1xf32>
    %45 = vector.broadcast %44 : vector<16x1xf32> to vector<16x32xf32>
    %46 = arith.subf %10, %45 : vector<16x32xf32>
    %47 = arith.mulf %46, %46 : vector<16x32xf32>
    %cst_27 = arith.constant dense<0.000000e+00> : vector<16xf32>
    %48 = vector.multi_reduction <add>, %47, %cst_27 [1] : vector<16x32xf32> to vector<16xf32>
    %49 = vector.shape_cast %48 : vector<16xf32> to vector<16x1xf32>
    %cst_28 = arith.constant 3.200000e+01 : f32
    %50 = vector.broadcast %cst_28 : f32 to vector<16x1xf32>
    %51 = arith.divf %49, %50 : vector<16x1xf32>
    %52 = vector.broadcast %44 : vector<16x1xf32> to vector<16x32xf32>
    %53 = arith.subf %10, %52 : vector<16x32xf32>
    %cst_29 = arith.constant 9.99999974E-6 : f32
    %54 = vector.broadcast %cst_29 : f32 to vector<16x1xf32>
    %55 = arith.addf %51, %54 : vector<16x1xf32>
    %56 = math.rsqrt %55 : vector<16x1xf32>
    %57 = vector.broadcast %56 : vector<16x1xf32> to vector<16x32xf32>
    %58 = arith.mulf %53, %57 : vector<16x32xf32>
    %59 = vector.broadcast %38 : vector<1x32xf32> to vector<16x32xf32>
    %60 = arith.mulf %58, %59 : vector<16x32xf32>
    %61 = vector.broadcast %40 : vector<1x32xf32> to vector<16x32xf32>
    %62 = arith.addf %60, %61 : vector<16x32xf32>
    %63 = arith.truncf %62 : vector<16x32xf32> to vector<16x32xbf16>
    %c0_30 = arith.constant 0 : index
    %c0_31 = arith.constant 0 : index
    %c0_32 = arith.constant 0 : index
    %64 = vector.load %arg9[%c0_30, %c0_31, %c0_32] : memref<1x32x32xbf16, #tpu.memory_space<vmem>>, vector<1x32x32xbf16>
    %65 = vector.shape_cast %64 : vector<1x32x32xbf16> to vector<32x32xbf16>
    %cst_33 = arith.constant dense<0.000000e+00> : vector<16x32xf32>
    %66 = tpu.matmul %63, %65, %cst_33 {dimension_numbers = #tpu.dot_dimension_numbers<[1], [0], [0], [1], [0, 0, 1, 1], [], []>} : vector<16x32xbf16>, vector<32x32xbf16>, vector<16x32xf32> -> vector<16x32xf32>
    %67 = arith.truncf %36 : vector<8x32xf32> to vector<8x32xbf16>
    %c0_34 = arith.constant 0 : index
    %c0_35 = arith.constant 0 : index
    %c0_36 = arith.constant 0 : index
    %68 = vector.load %arg10[%c0_34, %c0_35, %c0_36] : memref<1x32x64xbf16, #tpu.memory_space<vmem>>, vector<1x32x64xbf16>
    %69 = vector.shape_cast %68 : vector<1x32x64xbf16> to vector<32x64xbf16>
    %cst_37 = arith.constant dense<0.000000e+00> : vector<8x64xf32>
    %70 = tpu.matmul %67, %69, %cst_37 {dimension_numbers = #tpu.dot_dimension_numbers<[1], [0], [0], [1], [0, 0, 1, 1], [], []>} : vector<8x32xbf16>, vector<32x64xbf16>, vector<8x64xf32> -> vector<8x64xf32>
    %71 = arith.truncf %62 : vector<16x32xf32> to vector<16x32xbf16>
    %c0_38 = arith.constant 0 : index
    %c0_39 = arith.constant 0 : index
    %c0_40 = arith.constant 0 : index
    %72 = vector.load %arg10[%c0_38, %c0_39, %c0_40] : memref<1x32x64xbf16, #tpu.memory_space<vmem>>, vector<1x32x64xbf16>
    %73 = vector.shape_cast %72 : vector<1x32x64xbf16> to vector<32x64xbf16>
    %cst_41 = arith.constant dense<0.000000e+00> : vector<16x64xf32>
    %74 = tpu.matmul %71, %73, %cst_41 {dimension_numbers = #tpu.dot_dimension_numbers<[1], [0], [0], [1], [0, 0, 1, 1], [], []>} : vector<16x32xbf16>, vector<32x64xbf16>, vector<16x64xf32> -> vector<16x64xf32>
    %75 = vector.extract_strided_slice %66 {offsets = [0, 0], sizes = [8, 32], strides = [1, 1]} : vector<16x32xf32> to vector<8x32xf32>
    %76 = vector.extract_strided_slice %70 {offsets = [0, 0], sizes = [4, 32], strides = [1, 1]} : vector<8x64xf32> to vector<4x32xf32>
    %77 = vector.extract_strided_slice %70 {offsets = [0, 32], sizes = [4, 32], strides = [1, 1]} : vector<8x64xf32> to vector<4x32xf32>
    %78 = vector.extract_strided_slice %74 {offsets = [0, 0], sizes = [8, 32], strides = [1, 1]} : vector<16x64xf32> to vector<8x32xf32>
    %79 = vector.extract_strided_slice %74 {offsets = [0, 32], sizes = [8, 32], strides = [1, 1]} : vector<16x64xf32> to vector<8x32xf32>
    %c0_42 = arith.constant 0 : index
    %c0_43 = arith.constant 0 : index
    %c0_44 = arith.constant 0 : index
    %80 = vector.load %arg11[%c0_42, %c0_43, %c0_44] : memref<1x32x32xbf16, #tpu.memory_space<vmem>>, vector<1x32x32xbf16>
    %81 = vector.shape_cast %80 : vector<1x32x32xbf16> to vector<32x32xbf16>
    %cst_45 = arith.constant 0.000000e+00 : f32
    %82 = vector.broadcast %cst_45 : f32 to vector<8x32xf32>
    %83 = vector.extract_strided_slice %75 {offsets = [0, 0], sizes = [8, 16], strides = [1, 1]} : vector<8x32xf32> to vector<8x16xf32>
    %84 = arith.truncf %83 : vector<8x16xf32> to vector<8x16xbf16>
    %85 = vector.extract_strided_slice %76 {offsets = [0, 0], sizes = [4, 16], strides = [1, 1]} : vector<4x32xf32> to vector<4x16xf32>
    %86 = arith.truncf %85 : vector<4x16xf32> to vector<4x16xbf16>
    %cst_46 = arith.constant dense<0.000000e+00> : vector<8x4xf32>
    %87 = tpu.matmul %84, %86, %cst_46 {dimension_numbers = #tpu.dot_dimension_numbers<[1], [1], [0], [0], [0, 0, 1, 0], [], []>} : vector<8x16xbf16>, vector<4x16xbf16>, vector<8x4xf32> -> vector<8x4xf32>
    %88 = vector.extract_strided_slice %78 {offsets = [0, 0], sizes = [8, 16], strides = [1, 1]} : vector<8x32xf32> to vector<8x16xf32>
    %89 = arith.truncf %88 : vector<8x16xf32> to vector<8x16xbf16>
    %cst_47 = arith.constant dense<0.000000e+00> : vector<8x8xf32>
    %90 = tpu.matmul %84, %89, %cst_47 {dimension_numbers = #tpu.dot_dimension_numbers<[1], [1], [0], [0], [0, 0, 1, 0], [], []>} : vector<8x16xbf16>, vector<8x16xbf16>, vector<8x8xf32> -> vector<8x8xf32>
    %cst_48 = arith.constant dense<0xFF800000> : vector<8xf32>
    %91 = vector.multi_reduction <maximumf>, %87, %cst_48 [1] : vector<8x4xf32> to vector<8xf32>
    %92 = vector.shape_cast %91 : vector<8xf32> to vector<8x1xf32>
    %cst_49 = arith.constant dense<0xFF800000> : vector<8xf32>
    %93 = vector.multi_reduction <maximumf>, %90, %cst_49 [1] : vector<8x8xf32> to vector<8xf32>
    %94 = vector.shape_cast %93 : vector<8xf32> to vector<8x1xf32>
    %95 = arith.maximumf %92, %94 : vector<8x1xf32>
    %96 = vector.broadcast %95 : vector<8x1xf32> to vector<8x4xf32>
    %97 = arith.subf %87, %96 : vector<8x4xf32>
    %98 = math.exp %97 : vector<8x4xf32>
    %99 = vector.broadcast %95 : vector<8x1xf32> to vector<8x8xf32>
    %100 = arith.subf %90, %99 : vector<8x8xf32>
    %101 = math.exp %100 : vector<8x8xf32>
    %cst_50 = arith.constant dense<0.000000e+00> : vector<8xf32>
    %102 = vector.multi_reduction <add>, %98, %cst_50 [1] : vector<8x4xf32> to vector<8xf32>
    %103 = vector.shape_cast %102 : vector<8xf32> to vector<8x1xf32>
    %cst_51 = arith.constant dense<0.000000e+00> : vector<8xf32>
    %104 = vector.multi_reduction <add>, %101, %cst_51 [1] : vector<8x8xf32> to vector<8xf32>
    %105 = vector.shape_cast %104 : vector<8xf32> to vector<8x1xf32>
    %106 = arith.addf %103, %105 : vector<8x1xf32>
    %107 = tpu.reciprocal %106 {approx = true} : vector<8x1xf32> -> vector<8x1xf32>
    %108 = arith.truncf %98 : vector<8x4xf32> to vector<8x4xbf16>
    %109 = vector.extract_strided_slice %77 {offsets = [0, 0], sizes = [4, 16], strides = [1, 1]} : vector<4x32xf32> to vector<4x16xf32>
    %110 = arith.truncf %109 : vector<4x16xf32> to vector<4x16xbf16>
    %cst_52 = arith.constant dense<0.000000e+00> : vector<8x16xf32>
    %111 = tpu.matmul %108, %110, %cst_52 {dimension_numbers = #tpu.dot_dimension_numbers<[1], [0], [0], [1], [0, 0, 1, 1], [], []>} : vector<8x4xbf16>, vector<4x16xbf16>, vector<8x16xf32> -> vector<8x16xf32>
    %112 = arith.truncf %101 : vector<8x8xf32> to vector<8x8xbf16>
    %113 = vector.extract_strided_slice %79 {offsets = [0, 0], sizes = [8, 16], strides = [1, 1]} : vector<8x32xf32> to vector<8x16xf32>
    %114 = arith.truncf %113 : vector<8x16xf32> to vector<8x16xbf16>
    %cst_53 = arith.constant dense<0.000000e+00> : vector<8x16xf32>
    %115 = tpu.matmul %112, %114, %cst_53 {dimension_numbers = #tpu.dot_dimension_numbers<[1], [0], [0], [1], [0, 0, 1, 1], [], []>} : vector<8x8xbf16>, vector<8x16xbf16>, vector<8x16xf32> -> vector<8x16xf32>
    %116 = arith.addf %111, %115 : vector<8x16xf32>
    %117 = vector.broadcast %107 : vector<8x1xf32> to vector<8x16xf32>
    %118 = arith.mulf %116, %117 : vector<8x16xf32>
    %119 = arith.truncf %118 : vector<8x16xf32> to vector<8x16xbf16>
    %120 = vector.extract_strided_slice %81 {offsets = [0, 0], sizes = [16, 32], strides = [1, 1]} : vector<32x32xbf16> to vector<16x32xbf16>
    %cst_54 = arith.constant dense<0.000000e+00> : vector<8x32xf32>
    %121 = tpu.matmul %119, %120, %cst_54 {dimension_numbers = #tpu.dot_dimension_numbers<[1], [0], [0], [1], [0, 0, 1, 1], [], []>} : vector<8x16xbf16>, vector<16x32xbf16>, vector<8x32xf32> -> vector<8x32xf32>
    %122 = arith.addf %82, %121 : vector<8x32xf32>
    %123 = vector.extract_strided_slice %75 {offsets = [0, 16], sizes = [8, 16], strides = [1, 1]} : vector<8x32xf32> to vector<8x16xf32>
    %124 = arith.truncf %123 : vector<8x16xf32> to vector<8x16xbf16>
    %125 = vector.extract_strided_slice %76 {offsets = [0, 16], sizes = [4, 16], strides = [1, 1]} : vector<4x32xf32> to vector<4x16xf32>
    %126 = arith.truncf %125 : vector<4x16xf32> to vector<4x16xbf16>
    %cst_55 = arith.constant dense<0.000000e+00> : vector<8x4xf32>
    %127 = tpu.matmul %124, %126, %cst_55 {dimension_numbers = #tpu.dot_dimension_numbers<[1], [1], [0], [0], [0, 0, 1, 0], [], []>} : vector<8x16xbf16>, vector<4x16xbf16>, vector<8x4xf32> -> vector<8x4xf32>
    %128 = vector.extract_strided_slice %78 {offsets = [0, 16], sizes = [8, 16], strides = [1, 1]} : vector<8x32xf32> to vector<8x16xf32>
    %129 = arith.truncf %128 : vector<8x16xf32> to vector<8x16xbf16>
    %cst_56 = arith.constant dense<0.000000e+00> : vector<8x8xf32>
    %130 = tpu.matmul %124, %129, %cst_56 {dimension_numbers = #tpu.dot_dimension_numbers<[1], [1], [0], [0], [0, 0, 1, 0], [], []>} : vector<8x16xbf16>, vector<8x16xbf16>, vector<8x8xf32> -> vector<8x8xf32>
    %cst_57 = arith.constant dense<0xFF800000> : vector<8xf32>
    %131 = vector.multi_reduction <maximumf>, %127, %cst_57 [1] : vector<8x4xf32> to vector<8xf32>
    %132 = vector.shape_cast %131 : vector<8xf32> to vector<8x1xf32>
    %cst_58 = arith.constant dense<0xFF800000> : vector<8xf32>
    %133 = vector.multi_reduction <maximumf>, %130, %cst_58 [1] : vector<8x8xf32> to vector<8xf32>
    %134 = vector.shape_cast %133 : vector<8xf32> to vector<8x1xf32>
    %135 = arith.maximumf %132, %134 : vector<8x1xf32>
    %136 = vector.broadcast %135 : vector<8x1xf32> to vector<8x4xf32>
    %137 = arith.subf %127, %136 : vector<8x4xf32>
    %138 = math.exp %137 : vector<8x4xf32>
    %139 = vector.broadcast %135 : vector<8x1xf32> to vector<8x8xf32>
    %140 = arith.subf %130, %139 : vector<8x8xf32>
    %141 = math.exp %140 : vector<8x8xf32>
    %cst_59 = arith.constant dense<0.000000e+00> : vector<8xf32>
    %142 = vector.multi_reduction <add>, %138, %cst_59 [1] : vector<8x4xf32> to vector<8xf32>
    %143 = vector.shape_cast %142 : vector<8xf32> to vector<8x1xf32>
    %cst_60 = arith.constant dense<0.000000e+00> : vector<8xf32>
    %144 = vector.multi_reduction <add>, %141, %cst_60 [1] : vector<8x8xf32> to vector<8xf32>
    %145 = vector.shape_cast %144 : vector<8xf32> to vector<8x1xf32>
    %146 = arith.addf %143, %145 : vector<8x1xf32>
    %147 = tpu.reciprocal %146 {approx = true} : vector<8x1xf32> -> vector<8x1xf32>
    %148 = arith.truncf %138 : vector<8x4xf32> to vector<8x4xbf16>
    %149 = vector.extract_strided_slice %77 {offsets = [0, 16], sizes = [4, 16], strides = [1, 1]} : vector<4x32xf32> to vector<4x16xf32>
    %150 = arith.truncf %149 : vector<4x16xf32> to vector<4x16xbf16>
    %cst_61 = arith.constant dense<0.000000e+00> : vector<8x16xf32>
    %151 = tpu.matmul %148, %150, %cst_61 {dimension_numbers = #tpu.dot_dimension_numbers<[1], [0], [0], [1], [0, 0, 1, 1], [], []>} : vector<8x4xbf16>, vector<4x16xbf16>, vector<8x16xf32> -> vector<8x16xf32>
    %152 = arith.truncf %141 : vector<8x8xf32> to vector<8x8xbf16>
    %153 = vector.extract_strided_slice %79 {offsets = [0, 16], sizes = [8, 16], strides = [1, 1]} : vector<8x32xf32> to vector<8x16xf32>
    %154 = arith.truncf %153 : vector<8x16xf32> to vector<8x16xbf16>
    %cst_62 = arith.constant dense<0.000000e+00> : vector<8x16xf32>
    %155 = tpu.matmul %152, %154, %cst_62 {dimension_numbers = #tpu.dot_dimension_numbers<[1], [0], [0], [1], [0, 0, 1, 1], [], []>} : vector<8x8xbf16>, vector<8x16xbf16>, vector<8x16xf32> -> vector<8x16xf32>
    %156 = arith.addf %151, %155 : vector<8x16xf32>
    %157 = vector.broadcast %147 : vector<8x1xf32> to vector<8x16xf32>
    %158 = arith.mulf %156, %157 : vector<8x16xf32>
    %159 = arith.truncf %158 : vector<8x16xf32> to vector<8x16xbf16>
    %160 = vector.extract_strided_slice %81 {offsets = [16, 0], sizes = [16, 32], strides = [1, 1]} : vector<32x32xbf16> to vector<16x32xbf16>
    %cst_63 = arith.constant dense<0.000000e+00> : vector<8x32xf32>
    %161 = tpu.matmul %159, %160, %cst_63 {dimension_numbers = #tpu.dot_dimension_numbers<[1], [0], [0], [1], [0, 0, 1, 1], [], []>} : vector<8x16xbf16>, vector<16x32xbf16>, vector<8x32xf32> -> vector<8x32xf32>
    %162 = arith.addf %122, %161 : vector<8x32xf32>
    %163 = vector.extract_strided_slice %66 {offsets = [8, 0], sizes = [8, 32], strides = [1, 1]} : vector<16x32xf32> to vector<8x32xf32>
    %164 = vector.extract_strided_slice %70 {offsets = [4, 0], sizes = [4, 32], strides = [1, 1]} : vector<8x64xf32> to vector<4x32xf32>
    %165 = vector.extract_strided_slice %70 {offsets = [4, 32], sizes = [4, 32], strides = [1, 1]} : vector<8x64xf32> to vector<4x32xf32>
    %166 = vector.extract_strided_slice %74 {offsets = [8, 0], sizes = [8, 32], strides = [1, 1]} : vector<16x64xf32> to vector<8x32xf32>
    %167 = vector.extract_strided_slice %74 {offsets = [8, 32], sizes = [8, 32], strides = [1, 1]} : vector<16x64xf32> to vector<8x32xf32>
    %c0_64 = arith.constant 0 : index
    %c0_65 = arith.constant 0 : index
    %c0_66 = arith.constant 0 : index
    %168 = vector.load %arg11[%c0_64, %c0_65, %c0_66] : memref<1x32x32xbf16, #tpu.memory_space<vmem>>, vector<1x32x32xbf16>
    %169 = vector.shape_cast %168 : vector<1x32x32xbf16> to vector<32x32xbf16>
    %cst_67 = arith.constant 0.000000e+00 : f32
    %170 = vector.broadcast %cst_67 : f32 to vector<8x32xf32>
    %171 = vector.extract_strided_slice %163 {offsets = [0, 0], sizes = [8, 16], strides = [1, 1]} : vector<8x32xf32> to vector<8x16xf32>
    %172 = arith.truncf %171 : vector<8x16xf32> to vector<8x16xbf16>
    %173 = vector.extract_strided_slice %164 {offsets = [0, 0], sizes = [4, 16], strides = [1, 1]} : vector<4x32xf32> to vector<4x16xf32>
    %174 = arith.truncf %173 : vector<4x16xf32> to vector<4x16xbf16>
    %cst_68 = arith.constant dense<0.000000e+00> : vector<8x4xf32>
    %175 = tpu.matmul %172, %174, %cst_68 {dimension_numbers = #tpu.dot_dimension_numbers<[1], [1], [0], [0], [0, 0, 1, 0], [], []>} : vector<8x16xbf16>, vector<4x16xbf16>, vector<8x4xf32> -> vector<8x4xf32>
    %176 = vector.extract_strided_slice %166 {offsets = [0, 0], sizes = [8, 16], strides = [1, 1]} : vector<8x32xf32> to vector<8x16xf32>
    %177 = arith.truncf %176 : vector<8x16xf32> to vector<8x16xbf16>
    %cst_69 = arith.constant dense<0.000000e+00> : vector<8x8xf32>
    %178 = tpu.matmul %172, %177, %cst_69 {dimension_numbers = #tpu.dot_dimension_numbers<[1], [1], [0], [0], [0, 0, 1, 0], [], []>} : vector<8x16xbf16>, vector<8x16xbf16>, vector<8x8xf32> -> vector<8x8xf32>
    %cst_70 = arith.constant dense<0xFF800000> : vector<8xf32>
    %179 = vector.multi_reduction <maximumf>, %175, %cst_70 [1] : vector<8x4xf32> to vector<8xf32>
    %180 = vector.shape_cast %179 : vector<8xf32> to vector<8x1xf32>
    %cst_71 = arith.constant dense<0xFF800000> : vector<8xf32>
    %181 = vector.multi_reduction <maximumf>, %178, %cst_71 [1] : vector<8x8xf32> to vector<8xf32>
    %182 = vector.shape_cast %181 : vector<8xf32> to vector<8x1xf32>
    %183 = arith.maximumf %180, %182 : vector<8x1xf32>
    %184 = vector.broadcast %183 : vector<8x1xf32> to vector<8x4xf32>
    %185 = arith.subf %175, %184 : vector<8x4xf32>
    %186 = math.exp %185 : vector<8x4xf32>
    %187 = vector.broadcast %183 : vector<8x1xf32> to vector<8x8xf32>
    %188 = arith.subf %178, %187 : vector<8x8xf32>
    %189 = math.exp %188 : vector<8x8xf32>
    %cst_72 = arith.constant dense<0.000000e+00> : vector<8xf32>
    %190 = vector.multi_reduction <add>, %186, %cst_72 [1] : vector<8x4xf32> to vector<8xf32>
    %191 = vector.shape_cast %190 : vector<8xf32> to vector<8x1xf32>
    %cst_73 = arith.constant dense<0.000000e+00> : vector<8xf32>
    %192 = vector.multi_reduction <add>, %189, %cst_73 [1] : vector<8x8xf32> to vector<8xf32>
    %193 = vector.shape_cast %192 : vector<8xf32> to vector<8x1xf32>
    %194 = arith.addf %191, %193 : vector<8x1xf32>
    %195 = tpu.reciprocal %194 {approx = true} : vector<8x1xf32> -> vector<8x1xf32>
    %196 = arith.truncf %186 : vector<8x4xf32> to vector<8x4xbf16>
    %197 = vector.extract_strided_slice %165 {offsets = [0, 0], sizes = [4, 16], strides = [1, 1]} : vector<4x32xf32> to vector<4x16xf32>
    %198 = arith.truncf %197 : vector<4x16xf32> to vector<4x16xbf16>
    %cst_74 = arith.constant dense<0.000000e+00> : vector<8x16xf32>
    %199 = tpu.matmul %196, %198, %cst_74 {dimension_numbers = #tpu.dot_dimension_numbers<[1], [0], [0], [1], [0, 0, 1, 1], [], []>} : vector<8x4xbf16>, vector<4x16xbf16>, vector<8x16xf32> -> vector<8x16xf32>
    %200 = arith.truncf %189 : vector<8x8xf32> to vector<8x8xbf16>
    %201 = vector.extract_strided_slice %167 {offsets = [0, 0], sizes = [8, 16], strides = [1, 1]} : vector<8x32xf32> to vector<8x16xf32>
    %202 = arith.truncf %201 : vector<8x16xf32> to vector<8x16xbf16>
    %cst_75 = arith.constant dense<0.000000e+00> : vector<8x16xf32>
    %203 = tpu.matmul %200, %202, %cst_75 {dimension_numbers = #tpu.dot_dimension_numbers<[1], [0], [0], [1], [0, 0, 1, 1], [], []>} : vector<8x8xbf16>, vector<8x16xbf16>, vector<8x16xf32> -> vector<8x16xf32>
    %204 = arith.addf %199, %203 : vector<8x16xf32>
    %205 = vector.broadcast %195 : vector<8x1xf32> to vector<8x16xf32>
    %206 = arith.mulf %204, %205 : vector<8x16xf32>
    %207 = arith.truncf %206 : vector<8x16xf32> to vector<8x16xbf16>
    %208 = vector.extract_strided_slice %169 {offsets = [0, 0], sizes = [16, 32], strides = [1, 1]} : vector<32x32xbf16> to vector<16x32xbf16>
    %cst_76 = arith.constant dense<0.000000e+00> : vector<8x32xf32>
    %209 = tpu.matmul %207, %208, %cst_76 {dimension_numbers = #tpu.dot_dimension_numbers<[1], [0], [0], [1], [0, 0, 1, 1], [], []>} : vector<8x16xbf16>, vector<16x32xbf16>, vector<8x32xf32> -> vector<8x32xf32>
    %210 = arith.addf %170, %209 : vector<8x32xf32>
    %211 = vector.extract_strided_slice %163 {offsets = [0, 16], sizes = [8, 16], strides = [1, 1]} : vector<8x32xf32> to vector<8x16xf32>
    %212 = arith.truncf %211 : vector<8x16xf32> to vector<8x16xbf16>
    %213 = vector.extract_strided_slice %164 {offsets = [0, 16], sizes = [4, 16], strides = [1, 1]} : vector<4x32xf32> to vector<4x16xf32>
    %214 = arith.truncf %213 : vector<4x16xf32> to vector<4x16xbf16>
    %cst_77 = arith.constant dense<0.000000e+00> : vector<8x4xf32>
    %215 = tpu.matmul %212, %214, %cst_77 {dimension_numbers = #tpu.dot_dimension_numbers<[1], [1], [0], [0], [0, 0, 1, 0], [], []>} : vector<8x16xbf16>, vector<4x16xbf16>, vector<8x4xf32> -> vector<8x4xf32>
    %216 = vector.extract_strided_slice %166 {offsets = [0, 16], sizes = [8, 16], strides = [1, 1]} : vector<8x32xf32> to vector<8x16xf32>
    %217 = arith.truncf %216 : vector<8x16xf32> to vector<8x16xbf16>
    %cst_78 = arith.constant dense<0.000000e+00> : vector<8x8xf32>
    %218 = tpu.matmul %212, %217, %cst_78 {dimension_numbers = #tpu.dot_dimension_numbers<[1], [1], [0], [0], [0, 0, 1, 0], [], []>} : vector<8x16xbf16>, vector<8x16xbf16>, vector<8x8xf32> -> vector<8x8xf32>
    %cst_79 = arith.constant dense<0xFF800000> : vector<8xf32>
    %219 = vector.multi_reduction <maximumf>, %215, %cst_79 [1] : vector<8x4xf32> to vector<8xf32>
    %220 = vector.shape_cast %219 : vector<8xf32> to vector<8x1xf32>
    %cst_80 = arith.constant dense<0xFF800000> : vector<8xf32>
    %221 = vector.multi_reduction <maximumf>, %218, %cst_80 [1] : vector<8x8xf32> to vector<8xf32>
    %222 = vector.shape_cast %221 : vector<8xf32> to vector<8x1xf32>
    %223 = arith.maximumf %220, %222 : vector<8x1xf32>
    %224 = vector.broadcast %223 : vector<8x1xf32> to vector<8x4xf32>
    %225 = arith.subf %215, %224 : vector<8x4xf32>
    %226 = math.exp %225 : vector<8x4xf32>
    %227 = vector.broadcast %223 : vector<8x1xf32> to vector<8x8xf32>
    %228 = arith.subf %218, %227 : vector<8x8xf32>
    %229 = math.exp %228 : vector<8x8xf32>
    %cst_81 = arith.constant dense<0.000000e+00> : vector<8xf32>
    %230 = vector.multi_reduction <add>, %226, %cst_81 [1] : vector<8x4xf32> to vector<8xf32>
    %231 = vector.shape_cast %230 : vector<8xf32> to vector<8x1xf32>
    %cst_82 = arith.constant dense<0.000000e+00> : vector<8xf32>
    %232 = vector.multi_reduction <add>, %229, %cst_82 [1] : vector<8x8xf32> to vector<8xf32>
    %233 = vector.shape_cast %232 : vector<8xf32> to vector<8x1xf32>
    %234 = arith.addf %231, %233 : vector<8x1xf32>
    %235 = tpu.reciprocal %234 {approx = true} : vector<8x1xf32> -> vector<8x1xf32>
    %236 = arith.truncf %226 : vector<8x4xf32> to vector<8x4xbf16>
    %237 = vector.extract_strided_slice %165 {offsets = [0, 16], sizes = [4, 16], strides = [1, 1]} : vector<4x32xf32> to vector<4x16xf32>
    %238 = arith.truncf %237 : vector<4x16xf32> to vector<4x16xbf16>
    %cst_83 = arith.constant dense<0.000000e+00> : vector<8x16xf32>
    %239 = tpu.matmul %236, %238, %cst_83 {dimension_numbers = #tpu.dot_dimension_numbers<[1], [0], [0], [1], [0, 0, 1, 1], [], []>} : vector<8x4xbf16>, vector<4x16xbf16>, vector<8x16xf32> -> vector<8x16xf32>
    %240 = arith.truncf %229 : vector<8x8xf32> to vector<8x8xbf16>
    %241 = vector.extract_strided_slice %167 {offsets = [0, 16], sizes = [8, 16], strides = [1, 1]} : vector<8x32xf32> to vector<8x16xf32>
    %242 = arith.truncf %241 : vector<8x16xf32> to vector<8x16xbf16>
    %cst_84 = arith.constant dense<0.000000e+00> : vector<8x16xf32>
    %243 = tpu.matmul %240, %242, %cst_84 {dimension_numbers = #tpu.dot_dimension_numbers<[1], [0], [0], [1], [0, 0, 1, 1], [], []>} : vector<8x8xbf16>, vector<8x16xbf16>, vector<8x16xf32> -> vector<8x16xf32>
    %244 = arith.addf %239, %243 : vector<8x16xf32>
    %245 = vector.broadcast %235 : vector<8x1xf32> to vector<8x16xf32>
    %246 = arith.mulf %244, %245 : vector<8x16xf32>
    %247 = arith.truncf %246 : vector<8x16xf32> to vector<8x16xbf16>
    %248 = vector.extract_strided_slice %169 {offsets = [16, 0], sizes = [16, 32], strides = [1, 1]} : vector<32x32xbf16> to vector<16x32xbf16>
    %cst_85 = arith.constant dense<0.000000e+00> : vector<8x32xf32>
    %249 = tpu.matmul %247, %248, %cst_85 {dimension_numbers = #tpu.dot_dimension_numbers<[1], [0], [0], [1], [0, 0, 1, 1], [], []>} : vector<8x16xbf16>, vector<16x32xbf16>, vector<8x32xf32> -> vector<8x32xf32>
    %250 = arith.addf %210, %249 : vector<8x32xf32>
    %251 = tpu.concatenate %162, %250 in 0 : vector<8x32xf32>, vector<8x32xf32> -> vector<16x32xf32>
    %252 = arith.addf %10, %251 : vector<16x32xf32>
    %c0_86 = arith.constant 0 : index
    %c0_87 = arith.constant 0 : index
    %c0_88 = arith.constant 0 : index
    %253 = vector.load %arg12[%c0_86, %c0_87, %c0_88] : memref<1x1x32xf32, #tpu.memory_space<vmem>>, vector<1x1x32xf32>
    %254 = vector.shape_cast %253 : vector<1x1x32xf32> to vector<1x32xf32>
    %c0_89 = arith.constant 0 : index
    %c0_90 = arith.constant 0 : index
    %c0_91 = arith.constant 0 : index
    %255 = vector.load %arg13[%c0_89, %c0_90, %c0_91] : memref<1x1x32xf32, #tpu.memory_space<vmem>>, vector<1x1x32xf32>
    %256 = vector.shape_cast %255 : vector<1x1x32xf32> to vector<1x32xf32>
    %cst_92 = arith.constant dense<0.000000e+00> : vector<16xf32>
    %257 = vector.multi_reduction <add>, %252, %cst_92 [1] : vector<16x32xf32> to vector<16xf32>
    %258 = vector.shape_cast %257 : vector<16xf32> to vector<16x1xf32>
    %cst_93 = arith.constant 3.200000e+01 : f32
    %259 = vector.broadcast %cst_93 : f32 to vector<16x1xf32>
    %260 = arith.divf %258, %259 : vector<16x1xf32>
    %261 = vector.broadcast %260 : vector<16x1xf32> to vector<16x32xf32>
    %262 = arith.subf %252, %261 : vector<16x32xf32>
    %263 = arith.mulf %262, %262 : vector<16x32xf32>
    %cst_94 = arith.constant dense<0.000000e+00> : vector<16xf32>
    %264 = vector.multi_reduction <add>, %263, %cst_94 [1] : vector<16x32xf32> to vector<16xf32>
    %265 = vector.shape_cast %264 : vector<16xf32> to vector<16x1xf32>
    %cst_95 = arith.constant 3.200000e+01 : f32
    %266 = vector.broadcast %cst_95 : f32 to vector<16x1xf32>
    %267 = arith.divf %265, %266 : vector<16x1xf32>
    %268 = vector.broadcast %260 : vector<16x1xf32> to vector<16x32xf32>
    %269 = arith.subf %252, %268 : vector<16x32xf32>
    %cst_96 = arith.constant 9.99999974E-6 : f32
    %270 = vector.broadcast %cst_96 : f32 to vector<16x1xf32>
    %271 = arith.addf %267, %270 : vector<16x1xf32>
    %272 = math.rsqrt %271 : vector<16x1xf32>
    %273 = vector.broadcast %272 : vector<16x1xf32> to vector<16x32xf32>
    %274 = arith.mulf %269, %273 : vector<16x32xf32>
    %275 = vector.broadcast %254 : vector<1x32xf32> to vector<16x32xf32>
    %276 = arith.mulf %274, %275 : vector<16x32xf32>
    %277 = vector.broadcast %256 : vector<1x32xf32> to vector<16x32xf32>
    %278 = arith.addf %276, %277 : vector<16x32xf32>
    %279 = arith.truncf %278 : vector<16x32xf32> to vector<16x32xbf16>
    %c0_97 = arith.constant 0 : index
    %c0_98 = arith.constant 0 : index
    %c0_99 = arith.constant 0 : index
    %280 = vector.load %arg14[%c0_97, %c0_98, %c0_99] : memref<1x32x128xbf16, #tpu.memory_space<vmem>>, vector<1x32x128xbf16>
    %281 = vector.shape_cast %280 : vector<1x32x128xbf16> to vector<32x128xbf16>
    %cst_100 = arith.constant dense<0.000000e+00> : vector<16x128xf32>
    %282 = tpu.matmul %279, %281, %cst_100 {dimension_numbers = #tpu.dot_dimension_numbers<[1], [0], [0], [1], [0, 0, 1, 1], [], []>} : vector<16x32xbf16>, vector<32x128xbf16>, vector<16x128xf32> -> vector<16x128xf32>
    %cst_101 = arith.constant 5.000000e-01 : f32
    %283 = vector.broadcast %cst_101 : f32 to vector<16x128xf32>
    %284 = arith.mulf %283, %282 : vector<16x128xf32>
    %cst_102 = arith.constant 4.471500e-02 : f32
    %285 = vector.broadcast %cst_102 : f32 to vector<16x128xf32>
    %286 = arith.mulf %285, %282 : vector<16x128xf32>
    %287 = arith.mulf %286, %282 : vector<16x128xf32>
    %288 = arith.mulf %287, %282 : vector<16x128xf32>
    %289 = arith.addf %282, %288 : vector<16x128xf32>
    %cst_103 = arith.constant 0.797884583 : f32
    %290 = vector.broadcast %cst_103 : f32 to vector<16x128xf32>
    %291 = arith.mulf %290, %289 : vector<16x128xf32>
    %292 = math.tanh %291 : vector<16x128xf32>
    %cst_104 = arith.constant 1.000000e+00 : f32
    %293 = vector.broadcast %cst_104 : f32 to vector<16x128xf32>
    %294 = arith.addf %293, %292 : vector<16x128xf32>
    %295 = arith.mulf %284, %294 : vector<16x128xf32>
    %296 = arith.truncf %295 : vector<16x128xf32> to vector<16x128xbf16>
    %c0_105 = arith.constant 0 : index
    %c0_106 = arith.constant 0 : index
    %c0_107 = arith.constant 0 : index
    %297 = vector.load %arg15[%c0_105, %c0_106, %c0_107] : memref<1x128x32xbf16, #tpu.memory_space<vmem>>, vector<1x128x32xbf16>
    %298 = vector.shape_cast %297 : vector<1x128x32xbf16> to vector<128x32xbf16>
    %cst_108 = arith.constant dense<0.000000e+00> : vector<16x32xf32>
    %299 = tpu.matmul %296, %298, %cst_108 {dimension_numbers = #tpu.dot_dimension_numbers<[1], [0], [0], [1], [0, 0, 1, 1], [], []>} : vector<16x128xbf16>, vector<128x32xbf16>, vector<16x32xf32> -> vector<16x32xf32>
    %300 = arith.addf %252, %299 : vector<16x32xf32>
    %c0_109 = arith.constant 0 : index
    %c0_110 = arith.constant 0 : index
    %301 = vector.load %arg19[%c0_109, %c0_110] : memref<16x32xf32, #tpu.memory_space<vmem>>, vector<16x32xf32>
    tpu.vector_store %arg19[%c0_109, %c0_110], %300 {strides = array<i32>} : memref<16x32xf32, #tpu.memory_space<vmem>>, vector<16x32xf32>,
    %c0_111 = arith.constant 0 : index
    %c0_112 = arith.constant 0 : index
    %302 = vector.load %arg16[%c0_111, %c0_112] : memref<1x32xf32, #tpu.memory_space<vmem>>, vector<1x32xf32>
    %c0_113 = arith.constant 0 : index
    %c0_114 = arith.constant 0 : index
    %303 = vector.load %arg17[%c0_113, %c0_114] : memref<1x32xf32, #tpu.memory_space<vmem>>, vector<1x32xf32>
    %cst_115 = arith.constant dense<0.000000e+00> : vector<16xf32>
    %304 = vector.multi_reduction <add>, %300, %cst_115 [1] : vector<16x32xf32> to vector<16xf32>
    %305 = vector.shape_cast %304 : vector<16xf32> to vector<16x1xf32>
    %cst_116 = arith.constant 3.200000e+01 : f32
    %306 = vector.broadcast %cst_116 : f32 to vector<16x1xf32>
    %307 = arith.divf %305, %306 : vector<16x1xf32>
    %308 = vector.broadcast %307 : vector<16x1xf32> to vector<16x32xf32>
    %309 = arith.subf %300, %308 : vector<16x32xf32>
    %310 = arith.mulf %309, %309 : vector<16x32xf32>
    %cst_117 = arith.constant dense<0.000000e+00> : vector<16xf32>
    %311 = vector.multi_reduction <add>, %310, %cst_117 [1] : vector<16x32xf32> to vector<16xf32>
    %312 = vector.shape_cast %311 : vector<16xf32> to vector<16x1xf32>
    %cst_118 = arith.constant 3.200000e+01 : f32
    %313 = vector.broadcast %cst_118 : f32 to vector<16x1xf32>
    %314 = arith.divf %312, %313 : vector<16x1xf32>
    %315 = vector.broadcast %307 : vector<16x1xf32> to vector<16x32xf32>
    %316 = arith.subf %300, %315 : vector<16x32xf32>
    %cst_119 = arith.constant 9.99999974E-6 : f32
    %317 = vector.broadcast %cst_119 : f32 to vector<16x1xf32>
    %318 = arith.addf %314, %317 : vector<16x1xf32>
    %319 = math.rsqrt %318 : vector<16x1xf32>
    %320 = vector.broadcast %319 : vector<16x1xf32> to vector<16x32xf32>
    %321 = arith.mulf %316, %320 : vector<16x32xf32>
    %322 = vector.broadcast %302 : vector<1x32xf32> to vector<16x32xf32>
    %323 = arith.mulf %321, %322 : vector<16x32xf32>
    %324 = vector.broadcast %303 : vector<1x32xf32> to vector<16x32xf32>
    %325 = arith.addf %323, %324 : vector<16x32xf32>
    %c0_120 = arith.constant 0 : index
    %c0_121 = arith.constant 0 : index
    %326 = vector.load %arg18[%c0_120, %c0_121] : memref<16x32xf32, #tpu.memory_space<vmem>>, vector<16x32xf32>
    tpu.vector_store %arg18[%c0_120, %c0_121], %325 {strides = array<i32>} : memref<16x32xf32, #tpu.memory_space<vmem>>, vector<16x32xf32>,
    return
  }
  func.func @transform_0(%arg0: i32) -> (i32, i32) {
    %c0_i32 = arith.constant 0 : i32
    %c0_i32_0 = arith.constant 0 : i32
    %c0_i32_1 = arith.constant 0 : i32
    return %c0_i32, %c0_i32_0 : i32, i32
  }
  func.func @transform_1(%arg0: i32) -> (i32, i32) {
    %c0_i32 = arith.constant 0 : i32
    %c0_i32_0 = arith.constant 0 : i32
    %c0_i32_1 = arith.constant 0 : i32
    return %c0_i32, %c0_i32_0 : i32, i32
  }
  func.func @transform_2(%arg0: i32) -> (i32, i32) {
    %c0_i32 = arith.constant 0 : i32
    %c0_i32_0 = arith.constant 0 : i32
    %c0_i32_1 = arith.constant 0 : i32
    return %c0_i32, %c0_i32_0 : i32, i32
  }
  func.func @transform_3(%arg0: i32) -> (i32, i32) {
    %c0_i32 = arith.constant 0 : i32
    %c0_i32_0 = arith.constant 0 : i32
    %c0_i32_1 = arith.constant 0 : i32
    return %c0_i32, %c0_i32_0 : i32, i32
  }
  func.func @transform_4(%arg0: i32) -> (i32, i32, i32) {
    %c0_i32 = arith.constant 0 : i32
    %c0_i32_0 = arith.constant 0 : i32
    %c0_i32_1 = arith.constant 0 : i32
    return %arg0, %c0_i32, %c0_i32_0 : i32, i32, i32
  }
  func.func @transform_5(%arg0: i32) -> (i32, i32, i32) {
    %c0_i32 = arith.constant 0 : i32
    %c0_i32_0 = arith.constant 0 : i32
    %c0_i32_1 = arith.constant 0 : i32
    return %arg0, %c0_i32, %c0_i32_0 : i32, i32, i32
  }
  func.func @transform_6(%arg0: i32) -> (i32, i32, i32) {
    %c0_i32 = arith.constant 0 : i32
    %c0_i32_0 = arith.constant 0 : i32
    %c0_i32_1 = arith.constant 0 : i32
    return %arg0, %c0_i32, %c0_i32_0 : i32, i32, i32
  }
  func.func @transform_7(%arg0: i32) -> (i32, i32, i32) {
    %c0_i32 = arith.constant 0 : i32
    %c0_i32_0 = arith.constant 0 : i32
    %c0_i32_1 = arith.constant 0 : i32
    return %arg0, %c0_i32, %c0_i32_0 : i32, i32, i32
  }
  func.func @transform_8(%arg0: i32) -> (i32, i32, i32) {
    %c0_i32 = arith.constant 0 : i32
    %c0_i32_0 = arith.constant 0 : i32
    %c0_i32_1 = arith.constant 0 : i32
    return %arg0, %c0_i32, %c0_i32_0 : i32, i32, i32
  }
  func.func @transform_9(%arg0: i32) -> (i32, i32, i32) {
    %c0_i32 = arith.constant 0 : i32
    %c0_i32_0 = arith.constant 0 : i32
    %c0_i32_1 = arith.constant 0 : i32
    return %arg0, %c0_i32, %c0_i32_0 : i32, i32, i32
  }
  func.func @transform_10(%arg0: i32) -> (i32, i32, i32) {
    %c0_i32 = arith.constant 0 : i32
    %c0_i32_0 = arith.constant 0 : i32
    %c0_i32_1 = arith.constant 0 : i32
    return %arg0, %c0_i32, %c0_i32_0 : i32, i32, i32
  }
  func.func @transform_11(%arg0: i32) -> (i32, i32, i32) {
    %c0_i32 = arith.constant 0 : i32
    %c0_i32_0 = arith.constant 0 : i32
    %c0_i32_1 = arith.constant 0 : i32
    return %arg0, %c0_i32, %c0_i32_0 : i32, i32, i32
  }
  func.func @transform_12(%arg0: i32) -> (i32, i32, i32) {
    %c0_i32 = arith.constant 0 : i32
    %c0_i32_0 = arith.constant 0 : i32
    %c0_i32_1 = arith.constant 0 : i32
    return %arg0, %c0_i32, %c0_i32_0 : i32, i32, i32
  }
  func.func @transform_13(%arg0: i32) -> (i32, i32, i32) {
    %c0_i32 = arith.constant 0 : i32
    %c0_i32_0 = arith.constant 0 : i32
    %c0_i32_1 = arith.constant 0 : i32
    return %arg0, %c0_i32, %c0_i32_0 : i32, i32, i32
  }
  func.func @transform_14(%arg0: i32) -> (i32, i32, i32) {
    %c0_i32 = arith.constant 0 : i32
    %c0_i32_0 = arith.constant 0 : i32
    %c0_i32_1 = arith.constant 0 : i32
    return %arg0, %c0_i32, %c0_i32_0 : i32, i32, i32
  }
  func.func @transform_15(%arg0: i32) -> (i32, i32) {
    %c0_i32 = arith.constant 0 : i32
    %c0_i32_0 = arith.constant 0 : i32
    %c0_i32_1 = arith.constant 0 : i32
    return %c0_i32, %c0_i32_0 : i32, i32
  }
  func.func @transform_16(%arg0: i32) -> (i32, i32) {
    %c0_i32 = arith.constant 0 : i32
    %c0_i32_0 = arith.constant 0 : i32
    %c0_i32_1 = arith.constant 0 : i32
    return %c0_i32, %c0_i32_0 : i32, i32
  }
  func.func @transform_17(%arg0: i32) -> (i32, i32) {
    %c0_i32 = arith.constant 0 : i32
    %c0_i32_0 = arith.constant 0 : i32
    %c0_i32_1 = arith.constant 0 : i32
    return %c0_i32, %c0_i32_0 : i32, i32
  }
}

module attributes {stable_mosaic.version = 11 : i64} {
  func.func @_lang_kernel(%arg0: i32, %arg1: memref<16x32xf32, #tpu.memory_space<vmem>>, %arg2: memref<16x32xf32, #tpu.memory_space<vmem>>, %arg3: memref<2x8x1xi32, #tpu.memory_space<vmem>>, %arg4: memref<2x1x8xi32, #tpu.memory_space<vmem>>, %arg5: memref<2x2xf32, #tpu.memory_space<smem>>, %arg6: memref<1x1x32xf32, #tpu.memory_space<vmem>>, %arg7: memref<1x1x32xf32, #tpu.memory_space<vmem>>, %arg8: memref<1x32x32xbf16, #tpu.memory_space<vmem>>, %arg9: memref<1x32x64xbf16, #tpu.memory_space<vmem>>, %arg10: memref<1x32x32xbf16, #tpu.memory_space<vmem>>, %arg11: memref<1x1x32xf32, #tpu.memory_space<vmem>>, %arg12: memref<1x1x32xf32, #tpu.memory_space<vmem>>, %arg13: memref<1x32x128xbf16, #tpu.memory_space<vmem>>, %arg14: memref<1x128x32xbf16, #tpu.memory_space<vmem>>, %arg15: memref<1x1x32xf32, #tpu.memory_space<vmem>>, %arg16: memref<1x1x32xf32, #tpu.memory_space<vmem>>, %arg17: memref<1x32x96xbf16, #tpu.memory_space<vmem>>, %arg18: memref<1x1x96xf32, #tpu.memory_space<vmem>>, %arg19: memref<1x32x32xbf16, #tpu.memory_space<vmem>>, %arg20: memref<1x1x32xf32, #tpu.memory_space<vmem>>, %arg21: memref<1x1x32xf32, #tpu.memory_space<vmem>>, %arg22: memref<1x1x32xf32, #tpu.memory_space<vmem>>, %arg23: memref<1x32x128xbf16, #tpu.memory_space<vmem>>, %arg24: memref<1x1x128xf32, #tpu.memory_space<vmem>>, %arg25: memref<1x128x32xbf16, #tpu.memory_space<vmem>>, %arg26: memref<1x1x32xf32, #tpu.memory_space<vmem>>, %arg27: memref<1x32xf32, #tpu.memory_space<vmem>>, %arg28: memref<1x32xf32, #tpu.memory_space<vmem>>, %arg29: memref<32x128xbf16, #tpu.memory_space<vmem>>, %arg30: memref<16x128xf32, #tpu.memory_space<vmem>>, %arg31: memref<16x32xf32, #tpu.memory_space<vmem>>) attributes {dimension_semantics = [#tpu.dimension_semantics<arbitrary>], iteration_bounds = array<i64: 2>, scalar_prefetch = 0 : i64, scratch_operands = 1 : i64, tpu.core_type = #tpu.core_type<tc>, window_params = [{pipeline_mode = #tpu.pipeline_mode<synchronous>, transform_indices = @transform_0, window_bounds = array<i64: 16, 32>}, {pipeline_mode = #tpu.pipeline_mode<synchronous>, transform_indices = @transform_1, window_bounds = array<i64: 16, 32>}, {pipeline_mode = #tpu.pipeline_mode<synchronous>, transform_indices = @transform_2, window_bounds = array<i64: 2, 8, 1>}, {pipeline_mode = #tpu.pipeline_mode<synchronous>, transform_indices = @transform_3, window_bounds = array<i64: 2, 1, 8>}, {transform_indices = @transform_4, window_bounds = array<i64: 2, 2>}, {transform_indices = @transform_5, window_bounds = array<i64: 1, 1, 32>}, {transform_indices = @transform_6, window_bounds = array<i64: 1, 1, 32>}, {transform_indices = @transform_7, window_bounds = array<i64: 1, 32, 32>}, {transform_indices = @transform_8, window_bounds = array<i64: 1, 32, 64>}, {transform_indices = @transform_9, window_bounds = array<i64: 1, 32, 32>}, {transform_indices = @transform_10, window_bounds = array<i64: 1, 1, 32>}, {transform_indices = @transform_11, window_bounds = array<i64: 1, 1, 32>}, {transform_indices = @transform_12, window_bounds = array<i64: 1, 32, 128>}, {transform_indices = @transform_13, window_bounds = array<i64: 1, 128, 32>}, {transform_indices = @transform_14, window_bounds = array<i64: 1, 1, 32>}, {transform_indices = @transform_15, window_bounds = array<i64: 1, 1, 32>}, {transform_indices = @transform_16, window_bounds = array<i64: 1, 32, 96>}, {transform_indices = @transform_17, window_bounds = array<i64: 1, 1, 96>}, {transform_indices = @transform_18, window_bounds = array<i64: 1, 32, 32>}, {transform_indices = @transform_19, window_bounds = array<i64: 1, 1, 32>}, {transform_indices = @transform_20, window_bounds = array<i64: 1, 1, 32>}, {transform_indices = @transform_21, window_bounds = array<i64: 1, 1, 32>}, {transform_indices = @transform_22, window_bounds = array<i64: 1, 32, 128>}, {transform_indices = @transform_23, window_bounds = array<i64: 1, 1, 128>}, {transform_indices = @transform_24, window_bounds = array<i64: 1, 128, 32>}, {transform_indices = @transform_25, window_bounds = array<i64: 1, 1, 32>}, {pipeline_mode = #tpu.pipeline_mode<synchronous>, transform_indices = @transform_26, window_bounds = array<i64: 1, 32>}, {pipeline_mode = #tpu.pipeline_mode<synchronous>, transform_indices = @transform_27, window_bounds = array<i64: 1, 32>}, {pipeline_mode = #tpu.pipeline_mode<synchronous>, transform_indices = @transform_28, window_bounds = array<i64: 32, 128>}, {pipeline_mode = #tpu.pipeline_mode<synchronous>, transform_indices = @transform_29, window_bounds = array<i64: 16, 128>}]} {
    %c0_i32 = arith.constant 0 : i32
    %0 = arith.cmpi eq, %arg0, %c0_i32 : i32
    %1 = arith.extui %0 : i1 to i32
    %c0_i32_0 = arith.constant 0 : i32
    %2 = arith.cmpi ne, %1, %c0_i32_0 : i32
    scf.if %2 {
      %c0_198 = arith.constant 0 : index
      %c0_199 = arith.constant 0 : index
      %500 = vector.load %arg1[%c0_198, %c0_199] : memref<16x32xf32, #tpu.memory_space<vmem>>, vector<16x32xf32>
      %c0_200 = arith.constant 0 : index
      %c0_201 = arith.constant 0 : index
      %501 = vector.load %arg31[%c0_200, %c0_201] : memref<16x32xf32, #tpu.memory_space<vmem>>, vector<16x32xf32>
      tpu.vector_store %arg31[%c0_200, %c0_201], %500 {strides = array<i32>} : memref<16x32xf32, #tpu.memory_space<vmem>>, vector<16x32xf32>,
    } else {
    }
    %c0 = arith.constant 0 : index
    %c0_1 = arith.constant 0 : index
    %3 = vector.load %arg31[%c0, %c0_1] : memref<16x32xf32, #tpu.memory_space<vmem>>, vector<16x32xf32>
    %4 = arith.index_cast %arg0 : i32 to index
    %c0_2 = arith.constant 0 : index
    %5 = memref.load %arg5[%4, %c0_2] : memref<2x2xf32, #tpu.memory_space<smem>>
    %6 = arith.index_cast %arg0 : i32 to index
    %c1 = arith.constant 1 : index
    %7 = memref.load %arg5[%6, %c1] : memref<2x2xf32, #tpu.memory_space<smem>>
    %c0_3 = arith.constant 0 : index
    %c0_4 = arith.constant 0 : index
    %c0_5 = arith.constant 0 : index
    %8 = vector.load %arg6[%c0_3, %c0_4, %c0_5] : memref<1x1x32xf32, #tpu.memory_space<vmem>>, vector<1x1x32xf32>
    %9 = vector.shape_cast %8 : vector<1x1x32xf32> to vector<1x32xf32>
    %c0_6 = arith.constant 0 : index
    %c0_7 = arith.constant 0 : index
    %c0_8 = arith.constant 0 : index
    %10 = vector.load %arg7[%c0_6, %c0_7, %c0_8] : memref<1x1x32xf32, #tpu.memory_space<vmem>>, vector<1x1x32xf32>
    %11 = vector.shape_cast %10 : vector<1x1x32xf32> to vector<1x32xf32>
    %cst = arith.constant dense<0.000000e+00> : vector<16xf32>
    %12 = vector.multi_reduction <add>, %3, %cst [1] : vector<16x32xf32> to vector<16xf32>
    %13 = vector.shape_cast %12 : vector<16xf32> to vector<16x1xf32>
    %cst_9 = arith.constant 3.200000e+01 : f32
    %14 = vector.broadcast %cst_9 : f32 to vector<16x1xf32>
    %15 = arith.divf %13, %14 : vector<16x1xf32>
    %16 = vector.broadcast %15 : vector<16x1xf32> to vector<16x32xf32>
    %17 = arith.subf %3, %16 : vector<16x32xf32>
    %18 = arith.mulf %17, %17 : vector<16x32xf32>
    %cst_10 = arith.constant dense<0.000000e+00> : vector<16xf32>
    %19 = vector.multi_reduction <add>, %18, %cst_10 [1] : vector<16x32xf32> to vector<16xf32>
    %20 = vector.shape_cast %19 : vector<16xf32> to vector<16x1xf32>
    %cst_11 = arith.constant 3.200000e+01 : f32
    %21 = vector.broadcast %cst_11 : f32 to vector<16x1xf32>
    %22 = arith.divf %20, %21 : vector<16x1xf32>
    %23 = vector.broadcast %15 : vector<16x1xf32> to vector<16x32xf32>
    %24 = arith.subf %3, %23 : vector<16x32xf32>
    %cst_12 = arith.constant 9.99999974E-6 : f32
    %25 = vector.broadcast %cst_12 : f32 to vector<16x1xf32>
    %26 = arith.addf %22, %25 : vector<16x1xf32>
    %27 = math.rsqrt %26 : vector<16x1xf32>
    %28 = vector.broadcast %27 : vector<16x1xf32> to vector<16x32xf32>
    %29 = arith.mulf %24, %28 : vector<16x32xf32>
    %30 = vector.broadcast %9 : vector<1x32xf32> to vector<16x32xf32>
    %31 = arith.mulf %29, %30 : vector<16x32xf32>
    %32 = vector.broadcast %11 : vector<1x32xf32> to vector<16x32xf32>
    %33 = arith.addf %31, %32 : vector<16x32xf32>
    %34 = arith.truncf %33 : vector<16x32xf32> to vector<16x32xbf16>
    %c0_13 = arith.constant 0 : index
    %c0_14 = arith.constant 0 : index
    %c0_15 = arith.constant 0 : index
    %35 = vector.load %arg8[%c0_13, %c0_14, %c0_15] : memref<1x32x32xbf16, #tpu.memory_space<vmem>>, vector<1x32x32xbf16>
    %36 = vector.shape_cast %35 : vector<1x32x32xbf16> to vector<32x32xbf16>
    %cst_16 = arith.constant dense<0.000000e+00> : vector<16x32xf32>
    %37 = tpu.matmul %34, %36, %cst_16 {dimension_numbers = #tpu.dot_dimension_numbers<[1], [0], [0], [1], [0, 0, 1, 1], [], []>} : vector<16x32xbf16>, vector<32x32xbf16>, vector<16x32xf32> -> vector<16x32xf32>
    %c0_17 = arith.constant 0 : index
    %c0_18 = arith.constant 0 : index
    %38 = vector.load %arg2[%c0_17, %c0_18] : memref<16x32xf32, #tpu.memory_space<vmem>>, vector<16x32xf32>
    %39 = arith.truncf %38 : vector<16x32xf32> to vector<16x32xbf16>
    %c0_19 = arith.constant 0 : index
    %c0_20 = arith.constant 0 : index
    %c0_21 = arith.constant 0 : index
    %40 = vector.load %arg9[%c0_19, %c0_20, %c0_21] : memref<1x32x64xbf16, #tpu.memory_space<vmem>>, vector<1x32x64xbf16>
    %41 = vector.shape_cast %40 : vector<1x32x64xbf16> to vector<32x64xbf16>
    %cst_22 = arith.constant dense<0.000000e+00> : vector<16x64xf32>
    %42 = tpu.matmul %39, %41, %cst_22 {dimension_numbers = #tpu.dot_dimension_numbers<[1], [0], [0], [1], [0, 0, 1, 1], [], []>} : vector<16x32xbf16>, vector<32x64xbf16>, vector<16x64xf32> -> vector<16x64xf32>
    %43 = tpu.iota {dimensions = array<i32: 1>} : vector<8x8xi32>
    %c0_23 = arith.constant 0 : index
    %c0_24 = arith.constant 0 : index
    %c0_25 = arith.constant 0 : index
    %44 = vector.load %arg3[%c0_23, %c0_24, %c0_25] : memref<2x8x1xi32, #tpu.memory_space<vmem>>, vector<1x8x1xi32>
    %45 = vector.shape_cast %44 : vector<1x8x1xi32> to vector<8x1xi32>
    %c1_i32 = arith.constant 1 : i32
    %46 = vector.broadcast %c1_i32 : i32 to vector<8x1xi32>
    %47 = arith.subi %45, %46 : vector<8x1xi32>
    %c8_i32 = arith.constant 8 : i32
    %48 = vector.broadcast %c8_i32 : i32 to vector<8x1xi32>
    %49 = arith.muli %47, %48 : vector<8x1xi32>
    %50 = vector.broadcast %49 : vector<8x1xi32> to vector<8x8xi32>
    %51 = arith.cmpi sge, %43, %50 : vector<8x8xi32>
    %c8_i32_26 = arith.constant 8 : i32
    %52 = vector.broadcast %c8_i32_26 : i32 to vector<8x1xi32>
    %53 = arith.muli %45, %52 : vector<8x1xi32>
    %54 = vector.broadcast %53 : vector<8x1xi32> to vector<8x8xi32>
    %55 = arith.cmpi slt, %43, %54 : vector<8x8xi32>
    %56 = arith.andi %51, %55 : vector<8x8xi1>
    %57 = vector.extract_strided_slice %37 {offsets = [0, 0], sizes = [8, 32], strides = [1, 1]} : vector<16x32xf32> to vector<8x32xf32>
    %58 = vector.extract_strided_slice %42 {offsets = [0, 0], sizes = [8, 32], strides = [1, 1]} : vector<16x64xf32> to vector<8x32xf32>
    %59 = vector.extract_strided_slice %42 {offsets = [0, 32], sizes = [8, 32], strides = [1, 1]} : vector<16x64xf32> to vector<8x32xf32>
    %c0_27 = arith.constant 0 : index
    %c0_28 = arith.constant 0 : index
    %c0_29 = arith.constant 0 : index
    %60 = vector.load %arg10[%c0_27, %c0_28, %c0_29] : memref<1x32x32xbf16, #tpu.memory_space<vmem>>, vector<1x32x32xbf16>
    %61 = vector.shape_cast %60 : vector<1x32x32xbf16> to vector<32x32xbf16>
    %cst_30 = arith.constant 0.000000e+00 : f32
    %62 = vector.broadcast %cst_30 : f32 to vector<8x32xf32>
    %63 = vector.extract_strided_slice %57 {offsets = [0, 0], sizes = [8, 16], strides = [1, 1]} : vector<8x32xf32> to vector<8x16xf32>
    %64 = arith.truncf %63 : vector<8x16xf32> to vector<8x16xbf16>
    %65 = vector.extract_strided_slice %58 {offsets = [0, 0], sizes = [8, 16], strides = [1, 1]} : vector<8x32xf32> to vector<8x16xf32>
    %66 = arith.truncf %65 : vector<8x16xf32> to vector<8x16xbf16>
    %cst_31 = arith.constant dense<0.000000e+00> : vector<8x8xf32>
    %67 = tpu.matmul %64, %66, %cst_31 {dimension_numbers = #tpu.dot_dimension_numbers<[1], [1], [0], [0], [0, 0, 1, 0], [], []>} : vector<8x16xbf16>, vector<8x16xbf16>, vector<8x8xf32> -> vector<8x8xf32>
    %cst_32 = arith.constant -1.000000e+30 : f32
    %68 = vector.broadcast %cst_32 : f32 to vector<8x8xf32>
    %69 = arith.select %56, %67, %68 : vector<8x8xi1>, vector<8x8xf32>
    %cst_33 = arith.constant dense<0xFF800000> : vector<8xf32>
    %70 = vector.multi_reduction <maximumf>, %69, %cst_33 [1] : vector<8x8xf32> to vector<8xf32>
    %71 = vector.shape_cast %70 : vector<8xf32> to vector<8x1xf32>
    %72 = vector.broadcast %71 : vector<8x1xf32> to vector<8x8xf32>
    %73 = arith.subf %69, %72 : vector<8x8xf32>
    %74 = math.exp %73 : vector<8x8xf32>
    %cst_34 = arith.constant dense<0.000000e+00> : vector<8xf32>
    %75 = vector.multi_reduction <add>, %74, %cst_34 [1] : vector<8x8xf32> to vector<8xf32>
    %76 = vector.shape_cast %75 : vector<8xf32> to vector<8x1xf32>
    %77 = tpu.reciprocal %76 {approx = true} : vector<8x1xf32> -> vector<8x1xf32>
    %78 = vector.broadcast %77 : vector<8x1xf32> to vector<8x8xf32>
    %79 = arith.mulf %74, %78 : vector<8x8xf32>
    %80 = arith.truncf %79 : vector<8x8xf32> to vector<8x8xbf16>
    %81 = vector.extract_strided_slice %59 {offsets = [0, 0], sizes = [8, 16], strides = [1, 1]} : vector<8x32xf32> to vector<8x16xf32>
    %82 = arith.truncf %81 : vector<8x16xf32> to vector<8x16xbf16>
    %cst_35 = arith.constant dense<0.000000e+00> : vector<8x16xf32>
    %83 = tpu.matmul %80, %82, %cst_35 {dimension_numbers = #tpu.dot_dimension_numbers<[1], [0], [0], [1], [0, 0, 1, 1], [], []>} : vector<8x8xbf16>, vector<8x16xbf16>, vector<8x16xf32> -> vector<8x16xf32>
    %84 = arith.truncf %83 : vector<8x16xf32> to vector<8x16xbf16>
    %85 = vector.extract_strided_slice %61 {offsets = [0, 0], sizes = [16, 32], strides = [1, 1]} : vector<32x32xbf16> to vector<16x32xbf16>
    %cst_36 = arith.constant dense<0.000000e+00> : vector<8x32xf32>
    %86 = tpu.matmul %84, %85, %cst_36 {dimension_numbers = #tpu.dot_dimension_numbers<[1], [0], [0], [1], [0, 0, 1, 1], [], []>} : vector<8x16xbf16>, vector<16x32xbf16>, vector<8x32xf32> -> vector<8x32xf32>
    %87 = arith.addf %62, %86 : vector<8x32xf32>
    %88 = vector.extract_strided_slice %57 {offsets = [0, 16], sizes = [8, 16], strides = [1, 1]} : vector<8x32xf32> to vector<8x16xf32>
    %89 = arith.truncf %88 : vector<8x16xf32> to vector<8x16xbf16>
    %90 = vector.extract_strided_slice %58 {offsets = [0, 16], sizes = [8, 16], strides = [1, 1]} : vector<8x32xf32> to vector<8x16xf32>
    %91 = arith.truncf %90 : vector<8x16xf32> to vector<8x16xbf16>
    %cst_37 = arith.constant dense<0.000000e+00> : vector<8x8xf32>
    %92 = tpu.matmul %89, %91, %cst_37 {dimension_numbers = #tpu.dot_dimension_numbers<[1], [1], [0], [0], [0, 0, 1, 0], [], []>} : vector<8x16xbf16>, vector<8x16xbf16>, vector<8x8xf32> -> vector<8x8xf32>
    %cst_38 = arith.constant -1.000000e+30 : f32
    %93 = vector.broadcast %cst_38 : f32 to vector<8x8xf32>
    %94 = arith.select %56, %92, %93 : vector<8x8xi1>, vector<8x8xf32>
    %cst_39 = arith.constant dense<0xFF800000> : vector<8xf32>
    %95 = vector.multi_reduction <maximumf>, %94, %cst_39 [1] : vector<8x8xf32> to vector<8xf32>
    %96 = vector.shape_cast %95 : vector<8xf32> to vector<8x1xf32>
    %97 = vector.broadcast %96 : vector<8x1xf32> to vector<8x8xf32>
    %98 = arith.subf %94, %97 : vector<8x8xf32>
    %99 = math.exp %98 : vector<8x8xf32>
    %cst_40 = arith.constant dense<0.000000e+00> : vector<8xf32>
    %100 = vector.multi_reduction <add>, %99, %cst_40 [1] : vector<8x8xf32> to vector<8xf32>
    %101 = vector.shape_cast %100 : vector<8xf32> to vector<8x1xf32>
    %102 = tpu.reciprocal %101 {approx = true} : vector<8x1xf32> -> vector<8x1xf32>
    %103 = vector.broadcast %102 : vector<8x1xf32> to vector<8x8xf32>
    %104 = arith.mulf %99, %103 : vector<8x8xf32>
    %105 = arith.truncf %104 : vector<8x8xf32> to vector<8x8xbf16>
    %106 = vector.extract_strided_slice %59 {offsets = [0, 16], sizes = [8, 16], strides = [1, 1]} : vector<8x32xf32> to vector<8x16xf32>
    %107 = arith.truncf %106 : vector<8x16xf32> to vector<8x16xbf16>
    %cst_41 = arith.constant dense<0.000000e+00> : vector<8x16xf32>
    %108 = tpu.matmul %105, %107, %cst_41 {dimension_numbers = #tpu.dot_dimension_numbers<[1], [0], [0], [1], [0, 0, 1, 1], [], []>} : vector<8x8xbf16>, vector<8x16xbf16>, vector<8x16xf32> -> vector<8x16xf32>
    %109 = arith.truncf %108 : vector<8x16xf32> to vector<8x16xbf16>
    %110 = vector.extract_strided_slice %61 {offsets = [16, 0], sizes = [16, 32], strides = [1, 1]} : vector<32x32xbf16> to vector<16x32xbf16>
    %cst_42 = arith.constant dense<0.000000e+00> : vector<8x32xf32>
    %111 = tpu.matmul %109, %110, %cst_42 {dimension_numbers = #tpu.dot_dimension_numbers<[1], [0], [0], [1], [0, 0, 1, 1], [], []>} : vector<8x16xbf16>, vector<16x32xbf16>, vector<8x32xf32> -> vector<8x32xf32>
    %112 = arith.addf %87, %111 : vector<8x32xf32>
    %c0_i32_43 = arith.constant 0 : i32
    %113 = vector.broadcast %c0_i32_43 : i32 to vector<8x1xi32>
    %114 = arith.cmpi sgt, %45, %113 : vector<8x1xi32>
    %cst_44 = arith.constant 0.000000e+00 : f32
    %115 = vector.shape_cast %114 : vector<8x1xi1> to vector<8x1xi1>
    %116 = vector.broadcast %115 : vector<8x1xi1> to vector<8x32xi1>
    %117 = vector.broadcast %cst_44 : f32 to vector<8x32xf32>
    %118 = arith.select %116, %112, %117 : vector<8x32xi1>, vector<8x32xf32>
    %c1_45 = arith.constant 1 : index
    %c0_46 = arith.constant 0 : index
    %c0_47 = arith.constant 0 : index
    %119 = vector.load %arg3[%c1_45, %c0_46, %c0_47] : memref<2x8x1xi32, #tpu.memory_space<vmem>>, vector<1x8x1xi32>
    %120 = vector.shape_cast %119 : vector<1x8x1xi32> to vector<8x1xi32>
    %c1_i32_48 = arith.constant 1 : i32
    %121 = vector.broadcast %c1_i32_48 : i32 to vector<8x1xi32>
    %122 = arith.subi %120, %121 : vector<8x1xi32>
    %c8_i32_49 = arith.constant 8 : i32
    %123 = vector.broadcast %c8_i32_49 : i32 to vector<8x1xi32>
    %124 = arith.muli %122, %123 : vector<8x1xi32>
    %125 = vector.broadcast %124 : vector<8x1xi32> to vector<8x8xi32>
    %126 = arith.cmpi sge, %43, %125 : vector<8x8xi32>
    %c8_i32_50 = arith.constant 8 : i32
    %127 = vector.broadcast %c8_i32_50 : i32 to vector<8x1xi32>
    %128 = arith.muli %120, %127 : vector<8x1xi32>
    %129 = vector.broadcast %128 : vector<8x1xi32> to vector<8x8xi32>
    %130 = arith.cmpi slt, %43, %129 : vector<8x8xi32>
    %131 = arith.andi %126, %130 : vector<8x8xi1>
    %132 = vector.extract_strided_slice %37 {offsets = [8, 0], sizes = [8, 32], strides = [1, 1]} : vector<16x32xf32> to vector<8x32xf32>
    %133 = vector.extract_strided_slice %42 {offsets = [8, 0], sizes = [8, 32], strides = [1, 1]} : vector<16x64xf32> to vector<8x32xf32>
    %134 = vector.extract_strided_slice %42 {offsets = [8, 32], sizes = [8, 32], strides = [1, 1]} : vector<16x64xf32> to vector<8x32xf32>
    %c0_51 = arith.constant 0 : index
    %c0_52 = arith.constant 0 : index
    %c0_53 = arith.constant 0 : index
    %135 = vector.load %arg10[%c0_51, %c0_52, %c0_53] : memref<1x32x32xbf16, #tpu.memory_space<vmem>>, vector<1x32x32xbf16>
    %136 = vector.shape_cast %135 : vector<1x32x32xbf16> to vector<32x32xbf16>
    %cst_54 = arith.constant 0.000000e+00 : f32
    %137 = vector.broadcast %cst_54 : f32 to vector<8x32xf32>
    %138 = vector.extract_strided_slice %132 {offsets = [0, 0], sizes = [8, 16], strides = [1, 1]} : vector<8x32xf32> to vector<8x16xf32>
    %139 = arith.truncf %138 : vector<8x16xf32> to vector<8x16xbf16>
    %140 = vector.extract_strided_slice %133 {offsets = [0, 0], sizes = [8, 16], strides = [1, 1]} : vector<8x32xf32> to vector<8x16xf32>
    %141 = arith.truncf %140 : vector<8x16xf32> to vector<8x16xbf16>
    %cst_55 = arith.constant dense<0.000000e+00> : vector<8x8xf32>
    %142 = tpu.matmul %139, %141, %cst_55 {dimension_numbers = #tpu.dot_dimension_numbers<[1], [1], [0], [0], [0, 0, 1, 0], [], []>} : vector<8x16xbf16>, vector<8x16xbf16>, vector<8x8xf32> -> vector<8x8xf32>
    %cst_56 = arith.constant -1.000000e+30 : f32
    %143 = vector.broadcast %cst_56 : f32 to vector<8x8xf32>
    %144 = arith.select %131, %142, %143 : vector<8x8xi1>, vector<8x8xf32>
    %cst_57 = arith.constant dense<0xFF800000> : vector<8xf32>
    %145 = vector.multi_reduction <maximumf>, %144, %cst_57 [1] : vector<8x8xf32> to vector<8xf32>
    %146 = vector.shape_cast %145 : vector<8xf32> to vector<8x1xf32>
    %147 = vector.broadcast %146 : vector<8x1xf32> to vector<8x8xf32>
    %148 = arith.subf %144, %147 : vector<8x8xf32>
    %149 = math.exp %148 : vector<8x8xf32>
    %cst_58 = arith.constant dense<0.000000e+00> : vector<8xf32>
    %150 = vector.multi_reduction <add>, %149, %cst_58 [1] : vector<8x8xf32> to vector<8xf32>
    %151 = vector.shape_cast %150 : vector<8xf32> to vector<8x1xf32>
    %152 = tpu.reciprocal %151 {approx = true} : vector<8x1xf32> -> vector<8x1xf32>
    %153 = vector.broadcast %152 : vector<8x1xf32> to vector<8x8xf32>
    %154 = arith.mulf %149, %153 : vector<8x8xf32>
    %155 = arith.truncf %154 : vector<8x8xf32> to vector<8x8xbf16>
    %156 = vector.extract_strided_slice %134 {offsets = [0, 0], sizes = [8, 16], strides = [1, 1]} : vector<8x32xf32> to vector<8x16xf32>
    %157 = arith.truncf %156 : vector<8x16xf32> to vector<8x16xbf16>
    %cst_59 = arith.constant dense<0.000000e+00> : vector<8x16xf32>
    %158 = tpu.matmul %155, %157, %cst_59 {dimension_numbers = #tpu.dot_dimension_numbers<[1], [0], [0], [1], [0, 0, 1, 1], [], []>} : vector<8x8xbf16>, vector<8x16xbf16>, vector<8x16xf32> -> vector<8x16xf32>
    %159 = arith.truncf %158 : vector<8x16xf32> to vector<8x16xbf16>
    %160 = vector.extract_strided_slice %136 {offsets = [0, 0], sizes = [16, 32], strides = [1, 1]} : vector<32x32xbf16> to vector<16x32xbf16>
    %cst_60 = arith.constant dense<0.000000e+00> : vector<8x32xf32>
    %161 = tpu.matmul %159, %160, %cst_60 {dimension_numbers = #tpu.dot_dimension_numbers<[1], [0], [0], [1], [0, 0, 1, 1], [], []>} : vector<8x16xbf16>, vector<16x32xbf16>, vector<8x32xf32> -> vector<8x32xf32>
    %162 = arith.addf %137, %161 : vector<8x32xf32>
    %163 = vector.extract_strided_slice %132 {offsets = [0, 16], sizes = [8, 16], strides = [1, 1]} : vector<8x32xf32> to vector<8x16xf32>
    %164 = arith.truncf %163 : vector<8x16xf32> to vector<8x16xbf16>
    %165 = vector.extract_strided_slice %133 {offsets = [0, 16], sizes = [8, 16], strides = [1, 1]} : vector<8x32xf32> to vector<8x16xf32>
    %166 = arith.truncf %165 : vector<8x16xf32> to vector<8x16xbf16>
    %cst_61 = arith.constant dense<0.000000e+00> : vector<8x8xf32>
    %167 = tpu.matmul %164, %166, %cst_61 {dimension_numbers = #tpu.dot_dimension_numbers<[1], [1], [0], [0], [0, 0, 1, 0], [], []>} : vector<8x16xbf16>, vector<8x16xbf16>, vector<8x8xf32> -> vector<8x8xf32>
    %cst_62 = arith.constant -1.000000e+30 : f32
    %168 = vector.broadcast %cst_62 : f32 to vector<8x8xf32>
    %169 = arith.select %131, %167, %168 : vector<8x8xi1>, vector<8x8xf32>
    %cst_63 = arith.constant dense<0xFF800000> : vector<8xf32>
    %170 = vector.multi_reduction <maximumf>, %169, %cst_63 [1] : vector<8x8xf32> to vector<8xf32>
    %171 = vector.shape_cast %170 : vector<8xf32> to vector<8x1xf32>
    %172 = vector.broadcast %171 : vector<8x1xf32> to vector<8x8xf32>
    %173 = arith.subf %169, %172 : vector<8x8xf32>
    %174 = math.exp %173 : vector<8x8xf32>
    %cst_64 = arith.constant dense<0.000000e+00> : vector<8xf32>
    %175 = vector.multi_reduction <add>, %174, %cst_64 [1] : vector<8x8xf32> to vector<8xf32>
    %176 = vector.shape_cast %175 : vector<8xf32> to vector<8x1xf32>
    %177 = tpu.reciprocal %176 {approx = true} : vector<8x1xf32> -> vector<8x1xf32>
    %178 = vector.broadcast %177 : vector<8x1xf32> to vector<8x8xf32>
    %179 = arith.mulf %174, %178 : vector<8x8xf32>
    %180 = arith.truncf %179 : vector<8x8xf32> to vector<8x8xbf16>
    %181 = vector.extract_strided_slice %134 {offsets = [0, 16], sizes = [8, 16], strides = [1, 1]} : vector<8x32xf32> to vector<8x16xf32>
    %182 = arith.truncf %181 : vector<8x16xf32> to vector<8x16xbf16>
    %cst_65 = arith.constant dense<0.000000e+00> : vector<8x16xf32>
    %183 = tpu.matmul %180, %182, %cst_65 {dimension_numbers = #tpu.dot_dimension_numbers<[1], [0], [0], [1], [0, 0, 1, 1], [], []>} : vector<8x8xbf16>, vector<8x16xbf16>, vector<8x16xf32> -> vector<8x16xf32>
    %184 = arith.truncf %183 : vector<8x16xf32> to vector<8x16xbf16>
    %185 = vector.extract_strided_slice %136 {offsets = [16, 0], sizes = [16, 32], strides = [1, 1]} : vector<32x32xbf16> to vector<16x32xbf16>
    %cst_66 = arith.constant dense<0.000000e+00> : vector<8x32xf32>
    %186 = tpu.matmul %184, %185, %cst_66 {dimension_numbers = #tpu.dot_dimension_numbers<[1], [0], [0], [1], [0, 0, 1, 1], [], []>} : vector<8x16xbf16>, vector<16x32xbf16>, vector<8x32xf32> -> vector<8x32xf32>
    %187 = arith.addf %162, %186 : vector<8x32xf32>
    %c0_i32_67 = arith.constant 0 : i32
    %188 = vector.broadcast %c0_i32_67 : i32 to vector<8x1xi32>
    %189 = arith.cmpi sgt, %120, %188 : vector<8x1xi32>
    %cst_68 = arith.constant 0.000000e+00 : f32
    %190 = vector.shape_cast %189 : vector<8x1xi1> to vector<8x1xi1>
    %191 = vector.broadcast %190 : vector<8x1xi1> to vector<8x32xi1>
    %192 = vector.broadcast %cst_68 : f32 to vector<8x32xf32>
    %193 = arith.select %191, %187, %192 : vector<8x32xi1>, vector<8x32xf32>
    %194 = tpu.concatenate %118, %193 in 0 : vector<8x32xf32>, vector<8x32xf32> -> vector<16x32xf32>
    %195 = vector.broadcast %5 : f32 to vector<16x32xf32>
    %196 = arith.mulf %195, %194 : vector<16x32xf32>
    %197 = arith.addf %3, %196 : vector<16x32xf32>
    %c0_69 = arith.constant 0 : index
    %c0_70 = arith.constant 0 : index
    %c0_71 = arith.constant 0 : index
    %198 = vector.load %arg11[%c0_69, %c0_70, %c0_71] : memref<1x1x32xf32, #tpu.memory_space<vmem>>, vector<1x1x32xf32>
    %199 = vector.shape_cast %198 : vector<1x1x32xf32> to vector<1x32xf32>
    %c0_72 = arith.constant 0 : index
    %c0_73 = arith.constant 0 : index
    %c0_74 = arith.constant 0 : index
    %200 = vector.load %arg12[%c0_72, %c0_73, %c0_74] : memref<1x1x32xf32, #tpu.memory_space<vmem>>, vector<1x1x32xf32>
    %201 = vector.shape_cast %200 : vector<1x1x32xf32> to vector<1x32xf32>
    %cst_75 = arith.constant dense<0.000000e+00> : vector<16xf32>
    %202 = vector.multi_reduction <add>, %197, %cst_75 [1] : vector<16x32xf32> to vector<16xf32>
    %203 = vector.shape_cast %202 : vector<16xf32> to vector<16x1xf32>
    %cst_76 = arith.constant 3.200000e+01 : f32
    %204 = vector.broadcast %cst_76 : f32 to vector<16x1xf32>
    %205 = arith.divf %203, %204 : vector<16x1xf32>
    %206 = vector.broadcast %205 : vector<16x1xf32> to vector<16x32xf32>
    %207 = arith.subf %197, %206 : vector<16x32xf32>
    %208 = arith.mulf %207, %207 : vector<16x32xf32>
    %cst_77 = arith.constant dense<0.000000e+00> : vector<16xf32>
    %209 = vector.multi_reduction <add>, %208, %cst_77 [1] : vector<16x32xf32> to vector<16xf32>
    %210 = vector.shape_cast %209 : vector<16xf32> to vector<16x1xf32>
    %cst_78 = arith.constant 3.200000e+01 : f32
    %211 = vector.broadcast %cst_78 : f32 to vector<16x1xf32>
    %212 = arith.divf %210, %211 : vector<16x1xf32>
    %213 = vector.broadcast %205 : vector<16x1xf32> to vector<16x32xf32>
    %214 = arith.subf %197, %213 : vector<16x32xf32>
    %cst_79 = arith.constant 9.99999974E-6 : f32
    %215 = vector.broadcast %cst_79 : f32 to vector<16x1xf32>
    %216 = arith.addf %212, %215 : vector<16x1xf32>
    %217 = math.rsqrt %216 : vector<16x1xf32>
    %218 = vector.broadcast %217 : vector<16x1xf32> to vector<16x32xf32>
    %219 = arith.mulf %214, %218 : vector<16x32xf32>
    %220 = vector.broadcast %199 : vector<1x32xf32> to vector<16x32xf32>
    %221 = arith.mulf %219, %220 : vector<16x32xf32>
    %222 = vector.broadcast %201 : vector<1x32xf32> to vector<16x32xf32>
    %223 = arith.addf %221, %222 : vector<16x32xf32>
    %224 = arith.truncf %223 : vector<16x32xf32> to vector<16x32xbf16>
    %c0_80 = arith.constant 0 : index
    %c0_81 = arith.constant 0 : index
    %c0_82 = arith.constant 0 : index
    %225 = vector.load %arg13[%c0_80, %c0_81, %c0_82] : memref<1x32x128xbf16, #tpu.memory_space<vmem>>, vector<1x32x128xbf16>
    %226 = vector.shape_cast %225 : vector<1x32x128xbf16> to vector<32x128xbf16>
    %cst_83 = arith.constant dense<0.000000e+00> : vector<16x128xf32>
    %227 = tpu.matmul %224, %226, %cst_83 {dimension_numbers = #tpu.dot_dimension_numbers<[1], [0], [0], [1], [0, 0, 1, 1], [], []>} : vector<16x32xbf16>, vector<32x128xbf16>, vector<16x128xf32> -> vector<16x128xf32>
    %cst_84 = arith.constant 5.000000e-01 : f32
    %228 = vector.broadcast %cst_84 : f32 to vector<16x128xf32>
    %229 = arith.mulf %228, %227 : vector<16x128xf32>
    %cst_85 = arith.constant 4.471500e-02 : f32
    %230 = vector.broadcast %cst_85 : f32 to vector<16x128xf32>
    %231 = arith.mulf %230, %227 : vector<16x128xf32>
    %232 = arith.mulf %231, %227 : vector<16x128xf32>
    %233 = arith.mulf %232, %227 : vector<16x128xf32>
    %234 = arith.addf %227, %233 : vector<16x128xf32>
    %cst_86 = arith.constant 0.797884583 : f32
    %235 = vector.broadcast %cst_86 : f32 to vector<16x128xf32>
    %236 = arith.mulf %235, %234 : vector<16x128xf32>
    %237 = math.tanh %236 : vector<16x128xf32>
    %cst_87 = arith.constant 1.000000e+00 : f32
    %238 = vector.broadcast %cst_87 : f32 to vector<16x128xf32>
    %239 = arith.addf %238, %237 : vector<16x128xf32>
    %240 = arith.mulf %229, %239 : vector<16x128xf32>
    %241 = arith.truncf %240 : vector<16x128xf32> to vector<16x128xbf16>
    %c0_88 = arith.constant 0 : index
    %c0_89 = arith.constant 0 : index
    %c0_90 = arith.constant 0 : index
    %242 = vector.load %arg14[%c0_88, %c0_89, %c0_90] : memref<1x128x32xbf16, #tpu.memory_space<vmem>>, vector<1x128x32xbf16>
    %243 = vector.shape_cast %242 : vector<1x128x32xbf16> to vector<128x32xbf16>
    %cst_91 = arith.constant dense<0.000000e+00> : vector<16x32xf32>
    %244 = tpu.matmul %241, %243, %cst_91 {dimension_numbers = #tpu.dot_dimension_numbers<[1], [0], [0], [1], [0, 0, 1, 1], [], []>} : vector<16x128xbf16>, vector<128x32xbf16>, vector<16x32xf32> -> vector<16x32xf32>
    %245 = vector.broadcast %7 : f32 to vector<16x32xf32>
    %246 = arith.mulf %245, %244 : vector<16x32xf32>
    %247 = arith.addf %197, %246 : vector<16x32xf32>
    %c0_92 = arith.constant 0 : index
    %c0_93 = arith.constant 0 : index
    %c0_94 = arith.constant 0 : index
    %248 = vector.load %arg15[%c0_92, %c0_93, %c0_94] : memref<1x1x32xf32, #tpu.memory_space<vmem>>, vector<1x1x32xf32>
    %249 = vector.shape_cast %248 : vector<1x1x32xf32> to vector<1x32xf32>
    %c0_95 = arith.constant 0 : index
    %c0_96 = arith.constant 0 : index
    %c0_97 = arith.constant 0 : index
    %250 = vector.load %arg16[%c0_95, %c0_96, %c0_97] : memref<1x1x32xf32, #tpu.memory_space<vmem>>, vector<1x1x32xf32>
    %251 = vector.shape_cast %250 : vector<1x1x32xf32> to vector<1x32xf32>
    %cst_98 = arith.constant dense<0.000000e+00> : vector<16xf32>
    %252 = vector.multi_reduction <add>, %247, %cst_98 [1] : vector<16x32xf32> to vector<16xf32>
    %253 = vector.shape_cast %252 : vector<16xf32> to vector<16x1xf32>
    %cst_99 = arith.constant 3.200000e+01 : f32
    %254 = vector.broadcast %cst_99 : f32 to vector<16x1xf32>
    %255 = arith.divf %253, %254 : vector<16x1xf32>
    %256 = vector.broadcast %255 : vector<16x1xf32> to vector<16x32xf32>
    %257 = arith.subf %247, %256 : vector<16x32xf32>
    %258 = arith.mulf %257, %257 : vector<16x32xf32>
    %cst_100 = arith.constant dense<0.000000e+00> : vector<16xf32>
    %259 = vector.multi_reduction <add>, %258, %cst_100 [1] : vector<16x32xf32> to vector<16xf32>
    %260 = vector.shape_cast %259 : vector<16xf32> to vector<16x1xf32>
    %cst_101 = arith.constant 3.200000e+01 : f32
    %261 = vector.broadcast %cst_101 : f32 to vector<16x1xf32>
    %262 = arith.divf %260, %261 : vector<16x1xf32>
    %263 = vector.broadcast %255 : vector<16x1xf32> to vector<16x32xf32>
    %264 = arith.subf %247, %263 : vector<16x32xf32>
    %cst_102 = arith.constant 9.99999974E-6 : f32
    %265 = vector.broadcast %cst_102 : f32 to vector<16x1xf32>
    %266 = arith.addf %262, %265 : vector<16x1xf32>
    %267 = math.rsqrt %266 : vector<16x1xf32>
    %268 = vector.broadcast %267 : vector<16x1xf32> to vector<16x32xf32>
    %269 = arith.mulf %264, %268 : vector<16x32xf32>
    %270 = vector.broadcast %249 : vector<1x32xf32> to vector<16x32xf32>
    %271 = arith.mulf %269, %270 : vector<16x32xf32>
    %272 = vector.broadcast %251 : vector<1x32xf32> to vector<16x32xf32>
    %273 = arith.addf %271, %272 : vector<16x32xf32>
    %274 = arith.truncf %273 : vector<16x32xf32> to vector<16x32xbf16>
    %c0_103 = arith.constant 0 : index
    %c0_104 = arith.constant 0 : index
    %c0_105 = arith.constant 0 : index
    %275 = vector.load %arg17[%c0_103, %c0_104, %c0_105] : memref<1x32x96xbf16, #tpu.memory_space<vmem>>, vector<1x32x96xbf16>
    %276 = vector.shape_cast %275 : vector<1x32x96xbf16> to vector<32x96xbf16>
    %cst_106 = arith.constant dense<0.000000e+00> : vector<16x96xf32>
    %277 = tpu.matmul %274, %276, %cst_106 {dimension_numbers = #tpu.dot_dimension_numbers<[1], [0], [0], [1], [0, 0, 1, 1], [], []>} : vector<16x32xbf16>, vector<32x96xbf16>, vector<16x96xf32> -> vector<16x96xf32>
    %c0_107 = arith.constant 0 : index
    %c0_108 = arith.constant 0 : index
    %c0_109 = arith.constant 0 : index
    %278 = vector.load %arg18[%c0_107, %c0_108, %c0_109] : memref<1x1x96xf32, #tpu.memory_space<vmem>>, vector<1x1x96xf32>
    %279 = vector.shape_cast %278 : vector<1x1x96xf32> to vector<1x96xf32>
    %280 = vector.broadcast %279 : vector<1x96xf32> to vector<16x96xf32>
    %281 = arith.addf %277, %280 : vector<16x96xf32>
    %282 = tpu.iota {dimensions = array<i32: 0>} : vector<8x8xi32>
    %283 = tpu.iota {dimensions = array<i32: 1>} : vector<8x8xi32>
    %284 = arith.cmpi sge, %282, %283 : vector<8x8xi32>
    %c0_110 = arith.constant 0 : index
    %c0_111 = arith.constant 0 : index
    %c0_112 = arith.constant 0 : index
    %285 = vector.load %arg4[%c0_110, %c0_111, %c0_112] : memref<2x1x8xi32, #tpu.memory_space<vmem>>, vector<1x1x8xi32>
    %286 = vector.shape_cast %285 : vector<1x1x8xi32> to vector<1x8xi32>
    %c0_i32_113 = arith.constant 0 : i32
    %287 = vector.broadcast %c0_i32_113 : i32 to vector<1x8xi32>
    %288 = arith.cmpi sgt, %286, %287 : vector<1x8xi32>
    %289 = vector.broadcast %288 : vector<1x8xi1> to vector<8x8xi1>
    %290 = arith.andi %284, %289 : vector<8x8xi1>
    %291 = vector.extract_strided_slice %281 {offsets = [0, 0], sizes = [8, 32], strides = [1, 1]} : vector<16x96xf32> to vector<8x32xf32>
    %292 = vector.extract_strided_slice %281 {offsets = [0, 32], sizes = [8, 32], strides = [1, 1]} : vector<16x96xf32> to vector<8x32xf32>
    %293 = vector.extract_strided_slice %281 {offsets = [0, 64], sizes = [8, 32], strides = [1, 1]} : vector<16x96xf32> to vector<8x32xf32>
    %c0_114 = arith.constant 0 : index
    %c0_115 = arith.constant 0 : index
    %c0_116 = arith.constant 0 : index
    %294 = vector.load %arg19[%c0_114, %c0_115, %c0_116] : memref<1x32x32xbf16, #tpu.memory_space<vmem>>, vector<1x32x32xbf16>
    %295 = vector.shape_cast %294 : vector<1x32x32xbf16> to vector<32x32xbf16>
    %cst_117 = arith.constant 0.000000e+00 : f32
    %296 = vector.broadcast %cst_117 : f32 to vector<8x32xf32>
    %297 = vector.extract_strided_slice %291 {offsets = [0, 0], sizes = [8, 16], strides = [1, 1]} : vector<8x32xf32> to vector<8x16xf32>
    %298 = arith.truncf %297 : vector<8x16xf32> to vector<8x16xbf16>
    %299 = vector.extract_strided_slice %292 {offsets = [0, 0], sizes = [8, 16], strides = [1, 1]} : vector<8x32xf32> to vector<8x16xf32>
    %300 = arith.truncf %299 : vector<8x16xf32> to vector<8x16xbf16>
    %cst_118 = arith.constant dense<0.000000e+00> : vector<8x8xf32>
    %301 = tpu.matmul %298, %300, %cst_118 {dimension_numbers = #tpu.dot_dimension_numbers<[1], [1], [0], [0], [0, 0, 1, 0], [], []>} : vector<8x16xbf16>, vector<8x16xbf16>, vector<8x8xf32> -> vector<8x8xf32>
    %cst_119 = arith.constant -1.000000e+30 : f32
    %302 = vector.broadcast %cst_119 : f32 to vector<8x8xf32>
    %303 = arith.select %290, %301, %302 : vector<8x8xi1>, vector<8x8xf32>
    %cst_120 = arith.constant dense<0xFF800000> : vector<8xf32>
    %304 = vector.multi_reduction <maximumf>, %303, %cst_120 [1] : vector<8x8xf32> to vector<8xf32>
    %305 = vector.shape_cast %304 : vector<8xf32> to vector<8x1xf32>
    %306 = vector.broadcast %305 : vector<8x1xf32> to vector<8x8xf32>
    %307 = arith.subf %303, %306 : vector<8x8xf32>
    %308 = math.exp %307 : vector<8x8xf32>
    %cst_121 = arith.constant dense<0.000000e+00> : vector<8xf32>
    %309 = vector.multi_reduction <add>, %308, %cst_121 [1] : vector<8x8xf32> to vector<8xf32>
    %310 = vector.shape_cast %309 : vector<8xf32> to vector<8x1xf32>
    %311 = tpu.reciprocal %310 {approx = true} : vector<8x1xf32> -> vector<8x1xf32>
    %312 = vector.broadcast %311 : vector<8x1xf32> to vector<8x8xf32>
    %313 = arith.mulf %308, %312 : vector<8x8xf32>
    %314 = arith.truncf %313 : vector<8x8xf32> to vector<8x8xbf16>
    %315 = vector.extract_strided_slice %293 {offsets = [0, 0], sizes = [8, 16], strides = [1, 1]} : vector<8x32xf32> to vector<8x16xf32>
    %316 = arith.truncf %315 : vector<8x16xf32> to vector<8x16xbf16>
    %cst_122 = arith.constant dense<0.000000e+00> : vector<8x16xf32>
    %317 = tpu.matmul %314, %316, %cst_122 {dimension_numbers = #tpu.dot_dimension_numbers<[1], [0], [0], [1], [0, 0, 1, 1], [], []>} : vector<8x8xbf16>, vector<8x16xbf16>, vector<8x16xf32> -> vector<8x16xf32>
    %318 = arith.truncf %317 : vector<8x16xf32> to vector<8x16xbf16>
    %319 = vector.extract_strided_slice %295 {offsets = [0, 0], sizes = [16, 32], strides = [1, 1]} : vector<32x32xbf16> to vector<16x32xbf16>
    %cst_123 = arith.constant dense<0.000000e+00> : vector<8x32xf32>
    %320 = tpu.matmul %318, %319, %cst_123 {dimension_numbers = #tpu.dot_dimension_numbers<[1], [0], [0], [1], [0, 0, 1, 1], [], []>} : vector<8x16xbf16>, vector<16x32xbf16>, vector<8x32xf32> -> vector<8x32xf32>
    %321 = arith.addf %296, %320 : vector<8x32xf32>
    %322 = vector.extract_strided_slice %291 {offsets = [0, 16], sizes = [8, 16], strides = [1, 1]} : vector<8x32xf32> to vector<8x16xf32>
    %323 = arith.truncf %322 : vector<8x16xf32> to vector<8x16xbf16>
    %324 = vector.extract_strided_slice %292 {offsets = [0, 16], sizes = [8, 16], strides = [1, 1]} : vector<8x32xf32> to vector<8x16xf32>
    %325 = arith.truncf %324 : vector<8x16xf32> to vector<8x16xbf16>
    %cst_124 = arith.constant dense<0.000000e+00> : vector<8x8xf32>
    %326 = tpu.matmul %323, %325, %cst_124 {dimension_numbers = #tpu.dot_dimension_numbers<[1], [1], [0], [0], [0, 0, 1, 0], [], []>} : vector<8x16xbf16>, vector<8x16xbf16>, vector<8x8xf32> -> vector<8x8xf32>
    %cst_125 = arith.constant -1.000000e+30 : f32
    %327 = vector.broadcast %cst_125 : f32 to vector<8x8xf32>
    %328 = arith.select %290, %326, %327 : vector<8x8xi1>, vector<8x8xf32>
    %cst_126 = arith.constant dense<0xFF800000> : vector<8xf32>
    %329 = vector.multi_reduction <maximumf>, %328, %cst_126 [1] : vector<8x8xf32> to vector<8xf32>
    %330 = vector.shape_cast %329 : vector<8xf32> to vector<8x1xf32>
    %331 = vector.broadcast %330 : vector<8x1xf32> to vector<8x8xf32>
    %332 = arith.subf %328, %331 : vector<8x8xf32>
    %333 = math.exp %332 : vector<8x8xf32>
    %cst_127 = arith.constant dense<0.000000e+00> : vector<8xf32>
    %334 = vector.multi_reduction <add>, %333, %cst_127 [1] : vector<8x8xf32> to vector<8xf32>
    %335 = vector.shape_cast %334 : vector<8xf32> to vector<8x1xf32>
    %336 = tpu.reciprocal %335 {approx = true} : vector<8x1xf32> -> vector<8x1xf32>
    %337 = vector.broadcast %336 : vector<8x1xf32> to vector<8x8xf32>
    %338 = arith.mulf %333, %337 : vector<8x8xf32>
    %339 = arith.truncf %338 : vector<8x8xf32> to vector<8x8xbf16>
    %340 = vector.extract_strided_slice %293 {offsets = [0, 16], sizes = [8, 16], strides = [1, 1]} : vector<8x32xf32> to vector<8x16xf32>
    %341 = arith.truncf %340 : vector<8x16xf32> to vector<8x16xbf16>
    %cst_128 = arith.constant dense<0.000000e+00> : vector<8x16xf32>
    %342 = tpu.matmul %339, %341, %cst_128 {dimension_numbers = #tpu.dot_dimension_numbers<[1], [0], [0], [1], [0, 0, 1, 1], [], []>} : vector<8x8xbf16>, vector<8x16xbf16>, vector<8x16xf32> -> vector<8x16xf32>
    %343 = arith.truncf %342 : vector<8x16xf32> to vector<8x16xbf16>
    %344 = vector.extract_strided_slice %295 {offsets = [16, 0], sizes = [16, 32], strides = [1, 1]} : vector<32x32xbf16> to vector<16x32xbf16>
    %cst_129 = arith.constant dense<0.000000e+00> : vector<8x32xf32>
    %345 = tpu.matmul %343, %344, %cst_129 {dimension_numbers = #tpu.dot_dimension_numbers<[1], [0], [0], [1], [0, 0, 1, 1], [], []>} : vector<8x16xbf16>, vector<16x32xbf16>, vector<8x32xf32> -> vector<8x32xf32>
    %346 = arith.addf %321, %345 : vector<8x32xf32>
    %c1_130 = arith.constant 1 : index
    %c0_131 = arith.constant 0 : index
    %c0_132 = arith.constant 0 : index
    %347 = vector.load %arg4[%c1_130, %c0_131, %c0_132] : memref<2x1x8xi32, #tpu.memory_space<vmem>>, vector<1x1x8xi32>
    %348 = vector.shape_cast %347 : vector<1x1x8xi32> to vector<1x8xi32>
    %c0_i32_133 = arith.constant 0 : i32
    %349 = vector.broadcast %c0_i32_133 : i32 to vector<1x8xi32>
    %350 = arith.cmpi sgt, %348, %349 : vector<1x8xi32>
    %351 = vector.broadcast %350 : vector<1x8xi1> to vector<8x8xi1>
    %352 = arith.andi %284, %351 : vector<8x8xi1>
    %353 = vector.extract_strided_slice %281 {offsets = [8, 0], sizes = [8, 32], strides = [1, 1]} : vector<16x96xf32> to vector<8x32xf32>
    %354 = vector.extract_strided_slice %281 {offsets = [8, 32], sizes = [8, 32], strides = [1, 1]} : vector<16x96xf32> to vector<8x32xf32>
    %355 = vector.extract_strided_slice %281 {offsets = [8, 64], sizes = [8, 32], strides = [1, 1]} : vector<16x96xf32> to vector<8x32xf32>
    %c0_134 = arith.constant 0 : index
    %c0_135 = arith.constant 0 : index
    %c0_136 = arith.constant 0 : index
    %356 = vector.load %arg19[%c0_134, %c0_135, %c0_136] : memref<1x32x32xbf16, #tpu.memory_space<vmem>>, vector<1x32x32xbf16>
    %357 = vector.shape_cast %356 : vector<1x32x32xbf16> to vector<32x32xbf16>
    %cst_137 = arith.constant 0.000000e+00 : f32
    %358 = vector.broadcast %cst_137 : f32 to vector<8x32xf32>
    %359 = vector.extract_strided_slice %353 {offsets = [0, 0], sizes = [8, 16], strides = [1, 1]} : vector<8x32xf32> to vector<8x16xf32>
    %360 = arith.truncf %359 : vector<8x16xf32> to vector<8x16xbf16>
    %361 = vector.extract_strided_slice %354 {offsets = [0, 0], sizes = [8, 16], strides = [1, 1]} : vector<8x32xf32> to vector<8x16xf32>
    %362 = arith.truncf %361 : vector<8x16xf32> to vector<8x16xbf16>
    %cst_138 = arith.constant dense<0.000000e+00> : vector<8x8xf32>
    %363 = tpu.matmul %360, %362, %cst_138 {dimension_numbers = #tpu.dot_dimension_numbers<[1], [1], [0], [0], [0, 0, 1, 0], [], []>} : vector<8x16xbf16>, vector<8x16xbf16>, vector<8x8xf32> -> vector<8x8xf32>
    %cst_139 = arith.constant -1.000000e+30 : f32
    %364 = vector.broadcast %cst_139 : f32 to vector<8x8xf32>
    %365 = arith.select %352, %363, %364 : vector<8x8xi1>, vector<8x8xf32>
    %cst_140 = arith.constant dense<0xFF800000> : vector<8xf32>
    %366 = vector.multi_reduction <maximumf>, %365, %cst_140 [1] : vector<8x8xf32> to vector<8xf32>
    %367 = vector.shape_cast %366 : vector<8xf32> to vector<8x1xf32>
    %368 = vector.broadcast %367 : vector<8x1xf32> to vector<8x8xf32>
    %369 = arith.subf %365, %368 : vector<8x8xf32>
    %370 = math.exp %369 : vector<8x8xf32>
    %cst_141 = arith.constant dense<0.000000e+00> : vector<8xf32>
    %371 = vector.multi_reduction <add>, %370, %cst_141 [1] : vector<8x8xf32> to vector<8xf32>
    %372 = vector.shape_cast %371 : vector<8xf32> to vector<8x1xf32>
    %373 = tpu.reciprocal %372 {approx = true} : vector<8x1xf32> -> vector<8x1xf32>
    %374 = vector.broadcast %373 : vector<8x1xf32> to vector<8x8xf32>
    %375 = arith.mulf %370, %374 : vector<8x8xf32>
    %376 = arith.truncf %375 : vector<8x8xf32> to vector<8x8xbf16>
    %377 = vector.extract_strided_slice %355 {offsets = [0, 0], sizes = [8, 16], strides = [1, 1]} : vector<8x32xf32> to vector<8x16xf32>
    %378 = arith.truncf %377 : vector<8x16xf32> to vector<8x16xbf16>
    %cst_142 = arith.constant dense<0.000000e+00> : vector<8x16xf32>
    %379 = tpu.matmul %376, %378, %cst_142 {dimension_numbers = #tpu.dot_dimension_numbers<[1], [0], [0], [1], [0, 0, 1, 1], [], []>} : vector<8x8xbf16>, vector<8x16xbf16>, vector<8x16xf32> -> vector<8x16xf32>
    %380 = arith.truncf %379 : vector<8x16xf32> to vector<8x16xbf16>
    %381 = vector.extract_strided_slice %357 {offsets = [0, 0], sizes = [16, 32], strides = [1, 1]} : vector<32x32xbf16> to vector<16x32xbf16>
    %cst_143 = arith.constant dense<0.000000e+00> : vector<8x32xf32>
    %382 = tpu.matmul %380, %381, %cst_143 {dimension_numbers = #tpu.dot_dimension_numbers<[1], [0], [0], [1], [0, 0, 1, 1], [], []>} : vector<8x16xbf16>, vector<16x32xbf16>, vector<8x32xf32> -> vector<8x32xf32>
    %383 = arith.addf %358, %382 : vector<8x32xf32>
    %384 = vector.extract_strided_slice %353 {offsets = [0, 16], sizes = [8, 16], strides = [1, 1]} : vector<8x32xf32> to vector<8x16xf32>
    %385 = arith.truncf %384 : vector<8x16xf32> to vector<8x16xbf16>
    %386 = vector.extract_strided_slice %354 {offsets = [0, 16], sizes = [8, 16], strides = [1, 1]} : vector<8x32xf32> to vector<8x16xf32>
    %387 = arith.truncf %386 : vector<8x16xf32> to vector<8x16xbf16>
    %cst_144 = arith.constant dense<0.000000e+00> : vector<8x8xf32>
    %388 = tpu.matmul %385, %387, %cst_144 {dimension_numbers = #tpu.dot_dimension_numbers<[1], [1], [0], [0], [0, 0, 1, 0], [], []>} : vector<8x16xbf16>, vector<8x16xbf16>, vector<8x8xf32> -> vector<8x8xf32>
    %cst_145 = arith.constant -1.000000e+30 : f32
    %389 = vector.broadcast %cst_145 : f32 to vector<8x8xf32>
    %390 = arith.select %352, %388, %389 : vector<8x8xi1>, vector<8x8xf32>
    %cst_146 = arith.constant dense<0xFF800000> : vector<8xf32>
    %391 = vector.multi_reduction <maximumf>, %390, %cst_146 [1] : vector<8x8xf32> to vector<8xf32>
    %392 = vector.shape_cast %391 : vector<8xf32> to vector<8x1xf32>
    %393 = vector.broadcast %392 : vector<8x1xf32> to vector<8x8xf32>
    %394 = arith.subf %390, %393 : vector<8x8xf32>
    %395 = math.exp %394 : vector<8x8xf32>
    %cst_147 = arith.constant dense<0.000000e+00> : vector<8xf32>
    %396 = vector.multi_reduction <add>, %395, %cst_147 [1] : vector<8x8xf32> to vector<8xf32>
    %397 = vector.shape_cast %396 : vector<8xf32> to vector<8x1xf32>
    %398 = tpu.reciprocal %397 {approx = true} : vector<8x1xf32> -> vector<8x1xf32>
    %399 = vector.broadcast %398 : vector<8x1xf32> to vector<8x8xf32>
    %400 = arith.mulf %395, %399 : vector<8x8xf32>
    %401 = arith.truncf %400 : vector<8x8xf32> to vector<8x8xbf16>
    %402 = vector.extract_strided_slice %355 {offsets = [0, 16], sizes = [8, 16], strides = [1, 1]} : vector<8x32xf32> to vector<8x16xf32>
    %403 = arith.truncf %402 : vector<8x16xf32> to vector<8x16xbf16>
    %cst_148 = arith.constant dense<0.000000e+00> : vector<8x16xf32>
    %404 = tpu.matmul %401, %403, %cst_148 {dimension_numbers = #tpu.dot_dimension_numbers<[1], [0], [0], [1], [0, 0, 1, 1], [], []>} : vector<8x8xbf16>, vector<8x16xbf16>, vector<8x16xf32> -> vector<8x16xf32>
    %405 = arith.truncf %404 : vector<8x16xf32> to vector<8x16xbf16>
    %406 = vector.extract_strided_slice %357 {offsets = [16, 0], sizes = [16, 32], strides = [1, 1]} : vector<32x32xbf16> to vector<16x32xbf16>
    %cst_149 = arith.constant dense<0.000000e+00> : vector<8x32xf32>
    %407 = tpu.matmul %405, %406, %cst_149 {dimension_numbers = #tpu.dot_dimension_numbers<[1], [0], [0], [1], [0, 0, 1, 1], [], []>} : vector<8x16xbf16>, vector<16x32xbf16>, vector<8x32xf32> -> vector<8x32xf32>
    %408 = arith.addf %383, %407 : vector<8x32xf32>
    %409 = tpu.concatenate %346, %408 in 0 : vector<8x32xf32>, vector<8x32xf32> -> vector<16x32xf32>
    %410 = arith.addf %247, %409 : vector<16x32xf32>
    %c0_150 = arith.constant 0 : index
    %c0_151 = arith.constant 0 : index
    %c0_152 = arith.constant 0 : index
    %411 = vector.load %arg20[%c0_150, %c0_151, %c0_152] : memref<1x1x32xf32, #tpu.memory_space<vmem>>, vector<1x1x32xf32>
    %412 = vector.shape_cast %411 : vector<1x1x32xf32> to vector<1x32xf32>
    %413 = vector.broadcast %412 : vector<1x32xf32> to vector<16x32xf32>
    %414 = arith.addf %410, %413 : vector<16x32xf32>
    %c0_153 = arith.constant 0 : index
    %c0_154 = arith.constant 0 : index
    %c0_155 = arith.constant 0 : index
    %415 = vector.load %arg21[%c0_153, %c0_154, %c0_155] : memref<1x1x32xf32, #tpu.memory_space<vmem>>, vector<1x1x32xf32>
    %416 = vector.shape_cast %415 : vector<1x1x32xf32> to vector<1x32xf32>
    %c0_156 = arith.constant 0 : index
    %c0_157 = arith.constant 0 : index
    %c0_158 = arith.constant 0 : index
    %417 = vector.load %arg22[%c0_156, %c0_157, %c0_158] : memref<1x1x32xf32, #tpu.memory_space<vmem>>, vector<1x1x32xf32>
    %418 = vector.shape_cast %417 : vector<1x1x32xf32> to vector<1x32xf32>
    %cst_159 = arith.constant dense<0.000000e+00> : vector<16xf32>
    %419 = vector.multi_reduction <add>, %414, %cst_159 [1] : vector<16x32xf32> to vector<16xf32>
    %420 = vector.shape_cast %419 : vector<16xf32> to vector<16x1xf32>
    %cst_160 = arith.constant 3.200000e+01 : f32
    %421 = vector.broadcast %cst_160 : f32 to vector<16x1xf32>
    %422 = arith.divf %420, %421 : vector<16x1xf32>
    %423 = vector.broadcast %422 : vector<16x1xf32> to vector<16x32xf32>
    %424 = arith.subf %414, %423 : vector<16x32xf32>
    %425 = arith.mulf %424, %424 : vector<16x32xf32>
    %cst_161 = arith.constant dense<0.000000e+00> : vector<16xf32>
    %426 = vector.multi_reduction <add>, %425, %cst_161 [1] : vector<16x32xf32> to vector<16xf32>
    %427 = vector.shape_cast %426 : vector<16xf32> to vector<16x1xf32>
    %cst_162 = arith.constant 3.200000e+01 : f32
    %428 = vector.broadcast %cst_162 : f32 to vector<16x1xf32>
    %429 = arith.divf %427, %428 : vector<16x1xf32>
    %430 = vector.broadcast %422 : vector<16x1xf32> to vector<16x32xf32>
    %431 = arith.subf %414, %430 : vector<16x32xf32>
    %cst_163 = arith.constant 9.99999974E-6 : f32
    %432 = vector.broadcast %cst_163 : f32 to vector<16x1xf32>
    %433 = arith.addf %429, %432 : vector<16x1xf32>
    %434 = math.rsqrt %433 : vector<16x1xf32>
    %435 = vector.broadcast %434 : vector<16x1xf32> to vector<16x32xf32>
    %436 = arith.mulf %431, %435 : vector<16x32xf32>
    %437 = vector.broadcast %416 : vector<1x32xf32> to vector<16x32xf32>
    %438 = arith.mulf %436, %437 : vector<16x32xf32>
    %439 = vector.broadcast %418 : vector<1x32xf32> to vector<16x32xf32>
    %440 = arith.addf %438, %439 : vector<16x32xf32>
    %441 = arith.truncf %440 : vector<16x32xf32> to vector<16x32xbf16>
    %c0_164 = arith.constant 0 : index
    %c0_165 = arith.constant 0 : index
    %c0_166 = arith.constant 0 : index
    %442 = vector.load %arg23[%c0_164, %c0_165, %c0_166] : memref<1x32x128xbf16, #tpu.memory_space<vmem>>, vector<1x32x128xbf16>
    %443 = vector.shape_cast %442 : vector<1x32x128xbf16> to vector<32x128xbf16>
    %cst_167 = arith.constant dense<0.000000e+00> : vector<16x128xf32>
    %444 = tpu.matmul %441, %443, %cst_167 {dimension_numbers = #tpu.dot_dimension_numbers<[1], [0], [0], [1], [0, 0, 1, 1], [], []>} : vector<16x32xbf16>, vector<32x128xbf16>, vector<16x128xf32> -> vector<16x128xf32>
    %c0_168 = arith.constant 0 : index
    %c0_169 = arith.constant 0 : index
    %c0_170 = arith.constant 0 : index
    %445 = vector.load %arg24[%c0_168, %c0_169, %c0_170] : memref<1x1x128xf32, #tpu.memory_space<vmem>>, vector<1x1x128xf32>
    %446 = vector.shape_cast %445 : vector<1x1x128xf32> to vector<1x128xf32>
    %447 = vector.broadcast %446 : vector<1x128xf32> to vector<16x128xf32>
    %448 = arith.addf %444, %447 : vector<16x128xf32>
    %cst_171 = arith.constant 5.000000e-01 : f32
    %449 = vector.broadcast %cst_171 : f32 to vector<16x128xf32>
    %450 = arith.mulf %449, %448 : vector<16x128xf32>
    %cst_172 = arith.constant 4.471500e-02 : f32
    %451 = vector.broadcast %cst_172 : f32 to vector<16x128xf32>
    %452 = arith.mulf %451, %448 : vector<16x128xf32>
    %453 = arith.mulf %452, %448 : vector<16x128xf32>
    %454 = arith.mulf %453, %448 : vector<16x128xf32>
    %455 = arith.addf %448, %454 : vector<16x128xf32>
    %cst_173 = arith.constant 0.797884583 : f32
    %456 = vector.broadcast %cst_173 : f32 to vector<16x128xf32>
    %457 = arith.mulf %456, %455 : vector<16x128xf32>
    %458 = math.tanh %457 : vector<16x128xf32>
    %cst_174 = arith.constant 1.000000e+00 : f32
    %459 = vector.broadcast %cst_174 : f32 to vector<16x128xf32>
    %460 = arith.addf %459, %458 : vector<16x128xf32>
    %461 = arith.mulf %450, %460 : vector<16x128xf32>
    %462 = arith.truncf %461 : vector<16x128xf32> to vector<16x128xbf16>
    %c0_175 = arith.constant 0 : index
    %c0_176 = arith.constant 0 : index
    %c0_177 = arith.constant 0 : index
    %463 = vector.load %arg25[%c0_175, %c0_176, %c0_177] : memref<1x128x32xbf16, #tpu.memory_space<vmem>>, vector<1x128x32xbf16>
    %464 = vector.shape_cast %463 : vector<1x128x32xbf16> to vector<128x32xbf16>
    %cst_178 = arith.constant dense<0.000000e+00> : vector<16x32xf32>
    %465 = tpu.matmul %462, %464, %cst_178 {dimension_numbers = #tpu.dot_dimension_numbers<[1], [0], [0], [1], [0, 0, 1, 1], [], []>} : vector<16x128xbf16>, vector<128x32xbf16>, vector<16x32xf32> -> vector<16x32xf32>
    %466 = arith.addf %414, %465 : vector<16x32xf32>
    %c0_179 = arith.constant 0 : index
    %c0_180 = arith.constant 0 : index
    %c0_181 = arith.constant 0 : index
    %467 = vector.load %arg26[%c0_179, %c0_180, %c0_181] : memref<1x1x32xf32, #tpu.memory_space<vmem>>, vector<1x1x32xf32>
    %468 = vector.shape_cast %467 : vector<1x1x32xf32> to vector<1x32xf32>
    %469 = vector.broadcast %468 : vector<1x32xf32> to vector<16x32xf32>
    %470 = arith.addf %466, %469 : vector<16x32xf32>
    %c0_182 = arith.constant 0 : index
    %c0_183 = arith.constant 0 : index
    %471 = vector.load %arg31[%c0_182, %c0_183] : memref<16x32xf32, #tpu.memory_space<vmem>>, vector<16x32xf32>
    tpu.vector_store %arg31[%c0_182, %c0_183], %470 {strides = array<i32>} : memref<16x32xf32, #tpu.memory_space<vmem>>, vector<16x32xf32>,
    %c0_184 = arith.constant 0 : index
    %c0_185 = arith.constant 0 : index
    %472 = vector.load %arg27[%c0_184, %c0_185] : memref<1x32xf32, #tpu.memory_space<vmem>>, vector<1x32xf32>
    %c0_186 = arith.constant 0 : index
    %c0_187 = arith.constant 0 : index
    %473 = vector.load %arg28[%c0_186, %c0_187] : memref<1x32xf32, #tpu.memory_space<vmem>>, vector<1x32xf32>
    %cst_188 = arith.constant dense<0.000000e+00> : vector<16xf32>
    %474 = vector.multi_reduction <add>, %470, %cst_188 [1] : vector<16x32xf32> to vector<16xf32>
    %475 = vector.shape_cast %474 : vector<16xf32> to vector<16x1xf32>
    %cst_189 = arith.constant 3.200000e+01 : f32
    %476 = vector.broadcast %cst_189 : f32 to vector<16x1xf32>
    %477 = arith.divf %475, %476 : vector<16x1xf32>
    %478 = vector.broadcast %477 : vector<16x1xf32> to vector<16x32xf32>
    %479 = arith.subf %470, %478 : vector<16x32xf32>
    %480 = arith.mulf %479, %479 : vector<16x32xf32>
    %cst_190 = arith.constant dense<0.000000e+00> : vector<16xf32>
    %481 = vector.multi_reduction <add>, %480, %cst_190 [1] : vector<16x32xf32> to vector<16xf32>
    %482 = vector.shape_cast %481 : vector<16xf32> to vector<16x1xf32>
    %cst_191 = arith.constant 3.200000e+01 : f32
    %483 = vector.broadcast %cst_191 : f32 to vector<16x1xf32>
    %484 = arith.divf %482, %483 : vector<16x1xf32>
    %485 = vector.broadcast %477 : vector<16x1xf32> to vector<16x32xf32>
    %486 = arith.subf %470, %485 : vector<16x32xf32>
    %cst_192 = arith.constant 9.99999974E-6 : f32
    %487 = vector.broadcast %cst_192 : f32 to vector<16x1xf32>
    %488 = arith.addf %484, %487 : vector<16x1xf32>
    %489 = math.rsqrt %488 : vector<16x1xf32>
    %490 = vector.broadcast %489 : vector<16x1xf32> to vector<16x32xf32>
    %491 = arith.mulf %486, %490 : vector<16x32xf32>
    %492 = vector.broadcast %472 : vector<1x32xf32> to vector<16x32xf32>
    %493 = arith.mulf %491, %492 : vector<16x32xf32>
    %494 = vector.broadcast %473 : vector<1x32xf32> to vector<16x32xf32>
    %495 = arith.addf %493, %494 : vector<16x32xf32>
    %496 = arith.truncf %495 : vector<16x32xf32> to vector<16x32xbf16>
    %c0_193 = arith.constant 0 : index
    %c0_194 = arith.constant 0 : index
    %497 = vector.load %arg29[%c0_193, %c0_194] : memref<32x128xbf16, #tpu.memory_space<vmem>>, vector<32x128xbf16>
    %cst_195 = arith.constant dense<0.000000e+00> : vector<16x128xf32>
    %498 = tpu.matmul %496, %497, %cst_195 {dimension_numbers = #tpu.dot_dimension_numbers<[1], [0], [0], [1], [0, 0, 1, 1], [], []>} : vector<16x32xbf16>, vector<32x128xbf16>, vector<16x128xf32> -> vector<16x128xf32>
    %c0_196 = arith.constant 0 : index
    %c0_197 = arith.constant 0 : index
    %499 = vector.load %arg30[%c0_196, %c0_197] : memref<16x128xf32, #tpu.memory_space<vmem>>, vector<16x128xf32>
    tpu.vector_store %arg30[%c0_196, %c0_197], %498 {strides = array<i32>} : memref<16x128xf32, #tpu.memory_space<vmem>>, vector<16x128xf32>,
    return
  }
  func.func @transform_0(%arg0: i32) -> (i32, i32) {
    %c0_i32 = arith.constant 0 : i32
    %c0_i32_0 = arith.constant 0 : i32
    %c0_i32_1 = arith.constant 0 : i32
    return %c0_i32, %c0_i32_0 : i32, i32
  }
  func.func @transform_1(%arg0: i32) -> (i32, i32) {
    %c0_i32 = arith.constant 0 : i32
    %c0_i32_0 = arith.constant 0 : i32
    %c0_i32_1 = arith.constant 0 : i32
    return %c0_i32, %c0_i32_0 : i32, i32
  }
  func.func @transform_2(%arg0: i32) -> (i32, i32, i32) {
    %c0_i32 = arith.constant 0 : i32
    %c0_i32_0 = arith.constant 0 : i32
    %c0_i32_1 = arith.constant 0 : i32
    %c0_i32_2 = arith.constant 0 : i32
    return %c0_i32, %c0_i32_0, %c0_i32_1 : i32, i32, i32
  }
  func.func @transform_3(%arg0: i32) -> (i32, i32, i32) {
    %c0_i32 = arith.constant 0 : i32
    %c0_i32_0 = arith.constant 0 : i32
    %c0_i32_1 = arith.constant 0 : i32
    %c0_i32_2 = arith.constant 0 : i32
    return %c0_i32, %c0_i32_0, %c0_i32_1 : i32, i32, i32
  }
  func.func @transform_4(%arg0: i32) -> (i32, i32) {
    %c0_i32 = arith.constant 0 : i32
    %c0_i32_0 = arith.constant 0 : i32
    %c0_i32_1 = arith.constant 0 : i32
    return %c0_i32, %c0_i32_0 : i32, i32
  }
  func.func @transform_5(%arg0: i32) -> (i32, i32, i32) {
    %c0_i32 = arith.constant 0 : i32
    %c0_i32_0 = arith.constant 0 : i32
    %c0_i32_1 = arith.constant 0 : i32
    return %arg0, %c0_i32, %c0_i32_0 : i32, i32, i32
  }
  func.func @transform_6(%arg0: i32) -> (i32, i32, i32) {
    %c0_i32 = arith.constant 0 : i32
    %c0_i32_0 = arith.constant 0 : i32
    %c0_i32_1 = arith.constant 0 : i32
    return %arg0, %c0_i32, %c0_i32_0 : i32, i32, i32
  }
  func.func @transform_7(%arg0: i32) -> (i32, i32, i32) {
    %c0_i32 = arith.constant 0 : i32
    %c0_i32_0 = arith.constant 0 : i32
    %c0_i32_1 = arith.constant 0 : i32
    return %arg0, %c0_i32, %c0_i32_0 : i32, i32, i32
  }
  func.func @transform_8(%arg0: i32) -> (i32, i32, i32) {
    %c0_i32 = arith.constant 0 : i32
    %c0_i32_0 = arith.constant 0 : i32
    %c0_i32_1 = arith.constant 0 : i32
    return %arg0, %c0_i32, %c0_i32_0 : i32, i32, i32
  }
  func.func @transform_9(%arg0: i32) -> (i32, i32, i32) {
    %c0_i32 = arith.constant 0 : i32
    %c0_i32_0 = arith.constant 0 : i32
    %c0_i32_1 = arith.constant 0 : i32
    return %arg0, %c0_i32, %c0_i32_0 : i32, i32, i32
  }
  func.func @transform_10(%arg0: i32) -> (i32, i32, i32) {
    %c0_i32 = arith.constant 0 : i32
    %c0_i32_0 = arith.constant 0 : i32
    %c0_i32_1 = arith.constant 0 : i32
    return %arg0, %c0_i32, %c0_i32_0 : i32, i32, i32
  }
  func.func @transform_11(%arg0: i32) -> (i32, i32, i32) {
    %c0_i32 = arith.constant 0 : i32
    %c0_i32_0 = arith.constant 0 : i32
    %c0_i32_1 = arith.constant 0 : i32
    return %arg0, %c0_i32, %c0_i32_0 : i32, i32, i32
  }
  func.func @transform_12(%arg0: i32) -> (i32, i32, i32) {
    %c0_i32 = arith.constant 0 : i32
    %c0_i32_0 = arith.constant 0 : i32
    %c0_i32_1 = arith.constant 0 : i32
    return %arg0, %c0_i32, %c0_i32_0 : i32, i32, i32
  }
  func.func @transform_13(%arg0: i32) -> (i32, i32, i32) {
    %c0_i32 = arith.constant 0 : i32
    %c0_i32_0 = arith.constant 0 : i32
    %c0_i32_1 = arith.constant 0 : i32
    return %arg0, %c0_i32, %c0_i32_0 : i32, i32, i32
  }
  func.func @transform_14(%arg0: i32) -> (i32, i32, i32) {
    %c0_i32 = arith.constant 0 : i32
    %c0_i32_0 = arith.constant 0 : i32
    %c0_i32_1 = arith.constant 0 : i32
    return %arg0, %c0_i32, %c0_i32_0 : i32, i32, i32
  }
  func.func @transform_15(%arg0: i32) -> (i32, i32, i32) {
    %c0_i32 = arith.constant 0 : i32
    %c0_i32_0 = arith.constant 0 : i32
    %c0_i32_1 = arith.constant 0 : i32
    return %arg0, %c0_i32, %c0_i32_0 : i32, i32, i32
  }
  func.func @transform_16(%arg0: i32) -> (i32, i32, i32) {
    %c0_i32 = arith.constant 0 : i32
    %c0_i32_0 = arith.constant 0 : i32
    %c0_i32_1 = arith.constant 0 : i32
    return %arg0, %c0_i32, %c0_i32_0 : i32, i32, i32
  }
  func.func @transform_17(%arg0: i32) -> (i32, i32, i32) {
    %c0_i32 = arith.constant 0 : i32
    %c0_i32_0 = arith.constant 0 : i32
    %c0_i32_1 = arith.constant 0 : i32
    return %arg0, %c0_i32, %c0_i32_0 : i32, i32, i32
  }
  func.func @transform_18(%arg0: i32) -> (i32, i32, i32) {
    %c0_i32 = arith.constant 0 : i32
    %c0_i32_0 = arith.constant 0 : i32
    %c0_i32_1 = arith.constant 0 : i32
    return %arg0, %c0_i32, %c0_i32_0 : i32, i32, i32
  }
  func.func @transform_19(%arg0: i32) -> (i32, i32, i32) {
    %c0_i32 = arith.constant 0 : i32
    %c0_i32_0 = arith.constant 0 : i32
    %c0_i32_1 = arith.constant 0 : i32
    return %arg0, %c0_i32, %c0_i32_0 : i32, i32, i32
  }
  func.func @transform_20(%arg0: i32) -> (i32, i32, i32) {
    %c0_i32 = arith.constant 0 : i32
    %c0_i32_0 = arith.constant 0 : i32
    %c0_i32_1 = arith.constant 0 : i32
    return %arg0, %c0_i32, %c0_i32_0 : i32, i32, i32
  }
  func.func @transform_21(%arg0: i32) -> (i32, i32, i32) {
    %c0_i32 = arith.constant 0 : i32
    %c0_i32_0 = arith.constant 0 : i32
    %c0_i32_1 = arith.constant 0 : i32
    return %arg0, %c0_i32, %c0_i32_0 : i32, i32, i32
  }
  func.func @transform_22(%arg0: i32) -> (i32, i32, i32) {
    %c0_i32 = arith.constant 0 : i32
    %c0_i32_0 = arith.constant 0 : i32
    %c0_i32_1 = arith.constant 0 : i32
    return %arg0, %c0_i32, %c0_i32_0 : i32, i32, i32
  }
  func.func @transform_23(%arg0: i32) -> (i32, i32, i32) {
    %c0_i32 = arith.constant 0 : i32
    %c0_i32_0 = arith.constant 0 : i32
    %c0_i32_1 = arith.constant 0 : i32
    return %arg0, %c0_i32, %c0_i32_0 : i32, i32, i32
  }
  func.func @transform_24(%arg0: i32) -> (i32, i32, i32) {
    %c0_i32 = arith.constant 0 : i32
    %c0_i32_0 = arith.constant 0 : i32
    %c0_i32_1 = arith.constant 0 : i32
    return %arg0, %c0_i32, %c0_i32_0 : i32, i32, i32
  }
  func.func @transform_25(%arg0: i32) -> (i32, i32, i32) {
    %c0_i32 = arith.constant 0 : i32
    %c0_i32_0 = arith.constant 0 : i32
    %c0_i32_1 = arith.constant 0 : i32
    return %arg0, %c0_i32, %c0_i32_0 : i32, i32, i32
  }
  func.func @transform_26(%arg0: i32) -> (i32, i32) {
    %c0_i32 = arith.constant 0 : i32
    %c0_i32_0 = arith.constant 0 : i32
    %c0_i32_1 = arith.constant 0 : i32
    return %c0_i32, %c0_i32_0 : i32, i32
  }
  func.func @transform_27(%arg0: i32) -> (i32, i32) {
    %c0_i32 = arith.constant 0 : i32
    %c0_i32_0 = arith.constant 0 : i32
    %c0_i32_1 = arith.constant 0 : i32
    return %c0_i32, %c0_i32_0 : i32, i32
  }
  func.func @transform_28(%arg0: i32) -> (i32, i32) {
    %c0_i32 = arith.constant 0 : i32
    %c0_i32_0 = arith.constant 0 : i32
    %c0_i32_1 = arith.constant 0 : i32
    return %c0_i32, %c0_i32_0 : i32, i32
  }
  func.func @transform_29(%arg0: i32) -> (i32, i32) {
    %c0_i32 = arith.constant 0 : i32
    %c0_i32_0 = arith.constant 0 : i32
    %c0_i32_1 = arith.constant 0 : i32
    return %c0_i32, %c0_i32_0 : i32, i32
  }
}

</mosaic_0001>

<bundles_post_ra>
// kernel: flamingo_forward.2
= control target key start
LH: loop header
LB: loop body
LE: loop exit
PB: predicated region body
PF: predicated region fallthrough
CT: control target
= control target key end

     0   :  { %s3124_s24 = smov 0   ;;  %s3550_s0 = inlined_call_operand.vmem [shape: f32[8,256], index: 0, kind: input, shape index: {}]   ;;  %s3551_s1 = inlined_call_operand.vmem [shape: bf16[256,32], index: 1, kind: input, shape index: {}]   ;;  %s3552_s2 = inlined_call_operand.vmem [shape: f32[1,32], index: 2, kind: input, shape index: {}]   ;;  %s3553_s3 = inlined_call_operand.vmem [shape: f32[8,32], index: 3, kind: input, shape index: {}]   ;;  %s3554_s4 = inlined_call_operand.vmem [shape: f32[2,1,32], index: 4, kind: input, shape index: {}]   ;;  %s3555_s5 = inlined_call_operand.vmem [shape: f32[2,1,32], index: 5, kind: input, shape index: {}]   ;;  %s3556_s6 = inlined_call_operand.vmem [shape: f32[2,1,32], index: 6, kind: input, shape index: {}]   ;;  %s3557_s7 = inlined_call_operand.vmem [shape: f32[2,1,32], index: 7, kind: input, shape index: {}]   ;;  %s3558_s8 = inlined_call_operand.vmem [shape: bf16[2,32,32], index: 8, kind: input, shape index: {}]   ;;  %s3559_s9 = inlined_call_operand.vmem [shape: bf16[2,32,64], index: 9, kind: input, shape index: {}]   ;;  %s3560_s10 = inlined_call_operand.vmem [shape: bf16[2,32,32], index: 10, kind: input, shape index: {}]   ;;  %s3561_s11 = inlined_call_operand.vmem [shape: f32[2,1,32], index: 11, kind: input, shape index: {}]   ;;  %s3562_s12 = inlined_call_operand.vmem [shape: f32[2,1,32], index: 12, kind: input, shape index: {}]   ;;  %s3563_s13 = inlined_call_operand.vmem [shape: bf16[2,32,128], index: 13, kind: input, shape index: {}]   ;;  %s3564_s14 = inlined_call_operand.vmem [shape: bf16[2,128,32], index: 14, kind: input, shape index: {}]   ;;  %s3565_s15 = inlined_call_operand.vmem [shape: f32[1,32], index: 15, kind: input, shape index: {}]   ;;  %s3566_s16 = inlined_call_operand.vmem [shape: f32[1,32], index: 16, kind: input, shape index: {}]   ;;  %s3567_s17 = inlined_call_operand.vmem [shape: f32[16,32], index: 17, kind: output, shape index: {}]  }
   0x1   :  { %3572 = sst [smem:[#allocation4_spill]] %s3550_s0 }
   0x2   :  { %3573 = sst [smem:[#allocation5_spill]] %s3551_s1 }
   0x3   :  { %3574 = sst [smem:[#allocation6_spill]] %s3558_s8 }
   0x4   :  { %3575 = sst [smem:[#allocation7_spill]] %s3565_s15 }
   0x5   :  { %3576 = sst [smem:[#allocation8_spill]] %s3566_s16 }
   0x6   :  { %3577 = sst [smem:[#allocation9_spill]] %s3567_s17 }
   0x7 LB: > { %3578 = sst [smem:[#allocation3_spill]] %s3027_s24  ;;  %s2592_s25 = sadd.s32 4294967295, %s3027_s24   ;;  %s3027_s24 = sphi %s3124_s24, %s27_s24  }
   0x8   : > { %p2595_p0 = scmp.ge.s32.totalorder %s3027_s24, 1  ;;  %p570_p1 = scmp.lt.s32.totalorder %s3027_s24, 3 }
   0xa   : > { %p571_p2 = pnand %p2595_p0, %p570_p1 }
   0xb   : > { %p655_p3 = scmp.lt.s32.totalorder (!%p571_p2), %s2592_s25, 1  ;;  %s3579_s8 = sld [smem:[#allocation6_spill]] (!%p571_p2) }
   0xc   : > { %574 = sbr.rel (%p571_p2) target bundleno = 3879 (0xf27), region = 88  ;;  %p2606_p4 = scmp.ne.s32.totalorder (!%p571_p2), %s2592_s25, 0 }
  0x11   : > { %s3132_s26 = scalar_select %p655_p3, %s2592_s25, 1 }
  0x13   : > { %s2674_s27 = sshll.u32 %s3132_s26, 4  ;;  %s687_s24 = scalar_lea.vmem %s3562_s12, %s3132_s26 }
  0x14   : > { %s3158_s29 = scalar_lea.vmem %s3579_s8, %s2674_s27  ;;  %s3163_s18 = scalar_lea.vmem %s3559_s9, %s2674_s27 }
  0x15   : > { %s3168_s21 = scalar_lea.vmem %s3560_s10, %s2674_s27  ;;  %s3177_s15 = scalar_lea.vmem %s3563_s13, %s2674_s27 }
  0x16   : > { %s2678_s16 = sshll.u32 %s3132_s26, 6  ;;  %702 = sbr.rel (%p2606_p4) target bundleno = 29 (0x1d), region = 92 }
  0x17   : > { %s3183_s0 = scalar_lea.vmem %s3564_s14, %s2678_s16 }
  0x1b   : > { %v703_v0 = vld [vmem:[%s3553_s3] sm:$0xff]  ;;  %vm704_vm0 = vcmask 261120  }
  0x1c   : > { %705 = vst.msk [vmem:[#allocation2] sm:$0xff] %vm704_vm0, %v703_v0  ;;  %706 = vst.msk [vmem:[#allocation2 + $0x8] sm:$0xff] %vm704_vm0, %v703_v0 }
  0x1d PF: > { %s3580_s27 = sld [smem:[#allocation5_spill]]  ;;  %vm890_vm1 = vcmask 261120   ;;  %v2607_v35 = vld [vmem:[%s3552_s2] ss:$0 sm:$0xff]  ;;  %v2963_v43 = vld [vmem:[%s3158_s29 + $0x8] sm:$0xff]   ;;  %v3029_v44 = vmov 0.0   ;;  %s3582_s16 = scalar_lea.vmem %s3556_s6, %s3132_s26 }
  0x1e   : > { %s3581_s1 = sld [smem:[#allocation4_spill]]  ;;  %2762 = vmatprep.subr.bf16.mxu1 %v3029_v44  ;;  %vm3030_vm2 = vmmov 0   ;;  %v2964_v45 = vld [vmem:[%s3158_s29] sm:$0xff]   ;;  %s3583_s23 = scalar_lea.vmem %s3557_s7, %s3132_s26  ;;  %vm1131_vm3 = vcmask 130048   ;;  %vm1222_vm4 = vcmask 31744   ;;  %vm1226_vm5 = vcmask 64512  }
  0x1f   : > { %2766 = vmatprep.mubr.msk.bf16.mxu1 %vm3030_vm2, %v3029_v44  ;;  %2763 = vmatpush3.bf16.msra.mxu1 %v2963_v43  ;;  %v2626_v59 = vld [vmem:[%s3582_s16] ss:$0 sm:$0xff]  ;;  %s3584_s8 = scalar_lea.vmem %s3554_s4, %s3132_s26  ;;  %s3031_s29 = smov 96   ;;  %vm1253_vm6 = vcmask 1043456   ;;  %vm1303_vm7 = vcmask 1041408  }
  0x20   : > { %2764 = vmatprep.subr.bf16.mxu1 %v3029_v44  ;;  %v2627_v63 = vld [vmem:[%s3583_s23] ss:$0 sm:$0xff]  ;;  %s3032_s28 = smov 112   ;;  %s3033_s16 = smov 80  }
  0x23   : > { %v2947_v1 = vld [vmem:[%s3580_s27 + $0x78] sm:$0xff]   ;;  %v2949_v3 = vld [vmem:[%s3580_s27 + $0x70] sm:$0xff]   ;;  %v2951_v5 = vld [vmem:[%s3580_s27 + $0x68] sm:$0xff]   ;;  %2765 = vmatpush3.bf16.msra.mxu1 %v2964_v45 }
  0x24   : > { %v2948_v2 = vld [vmem:[%s3580_s27 + $0x38] sm:$0xff]   ;;  %2679 = vmatprep.subr.bf16.mxu0 %v2947_v1  ;;  %v2950_v4 = vld [vmem:[%s3580_s27 + $0x30] sm:$0xff]   ;;  %v2952_v6 = vld [vmem:[%s3580_s27 + $0x28] sm:$0xff]   ;;  %2770 = vmatprep.subr.bf16.mxu1 %v3029_v44 }
  0x25   : > { %2680 = vmatpush3.bf16.msra.mxu0 %v2948_v2  ;;  %v2953_v7 = vld [vmem:[%s3580_s27 + $0x60] sm:$0xff]   ;;  %v2955_v9 = vld [vmem:[%s3580_s27 + $0x58] sm:$0xff]   ;;  %v2957_v11 = vld [vmem:[%s3580_s27 + $0x50] sm:$0xff]  }
  0x26   : > { %2681 = vmatprep.subr.bf16.mxu0 %v2949_v3  ;;  %v2954_v8 = vld [vmem:[%s3580_s27 + $0x20] sm:$0xff]   ;;  %v2956_v10 = vld [vmem:[%s3580_s27 + $0x18] sm:$0xff]   ;;  %v708_v12 = vld [vmem:[%s3581_s1 + $0x8] sm:$0xff] }
  0x27   : > { %v3224_v13 = vld [vmem:[#allocation2] sm:$0xff]  ;;  %v2958_v14 = vld [vmem:[%s3580_s27 + $0x10] sm:$0xff]   ;;  %v710_v15 = vpack.c.bf16 %v708_v12, %v708_v12  ;;  %v3231_v17 = vld [vmem:[#allocation2 + $0x8] sm:$0xff] }
  0x28   : > { %v921_v16 = vsel %vm890_vm1, %v3224_v13, 0.0  ;;  %v2959_v18 = vld [vmem:[%s3580_s27 + $0x48] sm:$0xff]   ;;  %v924_v19 = vsel %vm890_vm1, %v3231_v17, 0.0  ;;  %v2961_v21 = vld [vmem:[%s3580_s27 + $0x40] sm:$0xff]  }
  0x29   : > { %2682 = vmatpush3.bf16.msra.mxu0 %v2950_v4  ;;  %922 = vadd.xlane.f32.xlu0 %v921_v16  ;;  %v2960_v20 = vld [vmem:[%s3580_s27 + $0x8] sm:$0xff]   ;;  %v2962_v22 = vld [vmem:[%s3580_s27] sm:$0xff]  }
  0x2a   : > { %2683 = vmatprep.subr.bf16.mxu0 %v2951_v5  ;;  %878 = vmatprep.mubr.bf16.mxu0 %v710_v15  ;;  %v707_v23 = vld [vmem:[%s3581_s1] sm:$0xff]  ;;  %v2965_v4 = vld [vmem:[%s3163_s18 + $0x8] sm:$0xff]  }
  0x2b   : > { %v709_v24 = vpack.c.bf16 %v707_v23, %v707_v23  ;;  %v2966_v5 = vld [vmem:[%s3163_s18] sm:$0xff]   ;;  %s3585_s18 = scalar_lea.vmem %s3555_s5, %s3132_s26 }
  0x2c   : > { %v2625_v12 = vld [vmem:[%s3585_s18] ss:$0 sm:$0xff]  ;;  %s3589_s18 = sld [smem:[#allocation9_spill]] }
  0x2d   : > { %2684 = vmatpush3.bf16.msra.mxu0 %v2952_v6  ;;  %925 = vadd.xlane.f32.xlu0 %v924_v19 }
  0x2e   : > { %2685 = vmatprep.subr.bf16.mxu0 %v2953_v7 }
  0x31   : > { %2686 = vmatpush3.bf16.msra.mxu0 %v2954_v8 }
  0x32   : > { %2687 = vmatprep.subr.bf16.mxu0 %v2955_v9 }
  0x35   : > { %2688 = vmatpush3.bf16.msra.mxu0 %v2956_v10  ;;  %v2624_v10 = vld [vmem:[%s3584_s8] ss:$0 sm:$0xff]  ;;  %s3588_s8 = sld [smem:[#allocation8_spill]] }
  0x36   : > { %2689 = vmatprep.subr.bf16.mxu0 %v2957_v11 }
  0x39   : > { %2690 = vmatpush3.bf16.msra.mxu0 %v2958_v14 }
  0x3a   : > { %2691 = vmatprep.subr.bf16.mxu0 %v2959_v18 }
  0x3d   : > { %2692 = vmatpush3.bf16.msra.mxu0 %v2960_v20 }
  0x3e   : > { %2693 = vmatprep.subr.bf16.mxu0 %v2961_v21 }
  0x41   : > { %2694 = vmatpush3.bf16.msra.mxu0 %v2962_v22 }
  0x42   : > { %2816 = vmatprep.subr.bf16.mxu0 %v3029_v44 }
  0x44   : > { %879 = vmatmul.mubr.bf16.vlgmr.msra.gmra.mxu0 %v709_v24 }
  0x45   : > { %2818 = vmatprep.mubr.msk.bf16.mxu0 %vm3030_vm2, %v3029_v44 }
  0xb2   : > { %v923_v25 = vpop.xlane.xlu0 %922 }
  0xb3   : > { %v927_v31 = vmul.f32 0.03125, %v923_v25 }
  0xb5   : > { %v929_v33 = vsub.f32 %v3224_v13, %v927_v31 }
  0xb6   : > { %v926_v26 = vpop.xlane.xlu0 %925 }
  0xb7   : > { %v928_v27 = vmul.f32 0.03125, %v926_v26  ;;  %v931_v39 = vmul.f32 %v929_v33, %v929_v33 }
  0xb9   : > { %v930_v28 = vsub.f32 %v3231_v17, %v928_v27  ;;  %v933_v42 = vsel %vm890_vm1, %v931_v39, 0.0 }
  0xbb   : > { %v932_v29 = vmul.f32 %v930_v28, %v930_v28 }
  0xbd   : > { %v936_v30 = vsel %vm890_vm1, %v932_v29, 0.0 }
  0xbe   : > { %937 = vadd.xlane.f32.xlu0 %v936_v30 }
 0x104   : > { %v2695_v32 = vpop.f32.mrf.mxu0 }
 0x106   : > { %v2696_v34 = vpop.f32.mrf.mxu0 }
 0x107   : > { %v2697_v36 = vadd.f32 %v2696_v34, %v2695_v32 }
 0x108   : > { %v2698_v37 = vpop.f32.mrf.mxu0 }
 0x109   : > { %v881_v38 = vadd.f32 %v2697_v36, %v2607_v35 }
 0x10a   : > { %v2699_v40 = vpop.f32.mrf.mxu0 }
 0x10b   : > { %v891_v41 = vsel %vm890_vm1, %v881_v38, 0.0 }
 0x10c   : > { %892 = vadd.xlane.f32.xlu1 %v891_v41 }
 0x110   : > { %934 = vadd.xlane.f32.xlu1 %v933_v42 }
 0x147   : > { %v938_v46 = vpop.xlane.xlu0 %937 }
 0x148   : > { %v940_v47 = vmul.f32 0.03125, %v938_v46 }
 0x14a   : > { %v942_v48 = vadd.f32 1e-05, %v940_v47 }
 0x14c   : > { %2979 = vrsqrt.f32 %v942_v48 }
 0x159   : > { %v2980_v57 = vpop.eup %2979 }
 0x15a   : > { %v946_v58 = vmul.f32 %v2980_v57, %v930_v28 }
 0x15c   : > { %v954_v62 = vmul.f32 %v2626_v59, %v946_v58 }
 0x15e   : > { %v962_v2 = vadd.f32 %v2627_v63, %v954_v62 }
 0x195   : > { %v893_v49 = vpop.xlane.xlu1 %892 }
 0x196   : > { %v895_v50 = vmul.f32 0.03125, %v893_v49 }
 0x198   : > { %v896_v51 = vsub.f32 %v881_v38, %v895_v50 }
 0x199   : > { %v935_v52 = vpop.xlane.xlu1 %934 }
 0x19a   : > { %v939_v53 = vmul.f32 0.03125, %v935_v52  ;;  %v897_v54 = vmul.f32 %v896_v51, %v896_v51 }
 0x19c   : > { %v941_v55 = vadd.f32 1e-05, %v939_v53  ;;  %v898_v56 = vsel %vm890_vm1, %v897_v54, 0.0 }
 0x19d   : > { %899 = vadd.xlane.f32.xlu1 %v898_v56 }
 0x19e   : > { %2981 = vrsqrt.f32 %v941_v55 }
 0x1ab   : > { %v2982_v60 = vpop.eup %2981 }
 0x1ac   : > { %v945_v61 = vmul.f32 %v2982_v60, %v929_v33 }
 0x1ae   : > { %v953_v0 = vmul.f32 %v2626_v59, %v945_v61 }
 0x1b0   : > { %v961_v1 = vadd.f32 %v2627_v63, %v953_v0 }
 0x1b2   : > { %v963_v3 = vpack.c.bf16 %v962_v2, %v961_v1 }
 0x1b4   : > { %2767 = vmatmul.mubr.msk.bf16.vlgmr.msra.gmra.mxu1 %vm890_vm1, %v963_v3 }
 0x1b5   : > { %2774 = vmatprep.mubr.msk.bf16.mxu1 %vm3030_vm2, %v3029_v44  ;;  %2771 = vmatpush3.bf16.msra.mxu1 %v2965_v4 }
 0x1b6   : > { %2772 = vmatprep.subr.bf16.mxu1 %v3029_v44 }
 0x1b9   : > { %2773 = vmatpush3.bf16.msra.mxu1 %v2966_v5 }
 0x1ba   : > { %2778 = vmatprep.subr.bf16.mxu1 %v3029_v44 }
 0x226   : > { %v900_v6 = vpop.xlane.xlu1 %899 }
 0x227   : > { %v901_v7 = vmul.f32 0.03125, %v900_v6 }
 0x229   : > { %v902_v8 = vadd.f32 1e-05, %v901_v7 }
 0x22b   : > { %2983 = vrsqrt.f32 %v902_v8 }
 0x238   : > { %v2984_v9 = vpop.eup %2983 }
 0x239   : > { %v904_v11 = vmul.f32 %v2984_v9, %v896_v51 }
 0x23b   : > { %v911_v14 = vmul.f32 %v2624_v10, %v904_v11 }
 0x23d   : > { %v918_v15 = vadd.f32 %v2625_v12, %v911_v14 }
 0x23f   : > { %v1024_v16 = vpack.c.bf16 %v918_v15, %v918_v15 }
 0x241   : > { %2775 = vmatmul.mubr.msk.bf16.vlgmr.msra.gmra.mxu1 %vm890_vm1, %v1024_v16 }
 0x242   : > { %2779 = vmatpush3.bf16.msra.mxu1 %v2965_v4  ;;  %2782 = vmatprep.mubr.msk.bf16.mxu1 %vm3030_vm2, %v3029_v44 }
 0x243   : > { %2780 = vmatprep.subr.bf16.mxu1 %v3029_v44 }
 0x246   : > { %2781 = vmatpush3.bf16.msra.mxu1 %v2966_v5 }
 0x247   : > { %2786 = vmatprep.subr.bf16.mxu1 %v3029_v44 }
 0x249   : > { %2783 = vmatmul.mubr.msk.bf16.vlgmr.msra.gmra.mxu1 %vm890_vm1, %v963_v3 }
 0x24a   : > { %2788 = vmatprep.mubr.msk.bf16.mxu1 %vm3030_vm2, %v3029_v44 }
 0x274   : > { %v1017_v18 = vpop.f32.mrf.mxu1 }
 0x275   : > { %v1129_v29 = vpack.c.bf16 %v1017_v18, %v1017_v18 }
 0x276   : > { %v2768_v19 = vpop.f32.mrf.mxu1 }
 0x278   : > { %v3304_v20 = vpop.f32.mrf.mxu1 }
 0x27a   : > { %v2769_v21 = vpop.f32.mrf.mxu1 }
 0x301   : > { %v1078_v22 = vpop.f32.mrf.mxu1 }
 0x302   : > { %v3306_v23 = vpack.c.bf16 %v1078_v22, %v1078_v22 }
 0x303   : > { %v2776_v24 = vpop.f32.mrf.mxu1 }
 0x304   : > { %v1136_v25 = vsel %vm1131_vm3, %v3306_v23, 0 }
 0x305   : > { %v1081_v26 = vpop.f32.mrf.mxu1  ;;  %2787 = vmatpush3.bf16.xpose.msra.mxu1 %v1136_v25 }
 0x306   : > { %2792 = vmatprep.subr.bf16.mxu1 %v3029_v44 }
 0x307   : > { %v2777_v27 = vpop.f32.mrf.mxu1 }
 0x309   : > { %v1118_v28 = vpop.f32.mrf.mxu1 }
 0x30a   : > { %v3311_v30 = vpack.c.bf16 %v1118_v28, %v1118_v28  ;;  %v3370_v28 = vrot.slane %v3306_v23, 2 }
 0x30b   : > { %v2784_v31 = vpop.f32.mrf.mxu1 }
 0x30c   : > { %2789 = vmatmul.mubr.msk.bf16.vlgmr.msra.gmra.mxu1 %vm1131_vm3, %v1129_v29  ;;  %v1180_v32 = vsel %vm1131_vm3, %v3311_v30, 0 }
 0x30d   : > { %v3316_v33 = vpop.f32.mrf.mxu1  ;;  %2793 = vmatpush3.bf16.xpose.msra.mxu1 %v1180_v32  ;;  %2794 = vmatprep.mubr.msk.bf16.mxu1 %vm3030_vm2, %v3029_v44 }
 0x30e   : > { %2798 = vmatprep.subr.bf16.mxu1 %v3029_v44  ;;  %v3365_v27 = vpack.c.bf16 %v3316_v33, %v3316_v33 }
 0x30f   : > { %v2785_v34 = vpop.f32.mrf.mxu1 }
 0x314   : > { %2795 = vmatmul.mubr.msk.bf16.vlgmr.msra.gmra.mxu1 %vm1131_vm3, %v1129_v29 }
 0x315   : > { %2800 = vmatprep.mubr.msk.bf16.mxu1 %vm3030_vm2, %v3029_v44 }
 0x3cc   : > { %v1172_v35 = vpop.f32.mrf.mxu1 }
 0x3cd   : > { %v1223_v36 = vsel %vm1222_vm4, %v1172_v35, -inf }
 0x3ce   : > { %1224 = vmax.xlane.f32.xlu0 %v1223_v36  ;;  %v2790_v37 = vpop.f32.mrf.mxu1 }
 0x3d0   : > { %v1175_v38 = vpop.f32.mrf.mxu1 }
 0x3d2   : > { %v2791_v39 = vpop.f32.mrf.mxu1 }
 0x3d4   : > { %v1216_v40 = vpop.f32.mrf.mxu1 }
 0x3d5   : > { %v1227_v41 = vsel %vm1226_vm5, %v1216_v40, -inf }
 0x3d6   : > { %1228 = vmax.xlane.f32.xlu1 %v1227_v41  ;;  %v2796_v42 = vpop.f32.mrf.mxu1 }
 0x3d8   : > { %v1219_v43 = vpop.f32.mrf.mxu1 }
 0x3da   : > { %v2797_v45 = vpop.f32.mrf.mxu1 }
 0x3e4   : > { %1248 = vrot.lane.b32.xlu0 %v3311_v30, %s3031_s29 }
 0x3e7   : > { %1298 = vrot.lane.b32.xlu1 %v3306_v23, %s3031_s29 }
 0x3e8   : > { %1350 = vrot.lane.b32.xlu0 %v1129_v29, %s3032_s28 }
 0x3eb   : > { %1352 = vrot.lane.b32.xlu1 %v3306_v23, %s3032_s28 }
 0x3ef   : > { %1400 = vrot.lane.b32.xlu1 %v3311_v30, %s3032_s28 }
 0x457   : > { %v1225_v46 = vpop.xlane.xlu0 %1224 }
 0x45b   : > { %v1249_v47 = vpop.permute.xlu0 %1248 }
 0x45c   : > { %v1255_v48 = vsel %vm1253_vm6, %v1249_v47, 0 }
 0x45d   : > { %2799 = vmatpush3.bf16.msra.mxu1 %v1255_v48 }
 0x45e   : > { %2804 = vmatprep.subr.bf16.mxu1 %v3029_v44 }
 0x45f   : > { %v1229_v49 = vpop.xlane.xlu1 %1228  ;;  %v1351_v59 = vpop.permute.xlu0 %1350 }
 0x460   : > { %v1230_v50 = vmax.f32 %v1225_v46, %v1229_v49 }
 0x462   : > { %v1234_v51 = vsub.f32 %v1216_v40, %v1230_v50  ;;  %v1231_v54 = vsub.f32 %v1172_v35, %v1230_v50  ;;  %v3379_v40 = vld [vmem:[%s3168_s21] sm:$0xff]  }
 0x463   : > { %v1299_v52 = vpop.permute.xlu1 %1298 }
 0x464   : > { %v1235_v53 = vmul.f32 1.442695, %v1234_v51  ;;  %v1232_v56 = vmul.f32 1.442695, %v1231_v54  ;;  %v1305_v62 = vsel %vm1303_vm7, %v1299_v52, 0  ;;  %v1664_v54 = vpack.c.bf16 %v3304_v20, %v3304_v20 }
 0x466   : > { %2985 = vpow2.f32 %v1235_v53  ;;  %v1714_v53 = vsel %vm1131_vm3, %v3365_v27, 0 }
 0x467   : > { %v1353_v55 = vpop.permute.xlu1 %1352  ;;  %2987 = vpow2.f32 %v1232_v56 }
 0x468   : > { %v1358_v1 = vsel %vm1131_vm3, %v1353_v55, 0  ;;  %v3403_v55 = vld [vmem:[%s3168_s21 + $0x8] sm:$0xff]  }
 0x46b   : > { %v1401_v57 = vpop.permute.xlu1 %1400 }
 0x46c   : > { %v1403_v58 = vsel %vm1131_vm3, %v1401_v57, 0 }
 0x46d   : > { %2817 = vmatpush3.bf16.xpose.msra.mxu0 %v1403_v58 }
 0x46e   : > { %2828 = vmatprep.subr.bf16.mxu0 %v3029_v44 }
 0x473   : > { %v2986_v60 = vpop.eup %2985 }
 0x474   : > { %2819 = vmatmul.mubr.msk.bf16.vlgmr.msra.gmra.mxu0 %vm1131_vm3, %v1351_v59  ;;  %v1246_v61 = vpack.c.bf16 %v2986_v60, %v2986_v60  ;;  %v2988_v63 = vpop.eup %2987  ;;  %v1240_v25 = vsel %vm1226_vm5, %v2986_v60, 0.0 }
 0x475   : > { %2830 = vmatprep.mubr.msk.bf16.mxu0 %vm3030_vm2, %v3029_v44  ;;  %v1245_v0 = vpack.c.bf16 %v2988_v63, %v2988_v63  ;;  %v1237_v26 = vsel %vm1222_vm4, %v2988_v63, 0.0 }
 0x476   : > { %2801 = vmatmul.mubr.msk.bf16.vlgmr.msra.gmra.mxu1 %vm1226_vm5, %v1246_v61 }
 0x477   : > { %2805 = vmatpush3.bf16.msra.mxu1 %v1305_v62  ;;  %2806 = vmatprep.mubr.msk.bf16.mxu1 %vm3030_vm2, %v3029_v44 }
 0x478   : > { %2810 = vmatprep.subr.bf16.mxu1 %v3029_v44 }
 0x47e   : > { %2807 = vmatmul.mubr.msk.bf16.vlgmr.msra.gmra.mxu1 %vm1222_vm4, %v1245_v0 }
 0x47f   : > { %2811 = vmatpush3.bf16.xpose.msra.mxu1 %v1358_v1  ;;  %2812 = vmatprep.mubr.msk.bf16.mxu1 %vm3030_vm2, %v3029_v44 }
 0x480   : > { %2822 = vmatprep.subr.bf16.mxu1 %v3029_v44 }
 0x486   : > { %2813 = vmatmul.mubr.msk.bf16.vlgmr.msra.gmra.mxu1 %vm1131_vm3, %v1351_v59 }
 0x487   : > { %2824 = vmatprep.mubr.msk.bf16.mxu1 %vm3030_vm2, %v3029_v44 }
 0x534   : > { %v1439_v2 = vpop.f32.mrf.mxu0 }
 0x535   : > { %v1448_v3 = vsel %vm1226_vm5, %v1439_v2, -inf }
 0x536   : > { %1449 = vmax.xlane.f32.xlu0 %v1448_v3  ;;  %v2820_v4 = vpop.f32.mrf.mxu0  ;;  %v1291_v5 = vpop.f32.mrf.mxu1 }
 0x538   : > { %v1442_v6 = vpop.f32.mrf.mxu0  ;;  %v2802_v7 = vpop.f32.mrf.mxu1 }
 0x539   : > { %v1670_v6 = vsel %vm1131_vm3, %v3370_v28, 0 }
 0x53a   : > { %v2821_v8 = vpop.f32.mrf.mxu0  ;;  %v1294_v9 = vpop.f32.mrf.mxu1 }
 0x53c   : > { %v2803_v10 = vpop.f32.mrf.mxu1 }
 0x53e   : > { %v1341_v11 = vpop.f32.mrf.mxu1 }
 0x53f   : > { %v1342_v12 = vadd.f32 %v1341_v11, %v1291_v5 }
 0x540   : > { %v2808_v14 = vpop.f32.mrf.mxu1 }
 0x542   : > { %v1344_v15 = vpop.f32.mrf.mxu1 }
 0x544   : > { %v2809_v16 = vpop.f32.mrf.mxu1 }
 0x546   : > { %v1394_v18 = vpop.f32.mrf.mxu1 }
 0x547   : > { %v1445_v19 = vsel %vm1222_vm4, %v1394_v18, -inf }
 0x548   : > { %1446 = vmax.xlane.f32.xlu1 %v1445_v19  ;;  %v2814_v21 = vpop.f32.mrf.mxu1 }
 0x54a   : > { %v1397_v22 = vpop.f32.mrf.mxu1 }
 0x54c   : > { %1468 = vrot.lane.b32.xlu0 %v3311_v30, %s3033_s16  ;;  %v2815_v24 = vpop.f32.mrf.mxu1 }
 0x559   : > { %1516 = vrot.lane.b32.xlu1 %v3306_v23, %s3033_s16 }
 0x56b   : > { %1241 = vadd.xlane.f32.xlu0 %v1240_v25 }
 0x57d   : > { %1238 = vadd.xlane.f32.xlu1 %v1237_v26 }
 0x58e   : > { %1780 = vrot.lane.b32.xlu1 %v3365_v27, %s3031_s29 }
 0x592   : > { %1881 = vrot.lane.b32.xlu1 %v3370_v28, %s3032_s28 }
 0x5bf   : > { %v1450_v29 = vpop.xlane.xlu0 %1449 }
 0x5c3   : > { %v1469_v30 = vpop.permute.xlu0 %1468 }
 0x5c4   : > { %v1474_v31 = vsel %vm1253_vm6, %v1469_v30, 0 }
 0x5c5   : > { %2823 = vmatpush3.bf16.msra.mxu1 %v1474_v31 }
 0x5c6   : > { %2834 = vmatprep.subr.bf16.mxu1 %v3029_v44 }
 0x5d1   : > { %v1447_v32 = vpop.xlane.xlu1 %1446 }
 0x5d2   : > { %v1451_v33 = vmax.f32 %v1447_v32, %v1450_v29 }
 0x5d4   : > { %v1452_v34 = vsub.f32 %v1394_v18, %v1451_v33  ;;  %v1455_v35 = vsub.f32 %v1439_v2, %v1451_v33 }
 0x5d5   : > { %v1517_v36 = vpop.permute.xlu1 %1516 }
 0x5d6   : > { %v1453_v37 = vmul.f32 1.442695, %v1452_v34  ;;  %v1456_v38 = vmul.f32 1.442695, %v1455_v35  ;;  %v1522_v23 = vsel %vm1303_vm7, %v1517_v36, 0 }
 0x5d7   : > { %2829 = vmatpush3.bf16.msra.mxu0 %v1522_v23 }
 0x5d8   : > { %2989 = vpow2.f32 %v1453_v37  ;;  %2840 = vmatprep.subr.bf16.mxu0 %v3029_v44 }
 0x5d9   : > { %2991 = vpow2.f32 %v1456_v38 }
 0x5e5   : > { %v2990_v39 = vpop.eup %2989 }
 0x5e6   : > { %v2992_v41 = vpop.eup %2991  ;;  %v1458_v42 = vsel %vm1222_vm4, %v2990_v39, 0.0  ;;  %v1466_v43 = vpack.c.bf16 %v2990_v39, %v2990_v39 }
 0x5e7   : > { %1459 = vadd.xlane.f32.xlu0 %v1458_v42  ;;  %v1467_v45 = vpack.c.bf16 %v2992_v41, %v2992_v41  ;;  %v1461_v46 = vsel %vm1226_vm5, %v2992_v41, 0.0 }
 0x5e8   : > { %2831 = vmatmul.mubr.msk.bf16.vlgmr.msra.gmra.mxu0 %vm1222_vm4, %v1466_v43 }
 0x5e9   : > { %2825 = vmatmul.mubr.msk.bf16.vlgmr.msra.gmra.mxu1 %vm1226_vm5, %v1467_v45  ;;  %2841 = vmatpush3.bf16.msra.mxu0 %v3379_v40 }
 0x5ea   : > { %2842 = vmatprep.mubr.msk.bf16.mxu0 %vm3030_vm2, %v3029_v44  ;;  %2852 = vmatprep.subr.bf16.mxu0 %v3029_v44 }
 0x5eb   : > { %1462 = vadd.xlane.f32.xlu0 %v1461_v46  ;;  %2836 = vmatprep.mubr.msk.bf16.mxu1 %vm3030_vm2, %v3029_v44 }
 0x5ec   : > { %2835 = vmatpush3.bf16.msra.mxu1 %v3403_v55 }
 0x5ed   : > { %2846 = vmatprep.subr.bf16.mxu1 %v3029_v44 }
 0x5f4   : > { %v1242_v47 = vpop.xlane.xlu0 %1241 }
 0x606   : > { %v1239_v48 = vpop.xlane.xlu1 %1238 }
 0x607   : > { %v1243_v49 = vadd.f32 %v1242_v47, %v1239_v48 }
 0x609   : > { %2993 = vrcp.f32 %v1243_v49 }
 0x60a   : > { %v1781_v7 = vpop.permute.xlu1 %1780 }
 0x60b   : > { %v1786_v8 = vsel %vm1253_vm6, %v1781_v7, 0 }
 0x60e   : > { %v1882_v36 = vpop.permute.xlu1 %1881 }
 0x616   : > { %v2994_v50 = vpop.eup %2993 }
 0x617   : > { %v1347_v51 = vmul.f32 %v2994_v50, %v1342_v12  ;;  %v1887_v50 = vsel %vm1131_vm3, %v1882_v36, 0 }
 0x619   : > { %v1348_v52 = vpack.c.bf16 %v1347_v51, %v1347_v51 }
 0x61b   : > { %2843 = vmatmul.mubr.msk.bf16.vlgmr.msra.gmra.mxu0 %vm1131_vm3, %v1348_v52 }
 0x61c   : > { %2853 = vmatpush3.bf16.xpose.msra.mxu0 %v1714_v53  ;;  %2854 = vmatprep.mubr.msk.bf16.mxu0 %vm3030_vm2, %v3029_v44 }
 0x61d   : > { %2864 = vmatprep.subr.bf16.mxu0 %v3029_v44 }
 0x623   : > { %2855 = vmatmul.mubr.msk.bf16.vlgmr.msra.gmra.mxu0 %vm1131_vm3, %v1664_v54 }
 0x624   : > { %2866 = vmatprep.mubr.msk.bf16.mxu0 %vm3030_vm2, %v3029_v44 }
 0x670   : > { %v1460_v56 = vpop.xlane.xlu0 %1459 }
 0x674   : > { %v1463_v57 = vpop.xlane.xlu0 %1462 }
 0x675   : > { %v1464_v58 = vadd.f32 %v1463_v57, %v1460_v56 }
 0x677   : > { %2995 = vrcp.f32 %v1464_v58 }
 0x684   : > { %v2996_v20 = vpop.eup %2995 }
 0x6a8   : > { %v1558_v59 = vpop.f32.mrf.mxu0 }
 0x6a9   : > { %v1510_v60 = vpop.f32.mrf.mxu1 }
 0x6aa   : > { %v1559_v61 = vadd.f32 %v1558_v59, %v1510_v60  ;;  %v2832_v62 = vpop.f32.mrf.mxu0 }
 0x6ab   : > { %v2826_v63 = vpop.f32.mrf.mxu1 }
 0x6ac   : > { %v1564_v0 = vmul.f32 %v2996_v20, %v1559_v61  ;;  %v1561_v1 = vpop.f32.mrf.mxu0 }
 0x6ad   : > { %v1513_v2 = vpop.f32.mrf.mxu1 }
 0x6ae   : > { %v1565_v3 = vpack.c.bf16 %v1564_v0, %v1564_v0  ;;  %v2833_v4 = vpop.f32.mrf.mxu0 }
 0x6af   : > { %v2827_v5 = vpop.f32.mrf.mxu1 }
 0x6b0   : > { %2837 = vmatmul.mubr.msk.bf16.vlgmr.msra.gmra.mxu1 %vm1131_vm3, %v1565_v3 }
 0x6b1   : > { %2847 = vmatpush3.bf16.xpose.msra.mxu1 %v1670_v6  ;;  %2848 = vmatprep.mubr.msk.bf16.mxu1 %vm3030_vm2, %v3029_v44 }
 0x6b2   : > { %2858 = vmatprep.subr.bf16.mxu1 %v3029_v44 }
 0x6b8   : > { %2849 = vmatmul.mubr.msk.bf16.vlgmr.msra.gmra.mxu1 %vm1131_vm3, %v1664_v54 }
 0x6b9   : > { %2859 = vmatpush3.bf16.msra.mxu1 %v1786_v8  ;;  %2860 = vmatprep.mubr.msk.bf16.mxu1 %vm3030_vm2, %v3029_v44 }
 0x6ba   : > { %2870 = vmatprep.subr.bf16.mxu1 %v3029_v44 }
 0x6db   : > { %v3418_v9 = vpop.f32.mrf.mxu0 }
 0x6dd   : > { %v2844_v10 = vpop.f32.mrf.mxu0 }
 0x6df   : > { %v1661_v11 = vpop.f32.mrf.mxu0 }
 0x6e1   : > { %v2845_v12 = vpop.f32.mrf.mxu0 }
 0x6e3   : > { %v1750_v14 = vpop.f32.mrf.mxu0 }
 0x6e4   : > { %v1759_v15 = vsel %vm1226_vm5, %v1750_v14, -inf }
 0x6e5   : > { %1760 = vmax.xlane.f32.xlu0 %v1759_v15  ;;  %v2856_v16 = vpop.f32.mrf.mxu0 }
 0x6e7   : > { %v1753_v18 = vpop.f32.mrf.mxu0 }
 0x6e9   : > { %v2857_v19 = vpop.f32.mrf.mxu0 }
 0x6fb   : > { %1828 = vrot.lane.b32.xlu0 %v3370_v28, %s3031_s29 }
 0x76e   : > { %v1761_v21 = vpop.xlane.xlu0 %1760 }
 0x770   : > { %v3423_v22 = vpop.f32.mrf.mxu1 }
 0x772   : > { %v2838_v24 = vpop.f32.mrf.mxu1  ;;  %v1829_v25 = vpop.permute.xlu0 %1828 }
 0x773   : > { %v1834_v26 = vsel %vm1303_vm7, %v1829_v25, 0 }
 0x774   : > { %v1612_v29 = vpop.f32.mrf.mxu1  ;;  %2865 = vmatpush3.bf16.msra.mxu0 %v1834_v26  ;;  %v1659_v26 = vadd.f32 %v3418_v9, %v3423_v22 }
 0x775   : > { %2876 = vmatprep.subr.bf16.mxu0 %v3029_v44 }
 0x776   : > { %v2839_v30 = vpop.f32.mrf.mxu1 }
 0x778   : > { %v1706_v31 = vpop.f32.mrf.mxu1 }
 0x779   : > { %v1756_v32 = vsel %vm1222_vm4, %v1706_v31, -inf }
 0x77a   : > { %1757 = vmax.xlane.f32.xlu1 %v1756_v32  ;;  %v2850_v33 = vpop.f32.mrf.mxu1  ;;  %v3468_v32 = vadd.f32 %v1659_v26, %v3224_v13  ;;  %v2658_v26 = vld [vmem:[%s687_s24] ss:$0 sm:$0xff] }
 0x77c   : > { %v1709_v34 = vpop.f32.mrf.mxu1 }
 0x77e   : > { %v2851_v35 = vpop.f32.mrf.mxu1 }
 0x78b   : > { %1929 = vrot.lane.b32.xlu1 %v3365_v27, %s3032_s28 }
 0x78f   : > { %1879 = vrot.lane.b32.xlu1 %v1664_v54, %s3032_s28 }
 0x803   : > { %v1758_v37 = vpop.xlane.xlu1 %1757 }
 0x804   : > { %v1762_v38 = vmax.f32 %v1758_v37, %v1761_v21 }
 0x806   : > { %v1763_v23 = vsub.f32 %v1706_v31, %v1762_v38  ;;  %v1766_v39 = vsub.f32 %v1750_v14, %v1762_v38 }
 0x807   : > { %v1930_v45 = vpop.permute.xlu1 %1929 }
 0x808   : > { %v1764_v41 = vmul.f32 1.442695, %v1763_v23  ;;  %v1767_v42 = vmul.f32 1.442695, %v1766_v39  ;;  %v1932_v49 = vsel %vm1131_vm3, %v1930_v45, 0 }
 0x80a   : > { %2997 = vpow2.f32 %v1764_v41 }
 0x80b   : > { %2999 = vpow2.f32 %v1767_v42  ;;  %v1880_v51 = vpop.permute.xlu1 %1879 }
 0x817   : > { %v2998_v43 = vpop.eup %2997 }
 0x818   : > { %v3000_v46 = vpop.eup %2999  ;;  %v1777_v47 = vpack.c.bf16 %v2998_v43, %v2998_v43  ;;  %v1769_v8 = vsel %vm1222_vm4, %v2998_v43, 0.0 }
 0x819   : > { %v1778_v48 = vpack.c.bf16 %v3000_v46, %v3000_v46  ;;  %v1772_v7 = vsel %vm1226_vm5, %v3000_v46, 0.0 }
 0x81a   : > { %2867 = vmatmul.mubr.msk.bf16.vlgmr.msra.gmra.mxu0 %vm1222_vm4, %v1777_v47 }
 0x81b   : > { %2861 = vmatmul.mubr.msk.bf16.vlgmr.msra.gmra.mxu1 %vm1226_vm5, %v1778_v48  ;;  %2877 = vmatpush3.bf16.xpose.msra.mxu0 %v1932_v49 }
 0x81c   : > { %2871 = vmatpush3.bf16.xpose.msra.mxu1 %v1887_v50  ;;  %2872 = vmatprep.mubr.msk.bf16.mxu1 %vm3030_vm2, %v3029_v44 }
 0x81d   : > { %2878 = vmatprep.mubr.msk.bf16.mxu0 %vm3030_vm2, %v3029_v44  ;;  %2882 = vmatprep.subr.bf16.mxu1 %v3029_v44 }
 0x81e   : > { %2888 = vmatprep.subr.bf16.mxu0 %v3029_v44 }
 0x822   : > { %2879 = vmatmul.mubr.msk.bf16.vlgmr.msra.gmra.mxu0 %vm1131_vm3, %v1880_v51 }
 0x823   : > { %2873 = vmatmul.mubr.msk.bf16.vlgmr.msra.gmra.mxu1 %vm1131_vm3, %v1880_v51  ;;  %2890 = vmatprep.mubr.msk.bf16.mxu0 %vm3030_vm2, %v3029_v44 }
 0x824   : > { %2884 = vmatprep.mubr.msk.bf16.mxu1 %vm3030_vm2, %v3029_v44 }
 0x8da   : > { %v1870_v52 = vpop.f32.mrf.mxu0 }
 0x8db   : > { %v1822_v53 = vpop.f32.mrf.mxu1 }
 0x8dc   : > { %v3447_v54 = vadd.f32 %v1870_v52, %v1822_v53  ;;  %v2868_v56 = vpop.f32.mrf.mxu0 }
 0x8dd   : > { %v2862_v57 = vpop.f32.mrf.mxu1 }
 0x8de   : > { %v1873_v58 = vpop.f32.mrf.mxu0 }
 0x8df   : > { %v1825_v59 = vpop.f32.mrf.mxu1 }
 0x8e0   : > { %v2869_v60 = vpop.f32.mrf.mxu0 }
 0x8e1   : > { %v2863_v61 = vpop.f32.mrf.mxu1 }
 0x8e2   : > { %v1968_v62 = vpop.f32.mrf.mxu0 }
 0x8e3   : > { %v1923_v20 = vpop.f32.mrf.mxu1  ;;  %v1977_v63 = vsel %vm1226_vm5, %v1968_v62, -inf }
 0x8e4   : > { %1978 = vmax.xlane.f32.xlu1 %v1977_v63  ;;  %v2880_v0 = vpop.f32.mrf.mxu0  ;;  %v1974_v1 = vsel %vm1222_vm4, %v1923_v20, -inf }
 0x8e5   : > { %1975 = vmax.xlane.f32.xlu0 %v1974_v1  ;;  %v2874_v2 = vpop.f32.mrf.mxu1 }
 0x8e6   : > { %v1971_v3 = vpop.f32.mrf.mxu0 }
 0x8e7   : > { %v1926_v4 = vpop.f32.mrf.mxu1 }
 0x8e8   : > { %v2881_v5 = vpop.f32.mrf.mxu0 }
 0x8e9   : > { %v2875_v6 = vpop.f32.mrf.mxu1 }
 0x8f5   : > { %2045 = vrot.lane.b32.xlu1 %v3370_v28, %s3033_s16 }
 0x8fb   : > { %1997 = vrot.lane.b32.xlu0 %v3365_v27, %s3033_s16 }
 0x919   : > { %1773 = vadd.xlane.f32.xlu1 %v1772_v7 }
 0x91a   : > { %1770 = vadd.xlane.f32.xlu0 %v1769_v8 }
 0x96d   : > { %v1979_v10 = vpop.xlane.xlu1 %1978 }
 0x96e   : > { %v1976_v11 = vpop.xlane.xlu0 %1975 }
 0x96f   : > { %v1980_v12 = vmax.f32 %v1976_v11, %v1979_v10  ;;  %v2969_v10 = vld [vmem:[%s3177_s15 + $0x8] sm:$0xff]   ;;  %v2970_v11 = vld [vmem:[%s3177_s15] sm:$0xff]   ;;  %s3586_s15 = scalar_lea.vmem %s3561_s11, %s3132_s26 }
 0x971   : > { %v1981_v14 = vsub.f32 %v1923_v20, %v1980_v12  ;;  %v1984_v15 = vsub.f32 %v1968_v62, %v1980_v12  ;;  %v2046_v16 = vpop.permute.xlu1 %2045 }
 0x972   : > { %v2051_v18 = vsel %vm1303_vm7, %v2046_v16, 0  ;;  %v1998_v19 = vpop.permute.xlu0 %1997 }
 0x973   : > { %v1982_v21 = vmul.f32 1.442695, %v1981_v14  ;;  %v1985_v28 = vmul.f32 1.442695, %v1984_v15  ;;  %v2003_v24 = vsel %vm1253_vm6, %v1998_v19, 0  ;;  %2889 = vmatpush3.bf16.msra.mxu0 %v2051_v18 }
 0x974   : > { %2883 = vmatpush3.bf16.msra.mxu1 %v2003_v24  ;;  %2900 = vmatprep.subr.bf16.mxu0 %v3029_v44 }
 0x975   : > { %3001 = vpow2.f32 %v1982_v21  ;;  %2894 = vmatprep.subr.bf16.mxu1 %v3029_v44 }
 0x976   : > { %3003 = vpow2.f32 %v1985_v28  ;;  %v2657_v28 = vld [vmem:[%s3586_s15] ss:$0 sm:$0xff] }
 0x982   : > { %v3002_v27 = vpop.eup %3001 }
 0x983   : > { %v3004_v25 = vpop.eup %3003  ;;  %v1987_v29 = vsel %vm1222_vm4, %v3002_v27, 0.0  ;;  %v1995_v30 = vpack.c.bf16 %v3002_v27, %v3002_v27 }
 0x984   : > { %1988 = vadd.xlane.f32.xlu0 %v1987_v29  ;;  %v1996_v31 = vpack.c.bf16 %v3004_v25, %v3004_v25  ;;  %v1990_v33 = vsel %vm1226_vm5, %v3004_v25, 0.0 }
 0x985   : > { %2891 = vmatmul.mubr.msk.bf16.vlgmr.msra.gmra.mxu0 %vm1222_vm4, %v1995_v30 }
 0x986   : > { %2885 = vmatmul.mubr.msk.bf16.vlgmr.msra.gmra.mxu1 %vm1226_vm5, %v1996_v31  ;;  %2901 = vmatpush3.bf16.msra.mxu0 %v3379_v40  ;;  %v2185_v40 = vsel %vm890_vm1, %v3468_v32, 0.0 }
 0x987   : > { %2902 = vmatprep.mubr.msk.bf16.mxu0 %vm3030_vm2, %v3029_v44  ;;  %2895 = vmatpush3.bf16.msra.mxu1 %v3403_v55 }
 0x988   : > { %1991 = vadd.xlane.f32.xlu0 %v1990_v33  ;;  %2896 = vmatprep.mubr.msk.bf16.mxu1 %vm3030_vm2, %v3029_v44 }
 0x989   : > { %2906 = vmatprep.subr.bf16.mxu1 %v3029_v44  ;;  %2914 = vmatprep.subr.bf16.mxu0 %v3029_v44 }
 0x98c   : > { %2186 = vadd.xlane.f32.xlu0 %v2185_v40  ;;  %v2971_v40 = vld [vmem:[%s3183_s0 + $0x38] sm:$0xff]  }
 0x9a2   : > { %v1774_v13 = vpop.xlane.xlu1 %1773 }
 0x9a3   : > { %v1771_v9 = vpop.xlane.xlu0 %1770 }
 0x9a4   : > { %v1775_v22 = vadd.f32 %v1774_v13, %v1771_v9  ;;  %v2972_v13 = vld [vmem:[%s3183_s0 + $0x30] sm:$0xff]   ;;  %v2973_v9 = vld [vmem:[%s3183_s0 + $0x28] sm:$0xff]  }
 0x9a6   : > { %3005 = vrcp.f32 %v1775_v22  ;;  %v2974_v22 = vld [vmem:[%s3183_s0 + $0x20] sm:$0xff]  }
 0x9b3   : > { %v3006_v34 = vpop.eup %3005 }
 0x9b4   : > { %v1876_v35 = vmul.f32 %v3006_v34, %v3447_v54  ;;  %v2975_v34 = vld [vmem:[%s3183_s0 + $0x18] sm:$0xff]  }
 0x9b6   : > { %v1877_v55 = vpack.c.bf16 %v1876_v35, %v1876_v35  ;;  %v2976_v35 = vld [vmem:[%s3183_s0 + $0x10] sm:$0xff]  }
 0x9b8   : > { %2903 = vmatmul.mubr.msk.bf16.vlgmr.msra.gmra.mxu0 %vm1131_vm3, %v1877_v55  ;;  %v2977_v55 = vld [vmem:[%s3183_s0 + $0x8] sm:$0xff]  }
 0x9b9   : > { %2930 = vmatprep.mubr.msk.bf16.mxu0 %vm3030_vm2, %v3029_v44  ;;  %2915 = vmatpush3.bf16.msra.mxu0 %v2971_v40 }
 0x9ba   : > { %2916 = vmatprep.subr.bf16.mxu0 %v3029_v44 }
 0x9bd   : > { %2917 = vmatpush3.bf16.msra.mxu0 %v2972_v13 }
 0x9be   : > { %2918 = vmatprep.subr.bf16.mxu0 %v3029_v44 }
 0x9c1   : > { %2919 = vmatpush3.bf16.msra.mxu0 %v2973_v9 }
 0x9c2   : > { %2920 = vmatprep.subr.bf16.mxu0 %v3029_v44 }
 0x9c5   : > { %2921 = vmatpush3.bf16.msra.mxu0 %v2974_v22 }
 0x9c6   : > { %2922 = vmatprep.subr.bf16.mxu0 %v3029_v44 }
 0x9c9   : > { %2923 = vmatpush3.bf16.msra.mxu0 %v2975_v34 }
 0x9ca   : > { %2924 = vmatprep.subr.bf16.mxu0 %v3029_v44 }
 0x9cd   : > { %2925 = vmatpush3.bf16.msra.mxu0 %v2976_v35 }
 0x9ce   : > { %2926 = vmatprep.subr.bf16.mxu0 %v3029_v44 }
 0x9d1   : > { %2927 = vmatpush3.bf16.msra.mxu0 %v2977_v55 }
 0x9d2   : > { %2928 = vmatprep.subr.bf16.mxu0 %v3029_v44 }
 0xa0d   : > { %v1989_v36 = vpop.xlane.xlu0 %1988 }
 0xa11   : > { %v1992_v37 = vpop.xlane.xlu0 %1991 }
 0xa12   : > { %v1993_v43 = vadd.f32 %v1992_v37, %v1989_v36  ;;  %v2978_v36 = vld [vmem:[%s3183_s0] sm:$0xff]   ;;  %s3587_s0 = sld [smem:[#allocation7_spill]] }
 0xa13   : > { %2929 = vmatpush3.bf16.msra.mxu0 %v2978_v36 }
 0xa14   : > { %3007 = vrcp.f32 %v1993_v43 }
 0xa15   : > { %v2187_v38 = vpop.xlane.xlu0 %2186 }
 0xa16   : > { %v2191_v23 = vmul.f32 0.03125, %v2187_v38 }
 0xa18   : > { %v2193_v39 = vsub.f32 %v3468_v32, %v2191_v23 }
 0xa1a   : > { %v2195_v41 = vmul.f32 %v2193_v39, %v2193_v39 }
 0xa1c   : > { %v2197_v42 = vsel %vm890_vm1, %v2195_v41, 0.0 }
 0xa1d   : > { %2198 = vadd.xlane.f32.xlu0 %v2197_v42 }
 0xa21   : > { %v3008_v49 = vpop.eup %3007 }
 0xa45   : > { %v2087_v45 = vpop.f32.mrf.mxu0 }
 0xa46   : > { %v2039_v46 = vpop.f32.mrf.mxu1 }
 0xa47   : > { %v2088_v47 = vadd.f32 %v2087_v45, %v2039_v46  ;;  %v2892_v48 = vpop.f32.mrf.mxu0 }
 0xa48   : > { %v2886_v50 = vpop.f32.mrf.mxu1 }
 0xa49   : > { %v2093_v51 = vmul.f32 %v3008_v49, %v2088_v47  ;;  %v2090_v52 = vpop.f32.mrf.mxu0 }
 0xa4a   : > { %v2042_v53 = vpop.f32.mrf.mxu1 }
 0xa4b   : > { %v2094_v54 = vpack.c.bf16 %v2093_v51, %v2093_v51  ;;  %v2893_v56 = vpop.f32.mrf.mxu0 }
 0xa4c   : > { %v2887_v57 = vpop.f32.mrf.mxu1 }
 0xa4d   : > { %2897 = vmatmul.mubr.msk.bf16.vlgmr.msra.gmra.mxu1 %vm1131_vm3, %v2094_v54 }
 0xa4e   : > { %2910 = vmatprep.mubr.msk.bf16.mxu1 %vm3030_vm2, %v3029_v44  ;;  %2907 = vmatpush3.bf16.msra.mxu1 %v2969_v10 }
 0xa4f   : > { %2908 = vmatprep.subr.bf16.mxu1 %v3029_v44 }
 0xa52   : > { %2909 = vmatpush3.bf16.msra.mxu1 %v2970_v11 }
 0xa78   : > { %v2175_v58 = vpop.f32.mrf.mxu0 }
 0xa7a   : > { %v2904_v59 = vpop.f32.mrf.mxu0 }
 0xa7c   : > { %v2178_v60 = vpop.f32.mrf.mxu0 }
 0xa7e   : > { %v2905_v61 = vpop.f32.mrf.mxu0 }
 0xb0d   : > { %v2132_v62 = vpop.f32.mrf.mxu1 }
 0xb0e   : > { %v2176_v20 = vadd.f32 %v2175_v58, %v2132_v62 }
 0xb0f   : > { %v2898_v63 = vpop.f32.mrf.mxu1 }
 0xb10   : > { %v3490_v0 = vadd.f32 %v2176_v20, %v3231_v17  ;;  %v2199_v17 = vpop.xlane.xlu0 %2198 }
 0xb11   : > { %v2135_v1 = vpop.f32.mrf.mxu1  ;;  %v2203_v12 = vmul.f32 0.03125, %v2199_v17 }
 0xb12   : > { %v2188_v2 = vsel %vm890_vm1, %v3490_v0, 0.0 }
 0xb13   : > { %2189 = vadd.xlane.f32.xlu1 %v2188_v2  ;;  %v2899_v3 = vpop.f32.mrf.mxu1  ;;  %v2205_v14 = vadd.f32 1e-05, %v2203_v12 }
 0xb15   : > { %3009 = vrsqrt.f32 %v2205_v14 }
 0xb22   : > { %v3010_v19 = vpop.eup %3009 }
 0xb23   : > { %v2209_v21 = vmul.f32 %v3010_v19, %v2193_v39 }
 0xb25   : > { %v2217_v25 = vmul.f32 %v2657_v28, %v2209_v21 }
 0xb27   : > { %v2225_v30 = vadd.f32 %v2658_v26, %v2217_v25  ;;  %v2671_v25 = vld [vmem:[%s3588_s8] ss:$0 sm:$0xff] }
 0xb9c   : > { %v2190_v4 = vpop.xlane.xlu1 %2189 }
 0xb9d   : > { %v2192_v5 = vmul.f32 0.03125, %v2190_v4 }
 0xb9f   : > { %v2194_v6 = vsub.f32 %v3490_v0, %v2192_v5 }
 0xba1   : > { %v2196_v7 = vmul.f32 %v2194_v6, %v2194_v6 }
 0xba3   : > { %v2200_v8 = vsel %vm890_vm1, %v2196_v7, 0.0 }
 0xba4   : > { %2201 = vadd.xlane.f32.xlu1 %v2200_v8 }
 0xc2d   : > { %v2202_v15 = vpop.xlane.xlu1 %2201 }
 0xc2e   : > { %v2204_v16 = vmul.f32 0.03125, %v2202_v15 }
 0xc30   : > { %v2206_v18 = vadd.f32 1e-05, %v2204_v16 }
 0xc32   : > { %3011 = vrsqrt.f32 %v2206_v18 }
 0xc3f   : > { %v3012_v24 = vpop.eup %3011 }
 0xc40   : > { %v2210_v27 = vmul.f32 %v3012_v24, %v2194_v6  ;;  %v2670_v24 = vld [vmem:[%s3587_s0] ss:$0 sm:$0xff] }
 0xc42   : > { %v2218_v29 = vmul.f32 %v2657_v28, %v2210_v27 }
 0xc44   : > { %v2226_v31 = vadd.f32 %v2658_v26, %v2218_v29 }
 0xc46   : > { %v2227_v33 = vpack.c.bf16 %v2226_v31, %v2225_v30 }
 0xc48   : > { %2911 = vmatmul.mubr.msk.bf16.vlgmr.msra.gmra.mxu1 %vm890_vm1, %v2227_v33 }
 0xd08   : > { %v2281_v37 = vpop.f32.mrf.mxu1 }
 0xd09   : > { %v2290_v38 = vmul.f32 0.044715, %v2281_v37  ;;  %v2288_v54 = vmul.f32 0.5, %v2281_v37 }
 0xd0a   : > { %v2912_v23 = vpop.f32.mrf.mxu1 }
 0xd0b   : > { %v2292_v39 = vmul.f32 %v2290_v38, %v2281_v37 }
 0xd0c   : > { %v2284_v41 = vpop.f32.mrf.mxu1 }
 0xd0d   : > { %v2294_v42 = vmul.f32 %v2292_v39, %v2281_v37  ;;  %v2291_v43 = vmul.f32 0.044715, %v2284_v41  ;;  %v2289_v56 = vmul.f32 0.5, %v2284_v41 }
 0xd0e   : > { %v2913_v45 = vpop.f32.mrf.mxu1 }
 0xd0f   : > { %v2296_v46 = vadd.f32 %v2294_v42, %v2281_v37  ;;  %v2293_v47 = vmul.f32 %v2291_v43, %v2284_v41 }
 0xd11   : > { %v2298_v48 = vmul.f32 0.7978846, %v2296_v46  ;;  %v2295_v49 = vmul.f32 %v2293_v47, %v2284_v41 }
 0xd13   : > { %3013 = vtanh.f32 %v2298_v48  ;;  %v2297_v50 = vadd.f32 %v2295_v49, %v2284_v41 }
 0xd15   : > { %v2299_v51 = vmul.f32 0.7978846, %v2297_v50 }
 0xd17   : > { %3015 = vtanh.f32 %v2299_v51 }
 0xd20   : > { %v3014_v52 = vpop.eup %3013 }
 0xd21   : > { %v2302_v53 = vadd.f32 1.0, %v3014_v52 }
 0xd23   : > { %v2304_v58 = vmul.f32 %v2302_v53, %v2288_v54 }
 0xd24   : > { %v3016_v44 = vpop.eup %3015 }
 0xd25   : > { %v2303_v57 = vadd.f32 1.0, %v3016_v44 }
 0xd27   : > { %v2305_v59 = vmul.f32 %v2303_v57, %v2289_v56 }
 0xd29   : > { %v2306_v60 = vpack.c.bf16 %v2305_v59, %v2304_v58 }
 0xd2b   : > { %2931 = vmatmul.mubr.bf16.vlgmr.msra.gmra.mxu0 %v2306_v60 }
 0xdeb   : > { %v2405_v61 = vpop.f32.mrf.mxu0 }
 0xdec   : > { %v2412_v62 = vadd.f32 %v2405_v61, %v3468_v32 }
 0xded   : > { %v2932_v20 = vpop.f32.mrf.mxu0 }
 0xdee   : > { %2414 = vst.msk [vmem:[#allocation2] sm:$0xff] %vm890_vm1, %v2412_v62  ;;  %v2418_v63 = vsel %vm890_vm1, %v2412_v62, 0.0 }
 0xdef   : > { %2419 = vadd.xlane.f32.xlu0 %v2418_v63  ;;  %v2408_v1 = vpop.f32.mrf.mxu0 }
 0xdf0   : > { %v2413_v2 = vadd.f32 %v2408_v1, %v3490_v0 }
 0xdf1   : > { %v2933_v3 = vpop.f32.mrf.mxu0 }
 0xdf2   : > { %2415 = vst.msk [vmem:[#allocation2 + $0x8] sm:$0xff] %vm890_vm1, %v2413_v2  ;;  %v2421_v4 = vsel %vm890_vm1, %v2413_v2, 0.0 }
 0xdf3   : > { %2422 = vadd.xlane.f32.xlu1 %v2421_v4 }
 0xe78   : > { %v2420_v5 = vpop.xlane.xlu0 %2419 }
 0xe79   : > { %v2424_v6 = vmul.f32 0.03125, %v2420_v5 }
 0xe7b   : > { %v2426_v7 = vsub.f32 %v2412_v62, %v2424_v6 }
 0xe7c   : > { %v2423_v8 = vpop.xlane.xlu1 %2422 }
 0xe7d   : > { %v2425_v32 = vmul.f32 0.03125, %v2423_v8  ;;  %v2428_v10 = vmul.f32 %v2426_v7, %v2426_v7 }
 0xe7f   : > { %v2427_v11 = vsub.f32 %v2413_v2, %v2425_v32  ;;  %v2430_v17 = vsel %vm890_vm1, %v2428_v10, 0.0 }
 0xe80   : > { %2431 = vadd.xlane.f32.xlu0 %v2430_v17 }
 0xe81   : > { %v2429_v12 = vmul.f32 %v2427_v11, %v2427_v11 }
 0xe83   : > { %v2433_v14 = vsel %vm890_vm1, %v2429_v12, 0.0 }
 0xe84   : > { %2434 = vadd.xlane.f32.xlu1 %v2433_v14 }
 0xf09   : > { %v2432_v0 = vpop.xlane.xlu0 %2431 }
 0xf0a   : > { %v2436_v15 = vmul.f32 0.03125, %v2432_v0 }
 0xf0c   : > { %v2438_v16 = vadd.f32 1e-05, %v2436_v15 }
 0xf0d   : > { %v2435_v18 = vpop.xlane.xlu1 %2434 }
 0xf0e   : > { %3017 = vrsqrt.f32 %v2438_v16  ;;  %v2437_v19 = vmul.f32 0.03125, %v2435_v18 }
 0xf10   : > { %v2439_v21 = vadd.f32 1e-05, %v2437_v19 }
 0xf12   : > { %3019 = vrsqrt.f32 %v2439_v21 }
 0xf1b   : > { %v3018_v28 = vpop.eup %3017 }
 0xf1c   : > { %v2442_v27 = vmul.f32 %v3018_v28, %v2426_v7 }
 0xf1e   : > { %v2450_v26 = vmul.f32 %v2670_v24, %v2442_v27 }
 0xf1f   : > { %v3020_v29 = vpop.eup %3019 }
 0xf20   : > { %v2458_v30 = vadd.f32 %v2671_v25, %v2450_v26  ;;  %v2443_v31 = vmul.f32 %v3020_v29, %v2427_v11 }
 0xf22   : > { %2460 = vst.msk [vmem:[%s3589_s18] sm:$0xff] %vm890_vm1, %v2458_v30  ;;  %v2451_v33 = vmul.f32 %v2670_v24, %v2443_v31 }
 0xf24   : > { %v2459_v40 = vadd.f32 %v2671_v25, %v2451_v33 }
 0xf26   : > { %2461 = vst.msk [vmem:[%s3589_s18 + $0x8] sm:$0xff] %vm890_vm1, %v2459_v40 }
 0xf27 PF: > { %s3590_s16 = sld [smem:[#allocation3_spill]] }
 0xf2d   : > { %s27_s24 = sadd.s32 1, %s3590_s16  }
 0xf2e   : > { %p24_p5 = scmp.ge.s32.totalorder %s27_s24, 4  }
 0xf30   :  { %26 = sbr.rel (!%p24_p5) target bundleno = 7 (0x7), region = 148 }

// kernel: flamingo_forward.3
= control target key start
LH: loop header
LB: loop body
LE: loop exit
PB: predicated region body
PF: predicated region fallthrough
CT: control target
= control target key end

     0   :  { %s4357_s6 = smov 1   ;;  %s4358_s10 = smov 2   ;;  %s5089_s0 = inlined_call_operand.smem [shape: u32[30], index: -1, kind: input, shape index: {}] }
   0x1   :  { %s4403_s5 = sld [smem:[%s5089_s0]]   ;;  %s4359_s14 = smov 3  }
   0x2   :  { %s4408_s9 = sld [smem:[%s5089_s0 + %s4357_s6]]   ;;  %s4360_s18 = smov 4  }
   0x3   :  { %s4413_s13 = sld [smem:[%s5089_s0 + %s4358_s10]]   ;;  %s4361_s22 = smov 5  }
   0x4   :  { %s4418_s17 = sld [smem:[%s5089_s0 + %s4359_s14]]   ;;  %s4362_s26 = smov 6  }
   0x5   :  { %s4423_s21 = sld [smem:[%s5089_s0 + %s4360_s18]]   ;;  %s4363_s30 = smov 7  }
   0x6   :  { %s4428_s25 = sld [smem:[%s5089_s0 + %s4361_s22]]   ;;  %s4364_s4 = smov 8  }
   0x7   :  { %5102 = sst [smem:[#allocation6_spill]] %s4403_s5  ;;  %s4365_s10 = smov 9  }
   0x8   :  { %5103 = sst [smem:[#allocation7_spill]] %s4408_s9  ;;  %s4366_s15 = smov 10  }
   0x9   :  { %5104 = sst [smem:[#allocation8_spill]] %s4413_s13  ;;  %s4367_s20 = smov 11  }
   0xa   :  { %5105 = sst [smem:[#allocation9_spill]] %s4418_s17  ;;  %s4369_s1 = smov 13  }
   0xb   :  { %5106 = sst [smem:[#allocation10_spill]] %s4423_s21  ;;  %s4370_s7 = smov 14  }
   0xc   :  { %5107 = sst [smem:[#allocation11_spill]] %s4428_s25  ;;  %s4372_s22 = smov 16  }
   0xd   :  { %s4433_s29 = sld [smem:[%s5089_s0 + %s4362_s26]]   ;;  %s4368_s26 = smov 12  }
   0xe   :  { %s4438_s3 = sld [smem:[%s5089_s0 + %s4363_s30]]   ;;  %s4373_s28 = smov 17  }
   0xf   :  { %s4443_s8 = sld [smem:[%s5089_s0 + %s4364_s4]]  }
  0x10   :  { %s4448_s14 = sld [smem:[%s5089_s0 + %s4365_s10]]  }
  0x11   :  { %s4453_s19 = sld [smem:[%s5089_s0 + %s4366_s15]]   ;;  %s4371_s15 = smov 15  }
  0x12   :  { %s4458_s24 = sld [smem:[%s5089_s0 + %s4367_s20]]  }
  0x13   :  { %5108 = sst [smem:[#allocation12_spill]] %s4433_s29 }
  0x14   :  { %5109 = sst [smem:[#allocation13_spill]] %s4438_s3 }
  0x15   :  { %5110 = sst [smem:[#allocation14_spill]] %s4443_s8 }
  0x16   :  { %5111 = sst [smem:[#allocation15_spill]] %s4448_s14 }
  0x17   :  { %5112 = sst [smem:[#allocation16_spill]] %s4453_s19 }
  0x18   :  { %5113 = sst [smem:[#allocation17_spill]] %s4458_s24 }
  0x19   :  { %s4463_s30 = sld [smem:[%s5089_s0 + %s4368_s26]]  }
  0x1a   :  { %s4468_s6 = sld [smem:[%s5089_s0 + %s4369_s1]]  }
  0x1b   :  { %s4473_s12 = sld [smem:[%s5089_s0 + %s4370_s7]]   ;;  %s4374_s7 = smov 18  }
  0x1c   :  { %s4478_s20 = sld [smem:[%s5089_s0 + %s4371_s15]]   ;;  %s4375_s15 = smov 19  }
  0x1d   :  { %s4483_s27 = sld [smem:[%s5089_s0 + %s4372_s22]]   ;;  %s4376_s22 = smov 20  }
  0x1e   :  { %s4488_s4 = sld [smem:[%s5089_s0 + %s4373_s28]]   ;;  %s4377_s28 = smov 21  }
  0x1f   :  { %5114 = sst [smem:[#allocation18_spill]] %s4463_s30 }
  0x20   :  { %5115 = sst [smem:[#allocation19_spill]] %s4468_s6 }
  0x21   :  { %s4493_s17 = sld [smem:[%s5089_s0 + %s4374_s7]]   ;;  %s4378_s7 = smov 22  }
  0x22   :  { %s4498_s13 = sld [smem:[%s5089_s0 + %s4375_s15]]   ;;  %s4379_s15 = smov 23  }
  0x23   :  { %s4503_s9 = sld [smem:[%s5089_s0 + %s4376_s22]]   ;;  %s4380_s22 = smov 24  }
  0x24   :  { %s4508_s5 = sld [smem:[%s5089_s0 + %s4377_s28]]   ;;  %s4381_s28 = smov 25  }
  0x27   :  { %5116 = sst [smem:[#allocation20_spill]] %s4493_s17 }
  0x28   :  { %5117 = sst [smem:[#allocation21_spill]] %s4498_s13 }
  0x29   :  { %5118 = sst [smem:[#allocation22_spill]] %s4503_s9 }
  0x2a   :  { %5119 = sst [smem:[#allocation23_spill]] %s4508_s5 }
  0x2b   :  { %s4513_s17 = sld [smem:[%s5089_s0 + %s4378_s7]]   ;;  %s4382_s7 = smov 26  }
  0x2c   :  { %s4518_s13 = sld [smem:[%s5089_s0 + %s4379_s15]]   ;;  %s4383_s15 = smov 27  }
  0x2d   :  { %s4523_s9 = sld [smem:[%s5089_s0 + %s4380_s22]]   ;;  %s4384_s22 = smov 28  }
  0x2e   :  { %s4528_s5 = sld [smem:[%s5089_s0 + %s4381_s28]]   ;;  %s4385_s28 = smov 29  }
  0x31   :  { %5120 = sst [smem:[#allocation24_spill]] %s4513_s17 }
  0x32   :  { %5121 = sst [smem:[#allocation25_spill]] %s4518_s13 }
  0x33   :  { %5122 = sst [smem:[#allocation26_spill]] %s4523_s9 }
  0x34   :  { %5123 = sst [smem:[#allocation27_spill]] %s4528_s5 }
  0x35   :  { %s4533_s17 = sld [smem:[%s5089_s0 + %s4382_s7]]  }
  0x36   :  { %s4538_s13 = sld [smem:[%s5089_s0 + %s4383_s15]]  }
  0x37   :  { %s4543_s9 = sld [smem:[%s5089_s0 + %s4384_s22]]  }
  0x38   :  { %s4548_s5 = sld [smem:[%s5089_s0 + %s4385_s28]]  }
  0x3b   :  { %5124 = sst [smem:[#allocation28_spill]] %s4533_s17 }
  0x3c   :  { %5125 = sst [smem:[#allocation29_spill]] %s4538_s13 }
  0x3d   :  { %5126 = sst [smem:[#allocation30_spill]] %s4543_s9 }
  0x3e   :  { %5127 = sst [smem:[#allocation31_spill]] %s4548_s5 }
  0x3f   :  { %64 = vsyncpa [#allocation4], 0  ;;  %s4550_s7 = smov 0  }
  0x40 LB: > { %s5128_s21 = sld [smem:[#allocation10_spill]]  ;;  %s4556_s10 = sadd.s32 4294967295, %s4355_s7   ;;  %s4355_s7 = sphi %s4550_s7, %s70_s7  }
  0x41   : > { %5129 = sst [smem:[#allocation32_spill]] %s4355_s7  ;;  %p3748_p0 = scmp.ge.s32.totalorder %s4355_s7, 1 }
  0x42   : > { %5130 = sst [smem:[#allocation33_spill]] %s4556_s10  ;;  %p810_p1 = scmp.lt.s32.totalorder %s4355_s7, 3 }
  0x43   : > { %p4188_p4 = scmp.eq.s32.totalorder %s4556_s10, 0 }
  0x44   : > { %p4562_p3 = pnand %p3748_p0, %p810_p1 }
  0x46   : > { %s835_s0 = sshll.u32 %s5128_s21, 4  ;;  %p4184_p5 = pneg %p4562_p3  ;;  %s836_s0 = int_to_ptr.vmem [resolvable:$true] %s835_s0 }
  0x47   : > { %s4330_s15 = scalar_lea.vmem %s836_s0, 32  ;;  %p4338_p11 = scmp.lt.s32.totalorder %s836_s0, %s836_s0 }
  0x48   : > { %p4185_p6 = pnand %p4188_p4, %p4184_p5  ;;  %p4331_p7 = scmp.ne.s32.totalorder %s836_s0, %s4330_s15 }
  0x49   : > { %p4339_p12 = scmp.lt.s32.totalorder %s4330_s15, %s4330_s15 }
  0x4a   : > { %p4332_p8 = pneg %p4185_p6 }
  0x4b   : > { %p4340_p13 = por %p4339_p12, %p4338_p11 }
  0x4c   : > { %p4333_p9 = pnand %p4332_p8, %p4331_p7 }
  0x4e   : > { %p4334_p10 = pneg %p4333_p9 }
  0x50   : > { %p4341_p2 = pnand %p4340_p13, %p4334_p10 }
  0x52   : > { %4344 = shalt.err (!%p4341_p2)
}
  0x53   : > { %s4386_s16 = smov [#allocation3]   ;;  %1001 = sbr.rel (%p4562_p3) target bundleno = 7150 (0x1bee), region = 136 }
  0x54   : > { %4187 = dma.vmem_to_smem (!%p4185_p6), %s836_s0, 32, %s4386_s16, [#allocation4]  }
  0x58   : > { %4350 = dma.done.wait (%p4188_p4), [#allocation4], 32  }
  0x59   : > { %4352 = vsyncadd (%p4188_p4), [#allocation4], 4294967264 }
  0x5a   : > { %1007 = sfence }
  0x5b   : > { %s5135_s3 = sld [smem:[#allocation13_spill]]  ;;  %p1149_p0 = scmp.lt.s32.totalorder %s4556_s10, 1 }
  0x5c   : > { %s5136_s8 = sld [smem:[#allocation14_spill]] }
  0x5d   : > { %s5137_s14 = sld [smem:[#allocation15_spill]] }
  0x5e   : > { %s5139_s30 = sld [smem:[#allocation18_spill]] }
  0x5f   : > { %s5140_s6 = sld [smem:[#allocation19_spill]] }
  0x60   : > { %s4579_s18 = scalar_select %p1149_p0, %s4556_s10, 1 }
  0x61   : > { %s5141_s22 = sld [smem:[#allocation20_spill]] }
  0x62   : > { %s5142_s26 = sld [smem:[#allocation21_spill]]  ;;  %s3855_s2 = sshll.u32 %s4579_s18, 4 }
  0x63   : > { %s5143_s1 = sld [smem:[#allocation22_spill]]  ;;  %s4589_s16 = scalar_lea.vmem %s5135_s3, %s3855_s2 }
  0x64   : > { %s5144_s0 = sld [smem:[#allocation23_spill]]  ;;  %s4592_s7 = scalar_lea.vmem %s5136_s8, %s3855_s2 }
  0x65   : > { %s5145_s15 = sld [smem:[#allocation24_spill]]  ;;  %s4595_s13 = scalar_lea.vmem %s5137_s14, %s3855_s2 }
  0x66   : > { %5146 = sst [smem:[#allocation34_spill]] %s4589_s16  ;;  %s4600_s28 = scalar_lea.vmem %s5139_s30, %s3855_s2 }
  0x67   : > { %s5147_s21 = sld [smem:[#allocation25_spill]]  ;;  %s3859_s9 = sshll.u32 %s4579_s18, 6 }
  0x68   : > { %5148 = sst [smem:[#allocation35_spill]] %s4592_s7  ;;  %s4604_s29 = scalar_lea.vmem %s5140_s6, %s3859_s9 }
  0x69   : > { %s5149_s5 = sld [smem:[#allocation26_spill]]  ;;  %s1188_s25 = scalar_lea.vmem %s4473_s12, %s4579_s18 }
  0x6a   : > { %5150 = sst [smem:[#allocation36_spill]] %s4595_s13  ;;  %s1191_s11 = scalar_lea.vmem %s4478_s20, %s4579_s18 }
  0x6b   : > { %s5151_s23 = sld [smem:[#allocation27_spill]]  ;;  %s4611_s19 = scalar_lea.vmem %s4483_s27, %s3855_s2 }
  0x6c   : > { %s1199_s3 = scalar_lea.vmem %s4488_s4, %s4579_s18  ;;  %s4616_s16 = scalar_lea.vmem %s5141_s22, %s3855_s2 }
  0x6d   : > { %s1207_s8 = scalar_lea.vmem %s5142_s26, %s4579_s18  ;;  %s1210_s7 = scalar_lea.vmem %s5143_s1, %s4579_s18 }
  0x6e   : > { %s1213_s10 = scalar_lea.vmem %s5144_s0, %s4579_s18  ;;  %s4625_s14 = scalar_lea.vmem %s5145_s15, %s3855_s2 }
  0x6f   : > { %s1221_s13 = scalar_lea.vmem %s5147_s21, %s4579_s18  ;;  %s4630_s17 = scalar_lea.vmem %s5149_s5, %s3859_s9 }
  0x70   : > { %s5152_s24 = sld [smem:[#allocation33_spill]] }
  0x71   : > { %s1229_s30 = scalar_lea.vmem %s5151_s23, %s4579_s18 }
  0x76   : > { %p5153_p1 = scmp.ne.s32.totalorder %s5152_s24, 0 }
  0x77   : > { %s5154_s6 = sld [smem:[#allocation6_spill]] (!%p5153_p1) }
  0x78   : > { %1234 = sbr.rel (%p5153_p1) target bundleno = 127 (0x7f), region = 144 }
  0x7d   : > { %v1235_v0 = vld [vmem:[%s5154_s6] sm:$0xff]  ;;  %vm1237_vm0 = vcmask 261120   ;;  %v1236_v1 = vld [vmem:[%s5154_s6 + $0x8] sm:$0xff] }
  0x7e   : > { %1238 = vst.msk [vmem:[#allocation2] sm:$0xff] %vm1237_vm0, %v1235_v0  ;;  %1239 = vst.msk [vmem:[#allocation2 + $0x8] sm:$0xff] %vm1237_vm0, %v1236_v1 }
  0x7f PF: > { %vm1248_vm1 = vcmask 261120   ;;  %s5155_s5 = sld [smem:[#allocation34_spill]]  ;;  %v4387_v17 = vmov 0.0   ;;  %vm4388_vm2 = vmmov 0   ;;  %v4389_v41 = vmov 0   ;;  %s4390_s2 = smov 112  }
  0x80   : > { %3948 = vmatprep.subr.bf16.mxu0 %v4387_v17  ;;  %3952 = vmatprep.mubr.msk.bf16.mxu0 %vm4388_vm2, %v4387_v17  ;;  %s5156_s9 = sld [smem:[#allocation11_spill]]  ;;  %vm1437_vm3 = vcmask 130048   ;;  %v1416_v61 = vlaneseq  ;;  %vm1485_vm7 = vcmask 64512   ;;  %s4391_s0 = smov 80   ;;  %vm1504_vm8 = vcmask 1043456  }
  0x81   : > { %3970 = vmatprep.subr.bf16.mxu1 %v4387_v17  ;;  %3972 = vmatprep.mubr.msk.bf16.mxu1 %vm4388_vm2, %v4387_v17  ;;  %s5157_s21 = sld [smem:[#allocation12_spill]]  ;;  %s4392_s15 = smov 96  }
  0x82   : > { %s5158_s24 = sld [smem:[#allocation35_spill]]  ;;  %4236 = vset.pattern.permute.xlu1 %v4389_v41  ;;  %4237 = vset.pattern.permute.xlu0 %v4389_v41  ;;  %v4702_v62 = vand.u32 127, %v1416_v61 }
  0x83   : > { %s5159_s22 = sld [smem:[#allocation7_spill]] }
  0x84   : > { %s5162_s1 = sld [smem:[#allocation8_spill]] }
  0x85   : > { %v4638_v2 = vld [vmem:[#allocation2] sm:$0xff]  ;;  %v4640_v3 = vld [vmem:[#allocation2 + $0x8] sm:$0xff] }
  0x86   : > { %v1249_v4 = vsel %vm1248_vm1, %v4638_v2, 0.0  ;;  %v1252_v5 = vsel %vm1248_vm1, %v4640_v3, 0.0  ;;  %v4238_v16 = vld [vmem:[%s5155_s5 + $0x8] sm:$0xff]   ;;  %v4239_v18 = vld [vmem:[%s5155_s5] sm:$0xff]   ;;  %s5160_s23 = scalar_lea.vmem %s5156_s9, %s4579_s18  ;;  %s5163_s5 = sld [smem:[#allocation36_spill]] }
  0x87   : > { %1250 = vadd.xlane.f32.xlu0 %v1249_v4  ;;  %3949 = vmatpush3.bf16.msra.mxu0 %v4238_v16  ;;  %v3773_v27 = vld [vmem:[%s5160_s23] ss:$0 sm:$0xff]  ;;  %s5161_s26 = scalar_lea.vmem %s5157_s21, %s4579_s18  ;;  %s5164_s9 = sld [smem:[#allocation33_spill]] }
  0x88   : > { %3950 = vmatprep.subr.bf16.mxu0 %v4387_v17  ;;  %v3774_v31 = vld [vmem:[%s5161_s26] ss:$0 sm:$0xff]  ;;  %v4240_v35 = vld [vmem:[%s5158_s24 + $0x8] sm:$0xff]   ;;  %s5165_s23 = sld [smem:[#allocation16_spill]] }
  0x89   : > { %v4241_v37 = vld [vmem:[%s5158_s24] sm:$0xff]   ;;  %v1354_v39 = vld [vmem:[%s5159_s22 + $0x8] sm:$0xff]  ;;  %s5166_s26 = sld [smem:[#allocation17_spill]] }
  0x8a   : > { %v1353_v38 = vld [vmem:[%s5159_s22] sm:$0xff]  ;;  %v4715_v16 = vld [vmem:[%s5162_s1 + $0x8] sm:$0xff] }
  0x8b   : > { %1253 = vadd.xlane.f32.xlu0 %v1252_v5  ;;  %3951 = vmatpush3.bf16.msra.mxu0 %v4239_v18  ;;  %v1355_v40 = vpack.c.bf16 %v1354_v39, %v1353_v38  ;;  %v4681_v42 = vld [vmem:[%s5162_s1] sm:$0xff]  ;;  %vm2091_vm13 = vcmp.gt.s32.totalorder %v4715_v16, 0 }
  0x8c   : > { %3956 = vmatprep.subr.bf16.mxu0 %v4387_v17  ;;  %v3781_v43 = vadd.s32 4294967295, %v4681_v42  ;;  %v1425_v50 = vmul.u32 8, %v4681_v42  ;;  %vm1760_vm12 = vcmp.gt.s32.totalorder %v4681_v42, 0 }
  0x8d   : > { %s3772_s21 = sshll.u32 %s5164_s9, 7 }
  0x8e   : > { %v1420_v47 = vmul.u32 8, %v3781_v43  ;;  %s4776_s24 = sld [smem:[#allocation3 + %s3772_s21]] }
 0x110   : > { %v1251_v6 = vpop.xlane.xlu0 %1250 }
 0x111   : > { %v1256_v7 = vmul.f32 0.03125, %v1251_v6 }
 0x113   : > { %v1258_v8 = vsub.f32 %v4638_v2, %v1256_v7 }
 0x114   : > { %v1254_v9 = vpop.xlane.xlu0 %1253 }
 0x115   : > { %v1257_v10 = vmul.f32 0.03125, %v1254_v9  ;;  %v1260_v11 = vmul.f32 %v1258_v8, %v1258_v8 }
 0x117   : > { %v1259_v12 = vsub.f32 %v4640_v3, %v1257_v10  ;;  %v1262_v13 = vsel %vm1248_vm1, %v1260_v11, 0.0 }
 0x118   : > { %1263 = vadd.xlane.f32.xlu1 %v1262_v13 }
 0x119   : > { %v1261_v14 = vmul.f32 %v1259_v12, %v1259_v12 }
 0x11b   : > { %v1265_v15 = vsel %vm1248_vm1, %v1261_v14, 0.0 }
 0x11c   : > { %1266 = vadd.xlane.f32.xlu1 %v1265_v15 }
 0x1a1   : > { %v1264_v19 = vpop.xlane.xlu1 %1263 }
 0x1a2   : > { %v1268_v20 = vmul.f32 0.03125, %v1264_v19 }
 0x1a4   : > { %v1270_v21 = vadd.f32 1e-05, %v1268_v20 }
 0x1a5   : > { %v1267_v22 = vpop.xlane.xlu1 %1266 }
 0x1a6   : > { %4270 = vrsqrt.f32 %v1270_v21  ;;  %v1269_v23 = vmul.f32 0.03125, %v1267_v22  ;;  %v1775_v21 = vmul.u32 8, %v4715_v16 }
 0x1a8   : > { %v1271_v24 = vadd.f32 1e-05, %v1269_v23 }
 0x1aa   : > { %4272 = vrsqrt.f32 %v1271_v24 }
 0x1b3   : > { %v4271_v25 = vpop.eup %4270 }
 0x1b4   : > { %v1274_v26 = vmul.f32 %v4271_v25, %v1258_v8 }
 0x1b6   : > { %v1282_v30 = vmul.f32 %v3773_v27, %v1274_v26 }
 0x1b7   : > { %v4273_v28 = vpop.eup %4272 }
 0x1b8   : > { %v1275_v29 = vmul.f32 %v4273_v28, %v1259_v12  ;;  %v1290_v33 = vadd.f32 %v3774_v31, %v1282_v30 }
 0x1ba   : > { %v1283_v32 = vmul.f32 %v3773_v27, %v1275_v29  ;;  %v3791_v29 = vadd.s32 4294967295, %v4715_v16  ;;  %v2098_v16 = vstv %s4776_s24 }
 0x1bc   : > { %v1291_v34 = vadd.f32 %v3774_v31, %v1283_v32  ;;  %v1770_v30 = vmul.u32 8, %v3791_v29 }
 0x1be   : > { %v1292_v36 = vpack.c.bf16 %v1291_v34, %v1290_v33 }
 0x1c0   : > { %3953 = vmatmul.mubr.msk.bf16.vlgmr.msra.gmra.mxu0 %vm1248_vm1, %v1292_v36 }
 0x1c1   : > { %3957 = vmatpush3.bf16.msra.mxu0 %v4240_v35  ;;  %3960 = vmatprep.mubr.msk.bf16.mxu0 %vm4388_vm2, %v4387_v17 }
 0x1c2   : > { %3958 = vmatprep.subr.bf16.mxu0 %v4387_v17 }
 0x1c5   : > { %3959 = vmatpush3.bf16.msra.mxu0 %v4241_v37 }
 0x1c6   : > { %3964 = vmatprep.subr.bf16.mxu0 %v4387_v17 }
 0x1c8   : > { %3961 = vmatmul.mubr.msk.bf16.vlgmr.msra.gmra.mxu0 %vm1248_vm1, %v1355_v40 }
 0x1c9   : > { %3966 = vmatprep.mubr.msk.bf16.mxu0 %vm4388_vm2, %v4387_v17 }
 0x280   : > { %v1346_v44 = vpop.f32.mrf.mxu0 }
 0x281   : > { %v1435_v45 = vpack.c.bf16 %v1346_v44, %v1346_v44 }
 0x282   : > { %v3954_v46 = vpop.f32.mrf.mxu0 }
 0x283   : > { %1550 = vrot.lane.b32.xlu1 %v1435_v45, %s4390_s2  ;;  %v4243_v46 = vld [vmem:[%s5163_s5 + $0x8] sm:$0xff]  }
 0x284   : > { %v1349_v48 = vpop.f32.mrf.mxu0 }
 0x285   : > { %v4717_v18 = vpack.c.bf16 %v1349_v48, %v1349_v48 }
 0x286   : > { %v3955_v49 = vpop.f32.mrf.mxu0 }
 0x287   : > { %1422 = vperm.xlu1 %4236, %v1420_v47  }
 0x288   : > { %v1409_v51 = vpop.f32.mrf.mxu0 }
 0x289   : > { %v4686_v52 = vpack.c.bf16 %v1409_v51, %v1409_v51 }
 0x28a   : > { %v3962_v53 = vpop.f32.mrf.mxu0 }
 0x28b   : > { %1552 = vrot.lane.b32.xlu0 %v4686_v52, %s4390_s2  ;;  %v1442_v54 = vsel %vm1437_vm3, %v4686_v52, 0  ;;  %1427 = vperm.xlu1 %4236, %v1425_v50  }
 0x28c   : > { %v1412_v55 = vpop.f32.mrf.mxu0  ;;  %3965 = vmatpush3.bf16.xpose.msra.mxu0 %v1442_v54 }
 0x28d   : > { %3976 = vmatprep.subr.bf16.mxu0 %v4387_v17  ;;  %v4710_v14 = vpack.c.bf16 %v1412_v55, %v1412_v55 }
 0x28e   : > { %v3963_v56 = vpop.f32.mrf.mxu0 }
 0x28f   : > { %v1787_v55 = vsel %vm1437_vm3, %v4710_v14, 0 }
 0x293   : > { %3967 = vmatmul.mubr.msk.bf16.vlgmr.msra.gmra.mxu0 %vm1437_vm3, %v1435_v45  ;;  %v4738_v45 = vld [vmem:[%s5163_s5] sm:$0xff]   ;;  %s5168_s5 = scalar_lea.vmem %s5166_s26, %s4579_s18 }
 0x294   : > { %3978 = vmatprep.mubr.msk.bf16.mxu0 %vm4388_vm2, %v4387_v17 }
 0x2f5   : > { %v1551_v59 = vpop.permute.xlu1 %1550 }
 0x2fd   : > { %v1553_v57 = vpop.permute.xlu0 %1552 }
 0x2fe   : > { %v1558_v58 = vsel %vm1437_vm3, %v1553_v57, 0 }
 0x2ff   : > { %3977 = vmatpush3.bf16.xpose.msra.mxu0 %v1558_v58 }
 0x300   : > { %3988 = vmatprep.subr.bf16.mxu0 %v4387_v17 }
 0x302   : > { %v1423_v60 = vpop.permute.xlu1 %1422 }
 0x303   : > { %vm1424_vm4 = vcmp.ge.s32.totalorder %v4702_v62, %v1423_v60 }
 0x306   : > { %3979 = vmatmul.mubr.msk.bf16.vlgmr.msra.gmra.mxu0 %vm1437_vm3, %v1551_v59  ;;  %v1428_v63 = vpop.permute.xlu1 %1427 }
 0x307   : > { %3990 = vmatprep.mubr.msk.bf16.mxu0 %vm4388_vm2, %v4387_v17  ;;  %vm1429_vm5 = vcmp.lt.s32.totalorder %v4702_v62, %v1428_v63  ;;  %3989 = vmatpush3.bf16.msra.mxu0 %v4243_v46 }
 0x308   : > { %vm1430_vm6 = vmand %vm1424_vm4, %vm1429_vm5  ;;  %4000 = vmatprep.subr.bf16.mxu0 %v4387_v17 }
 0x353   : > { %v1478_v0 = vpop.f32.mrf.mxu0 }
 0x354   : > { %v1484_v1 = vsel %vm1430_vm6, %v1478_v0, -1e+30 }
 0x355   : > { %v3968_v4 = vpop.f32.mrf.mxu0  ;;  %v1486_v5 = vsel %vm1485_vm7, %v1484_v1, -inf }
 0x356   : > { %1487 = vmax.xlane.f32.xlu0 %v1486_v5 }
 0x357   : > { %v1481_v6 = vpop.f32.mrf.mxu0 }
 0x359   : > { %v3969_v7 = vpop.f32.mrf.mxu0 }
 0x3c6   : > { %v1594_v8 = vpop.f32.mrf.mxu0 }
 0x3c7   : > { %v1600_v9 = vsel %vm1430_vm6, %v1594_v8, -1e+30 }
 0x3c8   : > { %v3980_v10 = vpop.f32.mrf.mxu0  ;;  %v1601_v11 = vsel %vm1485_vm7, %v1600_v9, -inf }
 0x3c9   : > { %1602 = vmax.xlane.f32.xlu1 %v1601_v11 }
 0x3ca   : > { %v1597_v12 = vpop.f32.mrf.mxu0 }
 0x3cc   : > { %v3981_v13 = vpop.f32.mrf.mxu0 }
 0x3da   : > { %1613 = vrot.lane.b32.xlu1 %v4686_v52, %s4391_s0 }
 0x3de   : > { %1895 = vrot.lane.b32.xlu1 %v4710_v14, %s4390_s2 }
 0x3df   : > { %v1488_v15 = vpop.xlane.xlu0 %1487 }
 0x3e0   : > { %v1489_v19 = vsub.f32 %v1484_v1, %v1488_v15 }
 0x3e2   : > { %v1490_v20 = vmul.f32 1.442695, %v1489_v19  ;;  %1893 = vrot.lane.b32.xlu1 %v4717_v18, %s4390_s2 }
 0x3e4   : > { %4274 = vpow2.f32 %v1490_v20 }
 0x3e6   : > { %1777 = vperm.xlu1 %4236, %v1775_v21  }
 0x3f1   : > { %v4275_v22 = vpop.eup %4274 }
 0x3f2   : > { %v1492_v23 = vsel %vm1485_vm7, %v4275_v22, 0.0 }
 0x3f3   : > { %1493 = vadd.xlane.f32.xlu0 %v1492_v23 }
 0x452   : > { %v1603_v24 = vpop.xlane.xlu1 %1602 }
 0x453   : > { %v1604_v25 = vsub.f32 %v1600_v9, %v1603_v24 }
 0x455   : > { %v1605_v26 = vmul.f32 1.442695, %v1604_v25 }
 0x456   : > { %v1614_v37 = vpop.permute.xlu1 %1613 }
 0x457   : > { %4276 = vpow2.f32 %v1605_v26  ;;  %v1619_v39 = vsel %vm1504_vm8, %v1614_v37, 0 }
 0x45a   : > { %v1896_v58 = vpop.permute.xlu1 %1895 }
 0x45b   : > { %v1901_v59 = vsel %vm1437_vm3, %v1896_v58, 0 }
 0x45e   : > { %v1894_v60 = vpop.permute.xlu1 %1893 }
 0x462   : > { %v1778_v9 = vpop.permute.xlu1 %1777 }
 0x463   : > { %vm1779_vm10 = vcmp.lt.s32.totalorder %v4702_v62, %v1778_v9 }
 0x464   : > { %v4277_v27 = vpop.eup %4276 }
 0x465   : > { %v1607_v28 = vsel %vm1485_vm7, %v4277_v27, 0.0 }
 0x466   : > { %1608 = vadd.xlane.f32.xlu0 %v1607_v28  ;;  %v2092_v28 = vsel %vm2091_vm13, 1, %v4389_v41 }
 0x47c   : > { %1499 = vrot.lane.b32.xlu0 %v4686_v52, %s4392_s15  ;;  %v1494_v31 = vpop.xlane.xlu0 %1493 }
 0x47d   : > { %4278 = vrcp.f32 %v1494_v31 }
 0x480   : > { %1772 = vperm.xlu0 %4237, %v1770_v30  }
 0x48a   : > { %v4279_v32 = vpop.eup %4278 }
 0x48b   : > { %v1496_v34 = vmul.f32 %v4279_v32, %v4275_v22 }
 0x48d   : > { %v1497_v38 = vpack.c.bf16 %v1496_v34, %v1496_v34 }
 0x4ef   : > { %v1609_v33 = vpop.xlane.xlu0 %1608 }
 0x4f0   : > { %4280 = vrcp.f32 %v1609_v33 }
 0x4f3   : > { %v1500_v35 = vpop.permute.xlu0 %1499 }
 0x4f4   : > { %v1506_v36 = vsel %vm1504_vm8, %v1500_v35, 0 }
 0x4f5   : > { %3971 = vmatpush3.bf16.msra.mxu1 %v1506_v36 }
 0x4f6   : > { %3982 = vmatprep.subr.bf16.mxu1 %v4387_v17 }
 0x4f8   : > { %3973 = vmatmul.mubr.msk.bf16.vlgmr.msra.gmra.mxu1 %vm1485_vm7, %v1497_v38 }
 0x4f9   : > { %3983 = vmatpush3.bf16.msra.mxu1 %v1619_v39  ;;  %3984 = vmatprep.mubr.msk.bf16.mxu1 %vm4388_vm2, %v4387_v17 }
 0x4fa   : > { %3994 = vmatprep.subr.bf16.mxu1 %v4387_v17 }
 0x4fb   : > { %v1773_v7 = vpop.permute.xlu0 %1772 }
 0x4fc   : > { %vm1774_vm9 = vcmp.ge.s32.totalorder %v4702_v62, %v1773_v7 }
 0x4fd   : > { %v4281_v40 = vpop.eup %4280  ;;  %vm1780_vm11 = vmand %vm1774_vm9, %vm1779_vm10 }
 0x4fe   : > { %v1611_v43 = vmul.f32 %v4281_v40, %v4277_v27  ;;  %v1761_v27 = vsel %vm1760_vm12, 1, %v4389_v41 }
 0x500   : > { %v1612_v44 = vpack.c.bf16 %v1611_v43, %v1611_v43 }
 0x502   : > { %3985 = vmatmul.mubr.msk.bf16.vlgmr.msra.gmra.mxu1 %vm1485_vm7, %v1612_v44 }
 0x503   : > { %3996 = vmatprep.mubr.msk.bf16.mxu1 %vm4388_vm2, %v4387_v17  ;;  %3995 = vmatpush3.bf16.msra.mxu1 %v4738_v45 }
 0x504   : > { %4006 = vmatprep.subr.bf16.mxu1 %v4387_v17 }
 0x5b8   : > { %v1542_v47 = vpop.f32.mrf.mxu1 }
 0x5b9   : > { %v1548_v48 = vpack.c.bf16 %v1542_v47, %v1542_v47 }
 0x5ba   : > { %v3974_v49 = vpop.f32.mrf.mxu1 }
 0x5bb   : > { %3997 = vmatmul.mubr.msk.bf16.vlgmr.msra.gmra.mxu1 %vm1437_vm3, %v1548_v48 }
 0x5bc   : > { %v1545_v50 = vpop.f32.mrf.mxu1  ;;  %4008 = vmatprep.mubr.msk.bf16.mxu1 %vm4388_vm2, %v4387_v17 }
 0x5be   : > { %v3975_v51 = vpop.f32.mrf.mxu1 }
 0x5c2   : > { %v1655_v52 = vpop.f32.mrf.mxu1 }
 0x5c3   : > { %v1661_v53 = vpack.c.bf16 %v1655_v52, %v1655_v52 }
 0x5c4   : > { %v3986_v54 = vpop.f32.mrf.mxu1 }
 0x5c5   : > { %3991 = vmatmul.mubr.msk.bf16.vlgmr.msra.gmra.mxu0 %vm1437_vm3, %v1661_v53 }
 0x5c6   : > { %4001 = vmatpush3.bf16.xpose.msra.mxu0 %v1787_v55  ;;  %v1658_v56 = vpop.f32.mrf.mxu1  ;;  %4002 = vmatprep.mubr.msk.bf16.mxu0 %vm4388_vm2, %v4387_v17 }
 0x5c7   : > { %4012 = vmatprep.subr.bf16.mxu0 %v4387_v17 }
 0x5c8   : > { %v3987_v57 = vpop.f32.mrf.mxu1 }
 0x5cd   : > { %4003 = vmatmul.mubr.msk.bf16.vlgmr.msra.gmra.mxu0 %vm1437_vm3, %v4717_v18 }
 0x5ce   : > { %4013 = vmatpush3.bf16.xpose.msra.mxu0 %v1901_v59  ;;  %4014 = vmatprep.mubr.msk.bf16.mxu0 %vm4388_vm2, %v4387_v17 }
 0x5cf   : > { %4024 = vmatprep.subr.bf16.mxu0 %v4387_v17 }
 0x5d5   : > { %4015 = vmatmul.mubr.msk.bf16.vlgmr.msra.gmra.mxu0 %vm1437_vm3, %v1894_v60 }
 0x5d6   : > { %4025 = vmatpush3.bf16.msra.mxu0 %v4243_v46  ;;  %4026 = vmatprep.mubr.msk.bf16.mxu0 %vm4388_vm2, %v4387_v17 }
 0x5d7   : > { %4036 = vmatprep.subr.bf16.mxu0 %v4387_v17 }
 0x67b   : > { %v1754_v63 = vpop.f32.mrf.mxu1 }
 0x67d   : > { %v3998_v0 = vpop.f32.mrf.mxu1 }
 0x67f   : > { %v1757_v1 = vpop.f32.mrf.mxu1 }
 0x681   : > { %v3999_v4 = vpop.f32.mrf.mxu1 }
 0x685   : > { %v1705_v5 = vpop.f32.mrf.mxu0 }
 0x686   : > { %v1755_v6 = vadd.f32 %v1754_v63, %v1705_v5 }
 0x687   : > { %v3992_v8 = vpop.f32.mrf.mxu0 }
 0x689   : > { %v1708_v10 = vpop.f32.mrf.mxu0 }
 0x68b   : > { %v3993_v11 = vpop.f32.mrf.mxu0 }
 0x68d   : > { %v1823_v12 = vpop.f32.mrf.mxu0 }
 0x68e   : > { %v1829_v13 = vsel %vm1780_vm11, %v1823_v12, -1e+30 }
 0x68f   : > { %v4004_v15 = vpop.f32.mrf.mxu0  ;;  %v1830_v18 = vsel %vm1485_vm7, %v1829_v13, -inf }
 0x690   : > { %1831 = vmax.xlane.f32.xlu1 %v1830_v18 }
 0x691   : > { %v1826_v19 = vpop.f32.mrf.mxu0 }
 0x693   : > { %v4005_v20 = vpop.f32.mrf.mxu0 }
 0x695   : > { %v1937_v21 = vpop.f32.mrf.mxu0 }
 0x696   : > { %v1943_v22 = vsel %vm1780_vm11, %v1937_v21, -1e+30 }
 0x697   : > { %v4016_v23 = vpop.f32.mrf.mxu0  ;;  %v1944_v24 = vsel %vm1485_vm7, %v1943_v22, -inf }
 0x698   : > { %1945 = vmax.xlane.f32.xlu0 %v1944_v24 }
 0x699   : > { %v1940_v25 = vpop.f32.mrf.mxu0 }
 0x69b   : > { %v4017_v26 = vpop.f32.mrf.mxu0 }
 0x6a1   : > { %1843 = vrot.lane.b32.xlu1 %v4710_v14, %s4392_s15 }
 0x6a5   : > { %1763 = vperm.xlu1 %4236, %v1761_v27  }
 0x6a9   : > { %2094 = vperm.xlu1 %4236, %v2092_v28  }
 0x719   : > { %v1832_v29 = vpop.xlane.xlu1 %1831 }
 0x71a   : > { %v1833_v30 = vsub.f32 %v1829_v13, %v1832_v29 }
 0x71c   : > { %v1834_v42 = vmul.f32 1.442695, %v1833_v30 }
 0x71d   : > { %v1844_v31 = vpop.permute.xlu1 %1843 }
 0x71e   : > { %4282 = vpow2.f32 %v1834_v42  ;;  %v1849_v32 = vsel %vm1504_vm8, %v1844_v31, 0  ;;  %v4244_v31 = vld [vmem:[%s4600_s28 + $0x8] sm:$0xff]  }
 0x71f   : > { %4007 = vmatpush3.bf16.msra.mxu1 %v1849_v32 }
 0x720   : > { %4018 = vmatprep.subr.bf16.mxu1 %v4387_v17 }
 0x721   : > { %v1764_v33 = vpop.permute.xlu1 %1763  ;;  %v1946_v34 = vpop.xlane.xlu0 %1945 }
 0x722   : > { %vm1765_vm14 = vcmp.eq.s32.totalorder %v1764_v33, 1  ;;  %v1947_v35 = vsub.f32 %v1943_v22, %v1946_v34 }
 0x723   : > { %v1766_v36 = vsel %vm1765_vm14, %v1755_v6, 0.0 }
 0x724   : > { %v2099_v37 = vmul.f32 %v2098_v16, %v1766_v36  ;;  %v1948_v38 = vmul.f32 1.442695, %v1947_v35 }
 0x725   : > { %v2095_v6 = vpop.permute.xlu1 %2094 }
 0x726   : > { %v4784_v39 = vadd.f32 %v2099_v37, %v4638_v2  ;;  %4284 = vpow2.f32 %v1948_v38  ;;  %vm2096_vm15 = vcmp.eq.s32.totalorder %v2095_v6, 1 }
 0x728   : > { %v2105_v40 = vsel %vm1248_vm1, %v4784_v39, 0.0 }
 0x729   : > { %2106 = vadd.xlane.f32.xlu1 %v2105_v40 }
 0x72b   : > { %v4283_v43 = vpop.eup %4282 }
 0x72c   : > { %v1836_v44 = vsel %vm1485_vm7, %v4283_v43, 0.0 }
 0x72d   : > { %1837 = vadd.xlane.f32.xlu0 %v1836_v44 }
 0x733   : > { %v4285_v46 = vpop.eup %4284 }
 0x734   : > { %v1950_v47 = vsel %vm1485_vm7, %v4285_v46, 0.0 }
 0x735   : > { %1951 = vadd.xlane.f32.xlu0 %v1950_v47  ;;  %v3799_v47 = vld [vmem:[%s5168_s5] ss:$0 sm:$0xff] }
 0x74b   : > { %1956 = vrot.lane.b32.xlu0 %v4710_v14, %s4391_s0 }
 0x7b2   : > { %v2107_v9 = vpop.xlane.xlu1 %2106 }
 0x7b3   : > { %v2111_v11 = vmul.f32 0.03125, %v2107_v9 }
 0x7b5   : > { %v2113_v19 = vsub.f32 %v4784_v39, %v2111_v11 }
 0x7b6   : > { %v1838_v48 = vpop.xlane.xlu0 %1837 }
 0x7b7   : > { %4286 = vrcp.f32 %v1838_v48  ;;  %v2115_v25 = vmul.f32 %v2113_v19, %v2113_v19 }
 0x7b9   : > { %v2117_v26 = vsel %vm1248_vm1, %v2115_v25, 0.0 }
 0x7be   : > { %v1952_v2 = vpop.xlane.xlu0 %1951 }
 0x7bf   : > { %4288 = vrcp.f32 %v1952_v2 }
 0x7c2   : > { %v1957_v51 = vpop.permute.xlu0 %1956 }
 0x7c3   : > { %v1962_v53 = vsel %vm1504_vm8, %v1957_v51, 0  ;;  %v4246_v51 = vld [vmem:[%s4604_s29 + $0x38] sm:$0xff]  }
 0x7c4   : > { %v4287_v49 = vpop.eup %4286 }
 0x7c5   : > { %v1840_v50 = vmul.f32 %v4287_v49, %v4283_v43 }
 0x7c7   : > { %v1841_v52 = vpack.c.bf16 %v1840_v50, %v1840_v50 }
 0x7c9   : > { %4009 = vmatmul.mubr.msk.bf16.vlgmr.msra.gmra.mxu1 %vm1485_vm7, %v1841_v52  ;;  %v4247_v52 = vld [vmem:[%s4604_s29 + $0x30] sm:$0xff]  }
 0x7ca   : > { %4019 = vmatpush3.bf16.msra.mxu1 %v1962_v53  ;;  %4020 = vmatprep.mubr.msk.bf16.mxu1 %vm4388_vm2, %v4387_v17  ;;  %v4248_v53 = vld [vmem:[%s4604_s29 + $0x28] sm:$0xff]  }
 0x7cb   : > { %4030 = vmatprep.subr.bf16.mxu1 %v4387_v17 }
 0x7cc   : > { %v4289_v54 = vpop.eup %4288 }
 0x7cd   : > { %v1954_v14 = vmul.f32 %v4289_v54, %v4285_v46  ;;  %v4249_v54 = vld [vmem:[%s4604_s29 + $0x20] sm:$0xff]  }
 0x7cf   : > { %v1955_v55 = vpack.c.bf16 %v1954_v14, %v1954_v14  ;;  %v4250_v14 = vld [vmem:[%s4604_s29 + $0x18] sm:$0xff]  }
 0x7d1   : > { %4021 = vmatmul.mubr.msk.bf16.vlgmr.msra.gmra.mxu1 %vm1485_vm7, %v1955_v55  ;;  %v4251_v55 = vld [vmem:[%s4604_s29 + $0x10] sm:$0xff]  }
 0x7d2   : > { %4031 = vmatpush3.bf16.msra.mxu1 %v4738_v45  ;;  %4032 = vmatprep.mubr.msk.bf16.mxu1 %vm4388_vm2, %v4387_v17 }
 0x7d3   : > { %4044 = vmatprep.subr.bf16.mxu1 %v4387_v17 }
 0x889   : > { %v1885_v56 = vpop.f32.mrf.mxu1 }
 0x88a   : > { %v1891_v57 = vpack.c.bf16 %v1885_v56, %v1885_v56  ;;  %v4252_v56 = vld [vmem:[%s4604_s29 + $0x8] sm:$0xff]  }
 0x88b   : > { %v4010_v58 = vpop.f32.mrf.mxu1 }
 0x88c   : > { %4033 = vmatmul.mubr.msk.bf16.vlgmr.msra.gmra.mxu1 %vm1437_vm3, %v1891_v57  ;;  %v4253_v57 = vld [vmem:[%s4604_s29] sm:$0xff]   ;;  %s1244_s29 = sadd.s32 1, %s3772_s21 }
 0x88d   : > { %v1888_v59 = vpop.f32.mrf.mxu1  ;;  %4060 = vmatprep.mubr.msk.bf16.mxu1 %vm4388_vm2, %v4387_v17  ;;  %4045 = vmatpush3.bf16.msra.mxu1 %v4246_v51  ;;  %s1245_s24 = sld [smem:[#allocation3 + %s1244_s29]] }
 0x88e   : > { %4046 = vmatprep.subr.bf16.mxu1 %v4387_v17 }
 0x88f   : > { %v4011_v60 = vpop.f32.mrf.mxu1 }
 0x891   : > { %v1998_v63 = vpop.f32.mrf.mxu1  ;;  %4047 = vmatpush3.bf16.msra.mxu1 %v4247_v52 }
 0x892   : > { %v2004_v0 = vpack.c.bf16 %v1998_v63, %v1998_v63  ;;  %4048 = vmatprep.subr.bf16.mxu1 %v4387_v17 }
 0x893   : > { %v4022_v1 = vpop.f32.mrf.mxu1 }
 0x894   : > { %4027 = vmatmul.mubr.msk.bf16.vlgmr.msra.gmra.mxu0 %vm1437_vm3, %v2004_v0 }
 0x895   : > { %v2001_v45 = vpop.f32.mrf.mxu1  ;;  %4040 = vmatprep.mubr.msk.bf16.mxu0 %vm4388_vm2, %v4387_v17  ;;  %4037 = vmatpush3.bf16.msra.mxu0 %v4244_v31 }
 0x896   : > { %4038 = vmatprep.subr.bf16.mxu0 %v4387_v17  ;;  %4049 = vmatpush3.bf16.msra.mxu1 %v4248_v53  ;;  %v3811_v53 = vld [vmem:[%s1188_s25] ss:$0 sm:$0xff]  ;;  %s4393_s25 = smov 64  }
 0x897   : > { %v4023_v4 = vpop.f32.mrf.mxu1  ;;  %4050 = vmatprep.subr.bf16.mxu1 %v4387_v17 }
 0x89a   : > { %4051 = vmatpush3.bf16.msra.mxu1 %v4249_v54 }
 0x89b   : > { %4052 = vmatprep.subr.bf16.mxu1 %v4387_v17 }
 0x89e   : > { %4053 = vmatpush3.bf16.msra.mxu1 %v4250_v14 }
 0x89f   : > { %4054 = vmatprep.subr.bf16.mxu1 %v4387_v17 }
 0x8a2   : > { %4055 = vmatpush3.bf16.msra.mxu1 %v4251_v55 }
 0x8a3   : > { %4056 = vmatprep.subr.bf16.mxu1 %v4387_v17 }
 0x8a6   : > { %4057 = vmatpush3.bf16.msra.mxu1 %v4252_v56  ;;  %v3812_v56 = vld [vmem:[%s1191_s11] ss:$0 sm:$0xff] }
 0x8a7   : > { %4058 = vmatprep.subr.bf16.mxu1 %v4387_v17 }
 0x8aa   : > { %4059 = vmatpush3.bf16.msra.mxu1 %v4253_v57 }
 0x8ab   : > { %4090 = vmatprep.subr.bf16.mxu1 %v4387_v17 }
 0x94c   : > { %v2085_v5 = vpop.f32.mrf.mxu1 }
 0x94e   : > { %v4034_v7 = vpop.f32.mrf.mxu1 }
 0x950   : > { %v2088_v8 = vpop.f32.mrf.mxu1 }
 0x952   : > { %v4035_v10 = vpop.f32.mrf.mxu1 }
 0x954   : > { %v2042_v12 = vpop.f32.mrf.mxu0 }
 0x955   : > { %v2086_v13 = vadd.f32 %v2085_v5, %v2042_v12 }
 0x956   : > { %v4028_v15 = vpop.f32.mrf.mxu0 }
 0x957   : > { %v2097_v18 = vsel %vm2096_vm15, %v2086_v13, 0.0 }
 0x958   : > { %v2100_v20 = vmul.f32 %v2098_v16, %v2097_v18  ;;  %v2045_v21 = vpop.f32.mrf.mxu0 }
 0x95a   : > { %v4029_v22 = vpop.f32.mrf.mxu0  ;;  %v4812_v23 = vadd.f32 %v2100_v20, %v4640_v3  ;;  %v4245_v3 = vld [vmem:[%s4600_s28] sm:$0xff]   ;;  %s5167_s28 = scalar_lea.vmem %s5165_s23, %s4579_s18 }
 0x95b   : > { %4039 = vmatpush3.bf16.msra.mxu0 %v4245_v3  ;;  %v3798_v40 = vld [vmem:[%s5167_s28] ss:$0 sm:$0xff] }
 0x95c   : > { %v2108_v24 = vsel %vm1248_vm1, %v4812_v23, 0.0  ;;  %4064 = vmatprep.subr.bf16.mxu0 %v4387_v17 }
 0x95d   : > { %2109 = vadd.xlane.f32.xlu0 %v2108_v24  ;;  %v2332_v24 = vstv %s1245_s24 }
 0x961   : > { %2118 = vadd.xlane.f32.xlu0 %v2117_v26 }
 0x9e6   : > { %v2110_v27 = vpop.xlane.xlu0 %2109 }
 0x9e7   : > { %v2112_v28 = vmul.f32 0.03125, %v2110_v27 }
 0x9e9   : > { %v2114_v29 = vsub.f32 %v4812_v23, %v2112_v28 }
 0x9ea   : > { %v2119_v32 = vpop.xlane.xlu0 %2118 }
 0x9eb   : > { %v2116_v30 = vmul.f32 %v2114_v29, %v2114_v29  ;;  %v2123_v16 = vmul.f32 0.03125, %v2119_v32 }
 0x9ed   : > { %v2120_v42 = vsel %vm1248_vm1, %v2116_v30, 0.0  ;;  %v2125_v33 = vadd.f32 1e-05, %v2123_v16 }
 0x9ee   : > { %2121 = vadd.xlane.f32.xlu0 %v2120_v42 }
 0x9ef   : > { %4290 = vrsqrt.f32 %v2125_v33 }
 0x9fc   : > { %v4291_v37 = vpop.eup %4290 }
 0x9fd   : > { %v2129_v38 = vmul.f32 %v4291_v37, %v2113_v19 }
 0x9ff   : > { %v2137_v46 = vmul.f32 %v3798_v40, %v2129_v38 }
 0xa01   : > { %v2145_v2 = vadd.f32 %v3799_v47, %v2137_v46 }
 0xa77   : > { %v2122_v34 = vpop.xlane.xlu0 %2121 }
 0xa78   : > { %v2124_v35 = vmul.f32 0.03125, %v2122_v34 }
 0xa7a   : > { %v2126_v36 = vadd.f32 1e-05, %v2124_v35 }
 0xa7c   : > { %4292 = vrsqrt.f32 %v2126_v36 }
 0xa89   : > { %v4293_v43 = vpop.eup %4292 }
 0xa8a   : > { %v2130_v44 = vmul.f32 %v4293_v43, %v2114_v29  ;;  %v4254_v43 = vld [vmem:[%s4611_s19 + $0x8] sm:$0xff]  }
 0xa8c   : > { %v2138_v48 = vmul.f32 %v3798_v40, %v2130_v44  ;;  %v4255_v44 = vld [vmem:[%s4611_s19] sm:$0xff]   ;;  %s5169_s19 = sld [smem:[#allocation9_spill]] }
 0xa8e   : > { %v2146_v49 = vadd.f32 %v3799_v47, %v2138_v48 }
 0xa90   : > { %v2147_v50 = vpack.c.bf16 %v2146_v49, %v2145_v2 }
 0xa92   : > { %4041 = vmatmul.mubr.msk.bf16.vlgmr.msra.gmra.mxu0 %vm1248_vm1, %v2147_v50 }
 0xa93   : > { %4068 = vmatprep.mubr.msk.bf16.mxu0 %vm4388_vm2, %v4387_v17  ;;  %4065 = vmatpush3.bf16.msra.mxu0 %v4254_v43 }
 0xa94   : > { %4066 = vmatprep.subr.bf16.mxu0 %v4387_v17 }
 0xa97   : > { %4067 = vmatpush3.bf16.msra.mxu0 %v4255_v44 }
 0xa98   : > { %4072 = vmatprep.subr.bf16.mxu0 %v4387_v17 }
 0xb52   : > { %v2201_v58 = vpop.f32.mrf.mxu0 }
 0xb53   : > { %v2210_v59 = vmul.f32 0.044715, %v2201_v58  ;;  %v2208_v15 = vmul.f32 0.5, %v2201_v58 }
 0xb54   : > { %v4042_v60 = vpop.f32.mrf.mxu0 }
 0xb55   : > { %v2212_v63 = vmul.f32 %v2210_v59, %v2201_v58 }
 0xb56   : > { %v2204_v0 = vpop.f32.mrf.mxu0 }
 0xb57   : > { %v2214_v1 = vmul.f32 %v2212_v63, %v2201_v58  ;;  %v2211_v45 = vmul.f32 0.044715, %v2204_v0  ;;  %v2209_v18 = vmul.f32 0.5, %v2204_v0  ;;  %v3813_v63 = vld [vmem:[%s1199_s3] ss:$0 sm:$0xff]  ;;  %s4394_s3 = smov 48  }
 0xb58   : > { %v4043_v4 = vpop.f32.mrf.mxu0 }
 0xb59   : > { %v2216_v5 = vadd.f32 %v2214_v1, %v2201_v58  ;;  %v2213_v6 = vmul.f32 %v2211_v45, %v2204_v0 }
 0xb5b   : > { %v2218_v7 = vmul.f32 0.7978846, %v2216_v5  ;;  %v2215_v8 = vmul.f32 %v2213_v6, %v2204_v0 }
 0xb5d   : > { %4294 = vtanh.f32 %v2218_v7  ;;  %v2217_v9 = vadd.f32 %v2215_v8, %v2204_v0 }
 0xb5f   : > { %v2219_v10 = vmul.f32 0.7978846, %v2217_v9 }
 0xb61   : > { %4296 = vtanh.f32 %v2219_v10  ;;  %v2452_v10 = vld [vmem:[%s5169_s19] sm:$0x1] }
 0xb62   : > { %vm2453_vm0 = vcmp.gt.s32.totalorder %v2452_v10, 0 }
 0xb6a   : > { %v4295_v11 = vpop.eup %4294 }
 0xb6b   : > { %v2222_v12 = vadd.f32 1.0, %v4295_v11  ;;  %v4900_v11 = vshrl.u32 %v1416_v61, 7 }
 0xb6d   : > { %v2224_v20 = vmul.f32 %v2222_v12, %v2208_v15  ;;  %v2457_v12 = vsub.s32 0, %v4900_v11  ;;  %vm2451_vm4 = vcmp.ge.s32.totalorder %v4900_v11, %v4702_v62 }
 0xb6e   : > { %v4297_v13 = vpop.eup %4296 }
 0xb6f   : > { %v2223_v19 = vadd.f32 1.0, %v4297_v13  ;;  %v2454_v13 = vsel %vm2453_vm0, 1, %v4389_v41 }
 0xb70   : > { %v2458_v15 = vrot.slane %v2454_v13, %v2457_v12 }
 0xb71   : > { %v2225_v21 = vmul.f32 %v2223_v19, %v2209_v18 }
 0xb72   : > { %vm2459_vm5 = vcmp.eq.s32.totalorder %v2458_v15, 1 }
 0xb73   : > { %v2226_v22 = vpack.c.bf16 %v2225_v21, %v2224_v20  ;;  %vm4911_vm6 = vmand %vm2451_vm4, %vm2459_vm5 }
 0xb75   : > { %4061 = vmatmul.mubr.bf16.vlgmr.msra.gmra.mxu1 %v2226_v22 }
 0xb76   : > { %4092 = vmatprep.mubr.msk.bf16.mxu1 %vm4388_vm2, %v4387_v17 }
 0xc35   : > { %v2325_v25 = vpop.f32.mrf.mxu1 }
 0xc36   : > { %v2333_v26 = vmul.f32 %v2332_v24, %v2325_v25 }
 0xc37   : > { %v4062_v27 = vpop.f32.mrf.mxu1 }
 0xc38   : > { %v4853_v28 = vadd.f32 %v2333_v26, %v4784_v39 }
 0xc39   : > { %v2328_v29 = vpop.f32.mrf.mxu1 }
 0xc3a   : > { %v2334_v30 = vmul.f32 %v2332_v24, %v2328_v29  ;;  %v2339_v42 = vsel %vm1248_vm1, %v4853_v28, 0.0 }
 0xc3b   : > { %2340 = vadd.xlane.f32.xlu1 %v2339_v42  ;;  %v4063_v31 = vpop.f32.mrf.mxu1 }
 0xc3c   : > { %v4858_v3 = vadd.f32 %v2334_v30, %v4812_v23 }
 0xc3e   : > { %v2342_v32 = vsel %vm1248_vm1, %v4858_v3, 0.0 }
 0xc3f   : > { %2343 = vadd.xlane.f32.xlu0 %v2342_v32 }
 0xcc4   : > { %v2341_v16 = vpop.xlane.xlu1 %2340 }
 0xcc5   : > { %v2345_v33 = vmul.f32 0.03125, %v2341_v16 }
 0xcc7   : > { %v2347_v39 = vsub.f32 %v4853_v28, %v2345_v33 }
 0xcc8   : > { %v2344_v34 = vpop.xlane.xlu0 %2343 }
 0xcc9   : > { %v2346_v35 = vmul.f32 0.03125, %v2344_v34  ;;  %v2349_v36 = vmul.f32 %v2347_v39, %v2347_v39 }
 0xccb   : > { %v2348_v37 = vsub.f32 %v4858_v3, %v2346_v35  ;;  %v2351_v38 = vsel %vm1248_vm1, %v2349_v36, 0.0 }
 0xccc   : > { %2352 = vadd.xlane.f32.xlu1 %v2351_v38 }
 0xccd   : > { %v2350_v40 = vmul.f32 %v2348_v37, %v2348_v37 }
 0xccf   : > { %v2354_v23 = vsel %vm1248_vm1, %v2350_v40, 0.0 }
 0xcd0   : > { %2355 = vadd.xlane.f32.xlu0 %v2354_v23 }
 0xd55   : > { %v2353_v46 = vpop.xlane.xlu1 %2352 }
 0xd56   : > { %v2357_v47 = vmul.f32 0.03125, %v2353_v46 }
 0xd58   : > { %v2359_v48 = vadd.f32 1e-05, %v2357_v47 }
 0xd59   : > { %v2356_v2 = vpop.xlane.xlu0 %2355 }
 0xd5a   : > { %4298 = vrsqrt.f32 %v2359_v48  ;;  %v2358_v49 = vmul.f32 0.03125, %v2356_v2 }
 0xd5c   : > { %v2360_v50 = vadd.f32 1e-05, %v2358_v49 }
 0xd5e   : > { %4300 = vrsqrt.f32 %v2360_v50 }
 0xd67   : > { %v4299_v51 = vpop.eup %4298 }
 0xd68   : > { %v2363_v52 = vmul.f32 %v4299_v51, %v2347_v39 }
 0xd6a   : > { %v2371_v55 = vmul.f32 %v3811_v53, %v2363_v52 }
 0xd6b   : > { %v4301_v54 = vpop.eup %4300 }
 0xd6c   : > { %v2364_v14 = vmul.f32 %v4301_v54, %v2348_v37  ;;  %v2379_v58 = vadd.f32 %v3812_v56, %v2371_v55 }
 0xd6e   : > { %v2372_v57 = vmul.f32 %v3811_v53, %v2364_v14 }
 0xd70   : > { %v2380_v59 = vadd.f32 %v3812_v56, %v2372_v57  ;;  %v4257_v56 = vld [vmem:[%s4616_s16 + $0x8] sm:$0xff]  }
 0xd72   : > { %v2381_v60 = vpack.c.bf16 %v2380_v59, %v2379_v58 }
 0xd74   : > { %4069 = vmatmul.mubr.msk.bf16.vlgmr.msra.gmra.mxu0 %vm1248_vm1, %v2381_v60  ;;  %v4952_v60 = vld [vmem:[%s4616_s16] sm:$0xff]  }
 0xd75   : > { %4074 = vmatprep.mubr.msk.bf16.mxu0 %vm4388_vm2, %v4387_v17 }
 0xe34   : > { %v2442_v0 = vpop.f32.mrf.mxu0 }
 0xe35   : > { %v2443_v1 = vadd.f32 %v3813_v63, %v2442_v0 }
 0xe36   : > { %v4070_v45 = vpop.f32.mrf.mxu0 }
 0xe37   : > { %v4882_v4 = vpack.c.bf16 %v2443_v1, %v2443_v1 }
 0xe38   : > { %v2445_v5 = vpop.f32.mrf.mxu0 }
 0xe39   : > { %v4884_v6 = vadd.f32 %v3813_v63, %v2445_v5  ;;  %2467 = vrot.lane.b32.xlu1 %v4882_v4, %s4392_s15 }
 0xe3a   : > { %v4071_v7 = vpop.f32.mrf.mxu0 }
 0xe3b   : > { %v4938_v49 = vpack.c.bf16 %v4884_v6, %v4884_v6 }
 0xe3d   : > { %2579 = vrot.lane.b32.xlu1 %v4882_v4, %s4391_s0 }
 0xe41   : > { %2577 = vrot.lane.b32.xlu1 %v4882_v4, %s4390_s2 }
 0xeab   : > { %v2468_v8 = vpop.permute.xlu1 %2467 }
 0xeac   : > { %v2473_v9 = vsel %vm1437_vm3, %v2468_v8, 0 }
 0xead   : > { %4073 = vmatpush3.bf16.xpose.msra.mxu0 %v2473_v9 }
 0xeae   : > { %4078 = vmatprep.subr.bf16.mxu0 %v4387_v17 }
 0xeaf   : > { %v2580_v39 = vpop.permute.xlu1 %2579 }
 0xeb0   : > { %v2585_v35 = vsel %vm1437_vm3, %v2580_v39, 0 }
 0xeb3   : > { %v2578_v36 = vpop.permute.xlu1 %2577 }
 0xeb4   : > { %4075 = vmatmul.mubr.msk.bf16.vlgmr.msra.gmra.mxu0 %vm1437_vm3, %v4882_v4 }
 0xeb5   : > { %4080 = vmatprep.mubr.msk.bf16.mxu0 %vm4388_vm2, %v4387_v17 }
 0xf74   : > { %v2509_v61 = vpop.f32.mrf.mxu0 }
 0xf75   : > { %v2515_v19 = vsel %vm4911_vm6, %v2509_v61, -1e+30 }
 0xf76   : > { %v4076_v20 = vpop.f32.mrf.mxu0  ;;  %v2516_v21 = vsel %vm1485_vm7, %v2515_v19, -inf }
 0xf77   : > { %2517 = vmax.xlane.f32.xlu0 %v2516_v21  ;;  %v3825_v20 = vld [vmem:[%s5169_s19 + $0x1] sm:$0x1] }
 0xf78   : > { %v2512_v22 = vpop.f32.mrf.mxu0  ;;  %vm2789_vm9 = vcmp.gt.s32.totalorder %v3825_v20, 0 }
 0xf79   : > { %v2790_v21 = vsel %vm2789_vm9, 1, %v4389_v41 }
 0xf7a   : > { %v4077_v24 = vpop.f32.mrf.mxu0  ;;  %v2794_v22 = vrot.slane %v2790_v21, %v2457_v12 }
 0xf7c   : > { %vm2795_vm10 = vcmp.eq.s32.totalorder %v2794_v22, 1 }
 0xf7d   : > { %vm2796_vm11 = vmand %vm2451_vm4, %vm2795_vm10 }
0x1000   : > { %v2518_v25 = vpop.xlane.xlu0 %2517 }
0x1001   : > { %v2519_v26 = vsub.f32 %v2515_v19, %v2518_v25 }
0x1003   : > { %v2520_v27 = vmul.f32 1.442695, %v2519_v26 }
0x1005   : > { %4302 = vpow2.f32 %v2520_v27 }
0x1012   : > { %v4303_v29 = vpop.eup %4302 }
0x1013   : > { %v2522_v30 = vsel %vm1485_vm7, %v4303_v29, 0.0 }
0x1014   : > { %2523 = vadd.xlane.f32.xlu0 %v2522_v30 }
0x102a   : > { %2528 = vrot.lane.b32.xlu0 %v4882_v4, %s4393_s25 }
0x109d   : > { %v2524_v42 = vpop.xlane.xlu0 %2523 }
0x109e   : > { %4304 = vrcp.f32 %v2524_v42 }
0x10a1   : > { %v2529_v31 = vpop.permute.xlu0 %2528 }
0x10a2   : > { %v2534_v32 = vsel %vm1504_vm8, %v2529_v31, 0 }
0x10a3   : > { %4079 = vmatpush3.bf16.msra.mxu0 %v2534_v32 }
0x10a4   : > { %4084 = vmatprep.subr.bf16.mxu0 %v4387_v17 }
0x10ab   : > { %v4305_v16 = vpop.eup %4304 }
0x10ac   : > { %v2526_v33 = vmul.f32 %v4305_v16, %v4303_v29 }
0x10ae   : > { %v2527_v34 = vpack.c.bf16 %v2526_v33, %v2526_v33 }
0x10b0   : > { %4081 = vmatmul.mubr.msk.bf16.vlgmr.msra.gmra.mxu0 %vm1485_vm7, %v2527_v34 }
0x10b1   : > { %4085 = vmatpush3.bf16.xpose.msra.mxu0 %v2585_v35  ;;  %4086 = vmatprep.mubr.msk.bf16.mxu0 %vm4388_vm2, %v4387_v17 }
0x10b2   : > { %4096 = vmatprep.subr.bf16.mxu0 %v4387_v17 }
0x10b8   : > { %4087 = vmatmul.mubr.msk.bf16.vlgmr.msra.gmra.mxu0 %vm1437_vm3, %v2578_v36  ;;  %v4992_v36 = vld [vmem:[%s1207_s8] ss:$0 sm:$0xff] }
0x10b9   : > { %4098 = vmatprep.mubr.msk.bf16.mxu0 %vm4388_vm2, %v4387_v17  ;;  %4097 = vmatpush3.bf16.msra.mxu0 %v4257_v56 }
0x10ba   : > { %4108 = vmatprep.subr.bf16.mxu0 %v4387_v17 }
0x1170   : > { %v2570_v37 = vpop.f32.mrf.mxu0 }
0x1171   : > { %v2576_v0 = vpack.c.bf16 %v2570_v37, %v2570_v37 }
0x1172   : > { %v4082_v38 = vpop.f32.mrf.mxu0 }
0x1174   : > { %v2573_v40 = vpop.f32.mrf.mxu0 }
0x1176   : > { %v4083_v23 = vpop.f32.mrf.mxu0 }
0x1178   : > { %v2621_v43 = vpop.f32.mrf.mxu0 }
0x1179   : > { %v2627_v44 = vsel %vm4911_vm6, %v2621_v43, -1e+30 }
0x117a   : > { %v4088_v46 = vpop.f32.mrf.mxu0  ;;  %v2628_v47 = vsel %vm1485_vm7, %v2627_v44, -inf }
0x117b   : > { %2629 = vmax.xlane.f32.xlu1 %v2628_v47 }
0x117c   : > { %v2624_v48 = vpop.f32.mrf.mxu0 }
0x117e   : > { %v4089_v2 = vpop.f32.mrf.mxu0 }
0x118c   : > { %2640 = vrot.lane.b32.xlu1 %v4882_v4, %s4394_s3 }
0x1190   : > { %2911 = vrot.lane.b32.xlu1 %v4938_v49, %s4391_s0 }
0x1194   : > { %2909 = vrot.lane.b32.xlu1 %v4938_v49, %s4390_s2 }
0x1204   : > { %v2630_v50 = vpop.xlane.xlu1 %2629 }
0x1205   : > { %v2631_v51 = vsub.f32 %v2627_v44, %v2630_v50 }
0x1207   : > { %v2632_v52 = vmul.f32 1.442695, %v2631_v51 }
0x1208   : > { %v2641_v53 = vpop.permute.xlu1 %2640 }
0x1209   : > { %4306 = vpow2.f32 %v2632_v52  ;;  %v2646_v54 = vsel %vm1504_vm8, %v2641_v53, 0 }
0x120a   : > { %4091 = vmatpush3.bf16.msra.mxu1 %v2646_v54 }
0x120b   : > { %4102 = vmatprep.subr.bf16.mxu1 %v4387_v17 }
0x120c   : > { %v2912_v9 = vpop.permute.xlu1 %2911 }
0x120d   : > { %v2917_v15 = vsel %vm1437_vm3, %v2912_v9, 0 }
0x1210   : > { %v2910_v19 = vpop.permute.xlu1 %2909 }
0x1216   : > { %v4307_v14 = vpop.eup %4306 }
0x1217   : > { %v2634_v55 = vsel %vm1485_vm7, %v4307_v14, 0.0 }
0x1218   : > { %2635 = vadd.xlane.f32.xlu0 %v2634_v55 }
0x122e   : > { %2799 = vrot.lane.b32.xlu0 %v4938_v49, %s4392_s15 }
0x12a1   : > { %v2636_v57 = vpop.xlane.xlu0 %2635 }
0x12a2   : > { %4308 = vrcp.f32 %v2636_v57 }
0x12a5   : > { %v2800_v1 = vpop.permute.xlu0 %2799 }
0x12a6   : > { %v2805_v6 = vsel %vm1437_vm3, %v2800_v1, 0 }
0x12af   : > { %v4309_v58 = vpop.eup %4308 }
0x12b0   : > { %v2638_v59 = vmul.f32 %v4309_v58, %v4307_v14 }
0x12b2   : > { %v2639_v63 = vpack.c.bf16 %v2638_v59, %v2638_v59 }
0x12b4   : > { %4093 = vmatmul.mubr.msk.bf16.vlgmr.msra.gmra.mxu1 %vm1485_vm7, %v2639_v63 }
0x12b5   : > { %4103 = vmatpush3.bf16.msra.mxu1 %v4952_v60  ;;  %4104 = vmatprep.mubr.msk.bf16.mxu1 %vm4388_vm2, %v4387_v17 }
0x12b6   : > { %4114 = vmatprep.subr.bf16.mxu1 %v4387_v17 }
0x12bc   : > { %4105 = vmatmul.mubr.msk.bf16.vlgmr.msra.gmra.mxu1 %vm1437_vm3, %v2576_v0 }
0x12bd   : > { %4116 = vmatprep.mubr.msk.bf16.mxu1 %vm4388_vm2, %v4387_v17 }
0x1374   : > { %v2682_v45 = vpop.f32.mrf.mxu1 }
0x1375   : > { %v2688_v4 = vpack.c.bf16 %v2682_v45, %v2682_v45 }
0x1376   : > { %v4094_v5 = vpop.f32.mrf.mxu1 }
0x1377   : > { %4099 = vmatmul.mubr.msk.bf16.vlgmr.msra.gmra.mxu0 %vm1437_vm3, %v2688_v4 }
0x1378   : > { %4109 = vmatpush3.bf16.xpose.msra.mxu0 %v2805_v6  ;;  %v2685_v7 = vpop.f32.mrf.mxu1  ;;  %4110 = vmatprep.mubr.msk.bf16.mxu0 %vm4388_vm2, %v4387_v17 }
0x1379   : > { %4120 = vmatprep.subr.bf16.mxu0 %v4387_v17 }
0x137a   : > { %v4095_v8 = vpop.f32.mrf.mxu1 }
0x137c   : > { %v2781_v10 = vpop.f32.mrf.mxu1 }
0x137e   : > { %v4106_v13 = vpop.f32.mrf.mxu1 }
0x137f   : > { %4111 = vmatmul.mubr.msk.bf16.vlgmr.msra.gmra.mxu0 %vm1437_vm3, %v4938_v49 }
0x1380   : > { %4121 = vmatpush3.bf16.xpose.msra.mxu0 %v2917_v15  ;;  %v2784_v18 = vpop.f32.mrf.mxu1  ;;  %4122 = vmatprep.mubr.msk.bf16.mxu0 %vm4388_vm2, %v4387_v17 }
0x1381   : > { %4132 = vmatprep.subr.bf16.mxu0 %v4387_v17 }
0x1382   : > { %v4107_v61 = vpop.f32.mrf.mxu1 }
0x1387   : > { %4123 = vmatmul.mubr.msk.bf16.vlgmr.msra.gmra.mxu0 %vm1437_vm3, %v2910_v19 }
0x1388   : > { %4133 = vmatpush3.bf16.msra.mxu0 %v4257_v56  ;;  %4134 = vmatprep.mubr.msk.bf16.mxu0 %vm4388_vm2, %v4387_v17 }
0x1389   : > { %4144 = vmatprep.subr.bf16.mxu0 %v4387_v17 }
0x1437   : > { %v2732_v24 = vpop.f32.mrf.mxu0 }
0x1438   : > { %v2782_v62 = vadd.f32 %v2781_v10, %v2732_v24 }
0x1439   : > { %v4100_v25 = vpop.f32.mrf.mxu0 }
0x143a   : > { %v3107_v11 = vadd.f32 %v2782_v62, %v4853_v28 }
0x143b   : > { %v2735_v26 = vpop.f32.mrf.mxu0 }
0x143c   : > { %v4995_v37 = vadd.f32 %v4992_v36, %v3107_v11 }
0x143d   : > { %v4101_v27 = vpop.f32.mrf.mxu0 }
0x143e   : > { %v3120_v38 = vsel %vm1248_vm1, %v4995_v37, 0.0 }
0x143f   : > { %v2841_v29 = vpop.f32.mrf.mxu0 }
0x1440   : > { %v2847_v30 = vsel %vm2796_vm11, %v2841_v29, -1e+30 }
0x1441   : > { %v4112_v42 = vpop.f32.mrf.mxu0  ;;  %v2848_v31 = vsel %vm1485_vm7, %v2847_v30, -inf }
0x1442   : > { %2849 = vmax.xlane.f32.xlu1 %v2848_v31 }
0x1443   : > { %v2844_v41 = vpop.f32.mrf.mxu0 }
0x1445   : > { %v4113_v32 = vpop.f32.mrf.mxu0 }
0x1447   : > { %v2953_v12 = vpop.f32.mrf.mxu0 }
0x1448   : > { %v2959_v16 = vsel %vm2796_vm11, %v2953_v12, -1e+30 }
0x1449   : > { %v4124_v33 = vpop.f32.mrf.mxu0  ;;  %v2960_v39 = vsel %vm1485_vm7, %v2959_v16, -inf }
0x144a   : > { %2961 = vmax.xlane.f32.xlu0 %v2960_v39  ;;  %v4258_v39 = vld [vmem:[%s4625_s14 + $0x8] sm:$0xff]  }
0x144b   : > { %v2956_v34 = vpop.f32.mrf.mxu0 }
0x144d   : > { %v4125_v35 = vpop.f32.mrf.mxu0 }
0x1453   : > { %2860 = vrot.lane.b32.xlu1 %v4938_v49, %s4393_s25 }
0x1477   : > { %3121 = vadd.xlane.f32.xlu1 %v3120_v38 }
0x14cb   : > { %v2850_v40 = vpop.xlane.xlu1 %2849 }
0x14cc   : > { %v2851_v23 = vsub.f32 %v2847_v30, %v2850_v40 }
0x14ce   : > { %v2852_v43 = vmul.f32 1.442695, %v2851_v23 }
0x14cf   : > { %v2861_v44 = vpop.permute.xlu1 %2860 }
0x14d0   : > { %4310 = vpow2.f32 %v2852_v43  ;;  %v2866_v46 = vsel %vm1504_vm8, %v2861_v44, 0  ;;  %v3833_v43 = vld [vmem:[%s1210_s7] ss:$0 sm:$0xff]  ;;  %s5179_s7 = sld [smem:[#allocation29_spill]] }
0x14d1   : > { %4115 = vmatpush3.bf16.msra.mxu1 %v2866_v46 }
0x14d2   : > { %4126 = vmatprep.subr.bf16.mxu1 %v4387_v17 }
0x14d3   : > { %v2962_v28 = vpop.xlane.xlu0 %2961 }
0x14d4   : > { %v2963_v47 = vsub.f32 %v2959_v16, %v2962_v28 }
0x14d6   : > { %v2964_v48 = vmul.f32 1.442695, %v2963_v47  ;;  %v3834_v47 = vld [vmem:[%s1213_s10] ss:$0 sm:$0xff]  ;;  %s5180_s10 = sld [smem:[#allocation31_spill]] }
0x14d8   : > { %4312 = vpow2.f32 %v2964_v48 }
0x14dd   : > { %v4311_v2 = vpop.eup %4310 }
0x14de   : > { %v2854_v50 = vsel %vm1485_vm7, %v4311_v2, 0.0 }
0x14df   : > { %2855 = vadd.xlane.f32.xlu0 %v2854_v50 }
0x14e5   : > { %v4313_v51 = vpop.eup %4312 }
0x14e6   : > { %v2966_v52 = vsel %vm1485_vm7, %v4313_v51, 0.0 }
0x14e7   : > { %2967 = vadd.xlane.f32.xlu0 %v2966_v52  ;;  %v4260_v52 = vld [vmem:[%s4630_s17 + $0x38] sm:$0xff]  }
0x14fd   : > { %2972 = vrot.lane.b32.xlu0 %v4938_v49, %s4394_s3 }
0x1500   : > { %v3122_v53 = vpop.xlane.xlu1 %3121 }
0x1501   : > { %v3126_v54 = vmul.f32 0.03125, %v3122_v53  ;;  %v4261_v53 = vld [vmem:[%s4630_s17 + $0x30] sm:$0xff]  }
0x1503   : > { %v5006_v14 = vsub.f32 %v4995_v37, %v3126_v54  ;;  %v4262_v54 = vld [vmem:[%s4630_s17 + $0x28] sm:$0xff]  }
0x1505   : > { %v3130_v55 = vmul.f32 %v5006_v14, %v5006_v14 }
0x1507   : > { %v3132_v56 = vsel %vm1248_vm1, %v3130_v55, 0.0  ;;  %v4264_v55 = vld [vmem:[%s4630_s17 + $0x18] sm:$0xff]  }
0x1508   : > { %3133 = vadd.xlane.f32.xlu1 %v3132_v56  ;;  %v4265_v56 = vld [vmem:[%s4630_s17 + $0x10] sm:$0xff]  }
0x1568   : > { %v2856_v57 = vpop.xlane.xlu0 %2855 }
0x1569   : > { %4314 = vrcp.f32 %v2856_v57  ;;  %v4266_v57 = vld [vmem:[%s4630_s17 + $0x8] sm:$0xff]  }
0x1570   : > { %v2968_v58 = vpop.xlane.xlu0 %2967 }
0x1571   : > { %4316 = vrcp.f32 %v2968_v58  ;;  %v4267_v58 = vld [vmem:[%s4630_s17] sm:$0xff]  }
0x1574   : > { %v2973_v0 = vpop.permute.xlu0 %2972 }
0x1575   : > { %v2978_v49 = vsel %vm1504_vm8, %v2973_v0, 0 }
0x1576   : > { %v4315_v59 = vpop.eup %4314 }
0x1577   : > { %v2858_v63 = vmul.f32 %v4315_v59, %v4311_v2  ;;  %v3835_v59 = vld [vmem:[%s1221_s13] ss:$0 sm:$0xff]  ;;  %s5177_s13 = sld [smem:[#allocation30_spill]] }
0x1579   : > { %v2859_v1 = vpack.c.bf16 %v2858_v63, %v2858_v63 }
0x157b   : > { %4117 = vmatmul.mubr.msk.bf16.vlgmr.msra.gmra.mxu1 %vm1485_vm7, %v2859_v1 }
0x157c   : > { %4127 = vmatpush3.bf16.msra.mxu1 %v2978_v49  ;;  %4128 = vmatprep.mubr.msk.bf16.mxu1 %vm4388_vm2, %v4387_v17 }
0x157d   : > { %4138 = vmatprep.subr.bf16.mxu1 %v4387_v17 }
0x157e   : > { %v4317_v45 = vpop.eup %4316 }
0x157f   : > { %v2970_v4 = vmul.f32 %v4317_v45, %v4313_v51 }
0x1581   : > { %v2971_v5 = vpack.c.bf16 %v2970_v4, %v2970_v4 }
0x1583   : > { %4129 = vmatmul.mubr.msk.bf16.vlgmr.msra.gmra.mxu1 %vm1485_vm7, %v2971_v5 }
0x1584   : > { %4139 = vmatpush3.bf16.msra.mxu1 %v4952_v60  ;;  %4140 = vmatprep.mubr.msk.bf16.mxu1 %vm4388_vm2, %v4387_v17 }
0x1585   : > { %4152 = vmatprep.subr.bf16.mxu1 %v4387_v17 }
0x1591   : > { %v3134_v34 = vpop.xlane.xlu1 %3133 }
0x1592   : > { %v3138_v35 = vmul.f32 0.03125, %v3134_v34 }
0x1594   : > { %v3140_v62 = vadd.f32 1e-05, %v3138_v35 }
0x1596   : > { %4318 = vrsqrt.f32 %v3140_v62 }
0x15a3   : > { %v4319_v40 = vpop.eup %4318 }
0x15a4   : > { %v3144_v23 = vmul.f32 %v4319_v40, %v5006_v14  ;;  %v4263_v14 = vld [vmem:[%s4630_s17 + $0x20] sm:$0xff]  }
0x15a6   : > { %v3152_v28 = vmul.f32 %v3833_v43, %v3144_v23 }
0x15a8   : > { %v3160_v2 = vadd.f32 %v3834_v47, %v3152_v28 }
0x163b   : > { %v2902_v6 = vpop.f32.mrf.mxu1 }
0x163c   : > { %v2908_v7 = vpack.c.bf16 %v2902_v6, %v2902_v6 }
0x163d   : > { %v4118_v8 = vpop.f32.mrf.mxu1 }
0x163e   : > { %4141 = vmatmul.mubr.msk.bf16.vlgmr.msra.gmra.mxu1 %vm1437_vm3, %v2908_v7 }
0x163f   : > { %v2905_v9 = vpop.f32.mrf.mxu1  ;;  %4168 = vmatprep.mubr.msk.bf16.mxu1 %vm4388_vm2, %v4387_v17  ;;  %4153 = vmatpush3.bf16.msra.mxu1 %v4260_v52 }
0x1640   : > { %4154 = vmatprep.subr.bf16.mxu1 %v4387_v17 }
0x1641   : > { %v4119_v10 = vpop.f32.mrf.mxu1 }
0x1643   : > { %v3014_v13 = vpop.f32.mrf.mxu1  ;;  %4155 = vmatpush3.bf16.msra.mxu1 %v4261_v53 }
0x1644   : > { %v3020_v15 = vpack.c.bf16 %v3014_v13, %v3014_v13  ;;  %4156 = vmatprep.subr.bf16.mxu1 %v4387_v17 }
0x1645   : > { %v4130_v18 = vpop.f32.mrf.mxu1 }
0x1646   : > { %4135 = vmatmul.mubr.msk.bf16.vlgmr.msra.gmra.mxu0 %vm1437_vm3, %v3020_v15 }
0x1647   : > { %v3017_v60 = vpop.f32.mrf.mxu1  ;;  %4148 = vmatprep.mubr.msk.bf16.mxu0 %vm4388_vm2, %v4387_v17  ;;  %4145 = vmatpush3.bf16.msra.mxu0 %v4258_v39 }
0x1648   : > { %4146 = vmatprep.subr.bf16.mxu0 %v4387_v17  ;;  %4157 = vmatpush3.bf16.msra.mxu1 %v4262_v54 }
0x1649   : > { %v4131_v61 = vpop.f32.mrf.mxu1  ;;  %4158 = vmatprep.subr.bf16.mxu1 %v4387_v17 }
0x164c   : > { %4159 = vmatpush3.bf16.msra.mxu1 %v4263_v14 }
0x164d   : > { %4160 = vmatprep.subr.bf16.mxu1 %v4387_v17 }
0x1650   : > { %4161 = vmatpush3.bf16.msra.mxu1 %v4264_v55 }
0x1651   : > { %4162 = vmatprep.subr.bf16.mxu1 %v4387_v17 }
0x1654   : > { %4163 = vmatpush3.bf16.msra.mxu1 %v4265_v56 }
0x1655   : > { %4164 = vmatprep.subr.bf16.mxu1 %v4387_v17 }
0x1658   : > { %4165 = vmatpush3.bf16.msra.mxu1 %v4266_v57  ;;  %v3849_v57 = vld [vmem:[%s5179_s7] ss:$0 sm:$0xff] }
0x1659   : > { %4166 = vmatprep.subr.bf16.mxu1 %v4387_v17 }
0x165c   : > { %4167 = vmatpush3.bf16.msra.mxu1 %v4267_v58 }
0x16fe   : > { %v3101_v19 = vpop.f32.mrf.mxu1 }
0x1700   : > { %v4142_v20 = vpop.f32.mrf.mxu1 }
0x1702   : > { %v3104_v21 = vpop.f32.mrf.mxu1 }
0x1704   : > { %v4143_v22 = vpop.f32.mrf.mxu1 }
0x1706   : > { %v3058_v24 = vpop.f32.mrf.mxu0 }
0x1707   : > { %v3102_v25 = vadd.f32 %v3101_v19, %v3058_v24 }
0x1708   : > { %v4136_v26 = vpop.f32.mrf.mxu0 }
0x1709   : > { %v3108_v27 = vadd.f32 %v3102_v25, %v4858_v3  ;;  %v4259_v3 = vld [vmem:[%s4625_s14] sm:$0xff]  }
0x170a   : > { %v3061_v29 = vpop.f32.mrf.mxu0  ;;  %4147 = vmatpush3.bf16.msra.mxu0 %v4259_v3 }
0x170b   : > { %v5029_v30 = vadd.f32 %v4992_v36, %v3108_v27  ;;  %4172 = vmatprep.subr.bf16.mxu0 %v4387_v17 }
0x170c   : > { %v4137_v42 = vpop.f32.mrf.mxu0 }
0x170d   : > { %v3123_v31 = vsel %vm1248_vm1, %v5029_v30, 0.0  ;;  %v3847_v42 = vld [vmem:[%s1229_s30] ss:$0 sm:$0xff]  ;;  %s5178_s30 = sld [smem:[#allocation28_spill]] }
0x170e   : > { %3124 = vadd.xlane.f32.xlu0 %v3123_v31 }
0x1713   : > { %v3848_v54 = vld [vmem:[%s5178_s30] ss:$0 sm:$0xff] }
0x1797   : > { %v3125_v41 = vpop.xlane.xlu0 %3124 }
0x1798   : > { %v3127_v32 = vmul.f32 0.03125, %v3125_v41 }
0x179a   : > { %v3129_v12 = vsub.f32 %v5029_v30, %v3127_v32 }
0x179c   : > { %v3131_v16 = vmul.f32 %v3129_v12, %v3129_v12 }
0x179e   : > { %v3135_v33 = vsel %vm1248_vm1, %v3131_v16, 0.0 }
0x179f   : > { %3136 = vadd.xlane.f32.xlu0 %v3135_v33 }
0x1828   : > { %v3137_v11 = vpop.xlane.xlu0 %3136 }
0x1829   : > { %v3139_v36 = vmul.f32 0.03125, %v3137_v11 }
0x182b   : > { %v3141_v38 = vadd.f32 1e-05, %v3139_v36 }
0x182d   : > { %4320 = vrsqrt.f32 %v3141_v38 }
0x183a   : > { %v4321_v44 = vpop.eup %4320 }
0x183b   : > { %v3145_v46 = vmul.f32 %v4321_v44, %v3129_v12  ;;  %v4268_v44 = vld [vmem:[%s5177_s13 + $0x8] sm:$0xff]  }
0x183d   : > { %v3153_v48 = vmul.f32 %v3833_v43, %v3145_v46  ;;  %v4269_v46 = vld [vmem:[%s5177_s13] sm:$0xff]  }
0x183f   : > { %v3161_v50 = vadd.f32 %v3834_v47, %v3153_v48 }
0x1841   : > { %v3162_v51 = vpack.c.bf16 %v3161_v50, %v3160_v2 }
0x1843   : > { %4149 = vmatmul.mubr.msk.bf16.vlgmr.msra.gmra.mxu0 %vm1248_vm1, %v3162_v51 }
0x1844   : > { %4176 = vmatprep.mubr.msk.bf16.mxu0 %vm4388_vm2, %v4387_v17  ;;  %4173 = vmatpush3.bf16.msra.mxu0 %v4268_v44 }
0x1845   : > { %4174 = vmatprep.subr.bf16.mxu0 %v4387_v17 }
0x1848   : > { %4175 = vmatpush3.bf16.msra.mxu0 %v4269_v46 }
0x1903   : > { %v3223_v63 = vpop.f32.mrf.mxu0 }
0x1904   : > { %v3224_v0 = vadd.f32 %v3835_v59, %v3223_v63 }
0x1905   : > { %v4150_v1 = vpop.f32.mrf.mxu0 }
0x1906   : > { %v3232_v49 = vmul.f32 0.044715, %v3224_v0  ;;  %v3230_v21 = vmul.f32 0.5, %v3224_v0 }
0x1907   : > { %v3226_v45 = vpop.f32.mrf.mxu0 }
0x1908   : > { %v3234_v4 = vmul.f32 %v3232_v49, %v3224_v0  ;;  %v3227_v5 = vadd.f32 %v3835_v59, %v3226_v45 }
0x1909   : > { %v4151_v6 = vpop.f32.mrf.mxu0 }
0x190a   : > { %v3236_v7 = vmul.f32 %v3234_v4, %v3224_v0  ;;  %v3233_v8 = vmul.f32 0.044715, %v3227_v5  ;;  %v3231_v22 = vmul.f32 0.5, %v3227_v5 }
0x190c   : > { %v3238_v9 = vadd.f32 %v3236_v7, %v3224_v0  ;;  %v3235_v10 = vmul.f32 %v3233_v8, %v3227_v5 }
0x190e   : > { %v3240_v13 = vmul.f32 0.7978846, %v3238_v9  ;;  %v3237_v15 = vmul.f32 %v3235_v10, %v3227_v5 }
0x1910   : > { %4322 = vtanh.f32 %v3240_v13  ;;  %v3239_v18 = vadd.f32 %v3237_v15, %v3227_v5 }
0x1912   : > { %v3241_v60 = vmul.f32 0.7978846, %v3239_v18 }
0x1914   : > { %4324 = vtanh.f32 %v3241_v60 }
0x191d   : > { %v4323_v61 = vpop.eup %4322 }
0x191e   : > { %v3244_v19 = vadd.f32 1.0, %v4323_v61 }
0x1920   : > { %v3246_v25 = vmul.f32 %v3244_v19, %v3230_v21 }
0x1921   : > { %v4325_v20 = vpop.eup %4324 }
0x1922   : > { %v3245_v24 = vadd.f32 1.0, %v4325_v20 }
0x1924   : > { %v3247_v26 = vmul.f32 %v3245_v24, %v3231_v22 }
0x1926   : > { %v3248_v27 = vpack.c.bf16 %v3247_v26, %v3246_v25 }
0x1928   : > { %4169 = vmatmul.mubr.bf16.vlgmr.msra.gmra.mxu1 %v3248_v27 }
0x19e8   : > { %v3347_v29 = vpop.f32.mrf.mxu1 }
0x19e9   : > { %v3354_v31 = vadd.f32 %v3347_v29, %v4995_v37 }
0x19ea   : > { %v4170_v41 = vpop.f32.mrf.mxu1 }
0x19eb   : > { %v3363_v32 = vadd.f32 %v3847_v42, %v3354_v31 }
0x19ec   : > { %v3350_v12 = vpop.f32.mrf.mxu1 }
0x19ed   : > { %3365 = vst.msk [vmem:[#allocation2] sm:$0xff] %vm1248_vm1, %v3363_v32  ;;  %v3355_v16 = vadd.f32 %v3350_v12, %v5029_v30  ;;  %v3369_v33 = vsel %vm1248_vm1, %v3363_v32, 0.0 }
0x19ee   : > { %3370 = vadd.xlane.f32.xlu1 %v3369_v33  ;;  %v4171_v39 = vpop.f32.mrf.mxu1 }
0x19ef   : > { %v3364_v3 = vadd.f32 %v3847_v42, %v3355_v16 }
0x19f1   : > { %3366 = vst.msk [vmem:[#allocation2 + $0x8] sm:$0xff] %vm1248_vm1, %v3364_v3  ;;  %v3372_v34 = vsel %vm1248_vm1, %v3364_v3, 0.0 }
0x19f2   : > { %3373 = vadd.xlane.f32.xlu0 %v3372_v34 }
0x1a77   : > { %v3371_v37 = vpop.xlane.xlu1 %3370 }
0x1a78   : > { %v3375_v35 = vmul.f32 0.03125, %v3371_v37 }
0x1a7a   : > { %v3377_v62 = vsub.f32 %v3363_v32, %v3375_v35 }
0x1a7b   : > { %v3374_v11 = vpop.xlane.xlu0 %3373 }
0x1a7c   : > { %v3376_v36 = vmul.f32 0.03125, %v3374_v11  ;;  %v3379_v38 = vmul.f32 %v3377_v62, %v3377_v62 }
0x1a7e   : > { %v3378_v40 = vsub.f32 %v3364_v3, %v3376_v36  ;;  %v3381_v30 = vsel %vm1248_vm1, %v3379_v38, 0.0 }
0x1a7f   : > { %3382 = vadd.xlane.f32.xlu1 %v3381_v30 }
0x1a80   : > { %v3380_v23 = vmul.f32 %v3378_v40, %v3378_v40 }
0x1a82   : > { %v3384_v43 = vsel %vm1248_vm1, %v3380_v23, 0.0 }
0x1a83   : > { %3385 = vadd.xlane.f32.xlu0 %v3384_v43 }
0x1b08   : > { %v3383_v28 = vpop.xlane.xlu1 %3382 }
0x1b09   : > { %v3387_v47 = vmul.f32 0.03125, %v3383_v28 }
0x1b0b   : > { %v3389_v48 = vadd.f32 1e-05, %v3387_v47 }
0x1b0c   : > { %v3386_v2 = vpop.xlane.xlu0 %3385 }
0x1b0d   : > { %4326 = vrsqrt.f32 %v3389_v48  ;;  %v3388_v50 = vmul.f32 0.03125, %v3386_v2 }
0x1b0f   : > { %v3390_v51 = vadd.f32 1e-05, %v3388_v50 }
0x1b11   : > { %4328 = vrsqrt.f32 %v3390_v51 }
0x1b1a   : > { %v4327_v52 = vpop.eup %4326 }
0x1b1b   : > { %v3393_v53 = vmul.f32 %v4327_v52, %v3377_v62 }
0x1b1d   : > { %v3401_v56 = vmul.f32 %v3848_v54, %v3393_v53 }
0x1b1e   : > { %v4329_v14 = vpop.eup %4328 }
0x1b1f   : > { %v3394_v55 = vmul.f32 %v4329_v14, %v3378_v40  ;;  %v3409_v58 = vadd.f32 %v3849_v57, %v3401_v56 }
0x1b21   : > { %v3402_v17 = vmul.f32 %v3848_v54, %v3394_v55 }
0x1b23   : > { %v3410_v59 = vadd.f32 %v3849_v57, %v3402_v17 }
0x1b25   : > { %v3411_v63 = vpack.c.bf16 %v3410_v59, %v3409_v58 }
0x1b27   : > { %4177 = vmatmul.mubr.msk.bf16.vlgmr.msra.gmra.mxu0 %vm1248_vm1, %v3411_v63 }
0x1be7   : > { %v3465_v0 = vpop.f32.mrf.mxu0 }
0x1be8   : > { %3472 = vst [vmem:[%s5180_s10] sm:$0xff] %v3465_v0 }
0x1be9   : > { %v4178_v1 = vpop.f32.mrf.mxu0 }
0x1beb   : > { %v3468_v49 = vpop.f32.mrf.mxu0 }
0x1bec   : > { %3473 = vst [vmem:[%s5180_s10 + $0x8] sm:$0xff] %v3468_v49 }
0x1bed   : > { %v4179_v45 = vpop.f32.mrf.mxu0 }
0x1bee PF: > { %s5181_s18 = sld [smem:[#allocation32_spill]] }
0x1bf4   : > { %s70_s7 = sadd.s32 1, %s5181_s18  }
0x1bf5   : > { %p67_p2 = scmp.ge.s32.totalorder %s70_s7, 4  }
0x1bf7   :  { %69 = sbr.rel (!%p67_p2) target bundleno = 64 (0x40), region = 262 }
0x1bfc   :  { %3485 = vsyncpa [#allocation4], 1 }
0x1bfd   :  { %3487 = vsyncpa [#allocation4 + $0x1], 1 }

</bundles_post_ra>
